<compile_context>
chip_gen: v5e
topology: v5e:2x2
jax: 0.10.0
libtpu: 0.0.40
codegen_flags: <defaults>
</compile_context>

<pallas_src>
import functools

import jax
import jax.numpy as jnp
from jax.experimental import pallas as pl
from jax.experimental.pallas import tpu as pltpu


# ----------------------------------------------------------------------------
# Fused kernel (one grid step == one batch image, lane-packed layout)
# ----------------------------------------------------------------------------

def _fused_kernel(x_ref, w_red_ref, w_f1_ref, band_ref, bias_ref,
                  hband_ref, hbias_ref,
                  seg_feats_ref, edge_feats_ref, seg_sup_ref, edge_sup_ref,
                  pad_ref, *, H, W, C, NP, pools, pmax):
    f32 = jnp.float32
    WC = W * C                       # lane width of an activation slab
    WIDE = (W + 2) * C               # lane width of a radius-1 conv window
    WPC = (W + 2 * pmax) * C         # lane width of the padded scratch

    # Zero the padded scratch once per grid step.  Every later stage only
    # overwrites the interior, so the zero border supplies the conv / pool
    # zero padding for every stage.
    pad_ref[...] = jnp.zeros_like(pad_ref)

    def mm(a, w):
        return jnp.dot(a, w, preferred_element_type=f32)

    def write_pad(v):                # v: (H, W*C) lane-packed activation
        pad_ref[:, pmax:pmax + H, pmax * C:pmax * C + WC] = v.reshape(1, H, WC)

    def rows_wide(dy):               # (H, (W+2)*C): rows shifted by dy-1, wide lanes
        r0 = pmax - 1 + dy
        c0 = (pmax - 1) * C
        return pad_ref[:, r0:r0 + H, c0:c0 + WIDE].reshape(H, WIDE)

    def conv3x3_on_pad(idxs, bands_ref, biases_ref):
        # Shared wide-row loads; one banded MXU matmul per row offset per branch.
        r = [rows_wide(dy) for dy in range(3)]
        return [mm(r[0], bands_ref[i, 0]) + mm(r[1], bands_ref[i, 1]) +
                mm(r[2], bands_ref[i, 2]) + biases_ref[i] for i in idxs]

    def pools_on_pad():
        # Separable stride-1 avg pools (count_include_pad=True semantics).
        kmax = max(pools)
        po = (kmax - 1) // 2
        rows = [pad_ref[:, pmax - po + dy:pmax - po + dy + H, :].reshape(H, WPC)
                for dy in range(kmax)]
        outs = []
        for k in pools:
            p = (k - 1) // 2
            off = po - p
            v = rows[off]
            for dy in range(1, k):            # vertical sum
                v = v + rows[off + dy]
            c0 = (pmax - p) * C
            h = v[:, c0:c0 + WC]
            for dx in range(1, k):            # horizontal sum (lane slices)
                h = h + v[:, c0 + dx * C:c0 + dx * C + WC]
            outs.append(h * (1.0 / float(k * k)))
        return outs

    # 1) reduce_conv: 1x1 (Cin->C) as one block-diagonal full-width matmul.
    x0 = mm(x_ref[...].reshape(H, x_ref.shape[-1]).astype(f32), w_red_ref[...])

    # 2) edge poolings on x0 (share one padded buffer).
    write_pad(x0)
    edge1, edge2 = pools_on_pad()

    # 3) fuse_conv: 1x1(3C->C)+ReLU over the implicit concat [x0, edge1, edge2]
    #    (three K=128 block-diag matmuls), then dw3x3+BN+1x1 with the depthwise
    #    weight & BN folded into banded matmul weights.
    y = mm(x0, w_f1_ref[0]) + mm(edge1, w_f1_ref[1]) + mm(edge2, w_f1_ref[2])
    y = jnp.maximum(y, 0.0)
    write_pad(y)
    (x1,) = conv3x3_on_pad([0], band_ref, bias_ref)

    # 4) edge / seg branches share the padded x1 (wide-row loads hoisted).
    write_pad(x1)
    edge_x, seg_x = conv3x3_on_pad([1, 2], band_ref, bias_ref)

    # 5) attention branches + fused gating (1 - sigmoid(a) == sigmoid(-a); EUP).
    write_pad(edge_x)
    (att_e,) = conv3x3_on_pad([3], band_ref, bias_ref)
    write_pad(seg_x)
    (att_s,) = conv3x3_on_pad([4], band_ref, bias_ref)

    edge_feats = edge_x + jax.nn.sigmoid(-att_e) * seg_x
    seg_feats = seg_x + jax.nn.sigmoid(-att_s) * edge_x
    edge_feats_ref[...] = edge_feats.reshape(1, H, WC).astype(edge_feats_ref.dtype)
    seg_feats_ref[...] = seg_feats.reshape(1, H, WC).astype(seg_feats_ref.dtype)

    # 6) supervision heads: full 3x3 conv + bias, class dim lane-padded to NP.
    write_pad(edge_feats)
    (edge_sup,) = conv3x3_on_pad([0], hband_ref, hbias_ref)
    write_pad(seg_feats)
    (seg_sup,) = conv3x3_on_pad([1], hband_ref, hbias_ref)
    edge_sup_ref[...] = edge_sup.reshape(1, H, W * NP).astype(edge_sup_ref.dtype)
    seg_sup_ref[...] = seg_sup.reshape(1, H, W * NP).astype(seg_sup_ref.dtype)


# ----------------------------------------------------------------------------
# Wrapper-side weight packing helpers (block-diagonal / banded matmul weights)
# ----------------------------------------------------------------------------

def _banded_conv_weights(W, C, taps9):
    # taps9: list of 9 per-tap (C, Cout) matrices, tap index t = dy*3 + dx.
    # Returns (3, (W+2)*C, W*Cout): for each dy, a band so that
    #   out[x*Cout+co] = sum_{dx,ci} window[(x+dx)*C+ci] * taps9[dy*3+dx][ci,co]
    Cout = taps9[0].shape[-1]
    eye = jnp.eye(W, dtype=jnp.float32)
    bands = []
    for dy in range(3):
        b = jnp.zeros(((W + 2) * C, W * Cout), jnp.float32)
        for dx in range(3):
            b = b.at[dx * C:dx * C + W * C, :].add(jnp.kron(eye, taps9[dy * 3 + dx]))
        bands.append(b)
    return jnp.stack(bands)


# ----------------------------------------------------------------------------
# Wrapper (external NCHW; internal lane-packed (H, W*C) rows per image)
# ----------------------------------------------------------------------------

def multitask_net_forward(x_nchw, params, *, edge_poolings=(3, 5)):
    B, Cin, H, W = x_nchw.shape
    C = params['reduce_w'].shape[1]
    ncls = params['edge_sup_w'].shape[-1]
    pools = tuple(int(k) for k in edge_poolings)
    for k in pools:
        assert k % 2 == 1, "stride-1 'same' avg pooling requires odd kernels"
    pmax = max(1, max((k - 1) // 2 for k in pools))
    NP = ((ncls + 7) // 8) * 8          # lane-pad the class dim

    # NCHW -> lane-packed rows: (B, H, W*Cin), lane index = w*Cin + cin.
    x_pack = jnp.transpose(x_nchw, (0, 2, 3, 1)).reshape(B, H, W * Cin)

    eye = jnp.eye(W, dtype=jnp.float32)

    def blockdiag(m):                   # (ci, co) -> (W*ci, W*co)
        return jnp.kron(eye, m)

    # 1x1 convs as block-diagonal full-width matmul weights.
    w_red = blockdiag(params['reduce_w'])                          # (W*Cin, W*C)
    w_f1 = jnp.stack([blockdiag(params['fuse_pw1'][j * C:(j + 1) * C])
                      for j in range(3)])                          # (3, W*C, W*C)

    # depthwise3x3 + BN + 1x1 branches: fold dw*bn_scale into the pointwise
    # weight, bn_bias through the pointwise into a per-lane bias.
    branch = (('fuse', 'fuse_pw2'), ('edge_conv', 'edge_conv_pw'),
              ('seg_conv', 'seg_conv_pw'), ('att_edge', 'att_edge_pw'),
              ('att_seg', 'att_seg_pw'))
    bands, biases = [], []
    for nm, pwk in branch:
        dw = params[f'{nm}_dw']                     # (9, C)
        s = params[f'{nm}_bn_scale']                # (1, C)
        b0 = params[f'{nm}_bn_bias']                # (1, C)
        pw = params[pwk]                            # (C, C)
        taps9 = [(dw[t] * s[0])[:, None] * pw for t in range(9)]
        bands.append(_banded_conv_weights(W, C, taps9))            # (3,(W+2)C,W*C)
        biases.append(jnp.tile(b0 @ pw, (1, W)))                   # (1, W*C)
    band = jnp.stack(bands)                                        # (5,3,(W+2)C,W*C)
    bias = jnp.stack(biases)                                       # (5,1,W*C)

    # 3x3 supervision heads (full conv + bias), class dim lane-padded to NP.
    hbands, hbiases = [], []
    for wk, bk in (('edge_sup_w', 'edge_sup_b'), ('seg_sup_w', 'seg_sup_b')):
        wpad = jnp.pad(params[wk], ((0, 0), (0, 0), (0, NP - ncls)))   # (9,C,NP)
        taps9 = [wpad[t] for t in range(9)]
        hbands.append(_banded_conv_weights(W, C, taps9))           # (3,(W+2)C,W*NP)
        hbiases.append(jnp.tile(jnp.pad(params[bk], ((0, 0), (0, NP - ncls))),
                                (1, W)))                           # (1, W*NP)
    hband = jnp.stack(hbands)                                      # (2,3,(W+2)C,W*NP)
    hbias = jnp.stack(hbiases)                                     # (2,1,W*NP)

    kernel = functools.partial(_fused_kernel, H=H, W=W, C=C, NP=NP,
                               pools=pools, pmax=pmax)

    out_shape = (jax.ShapeDtypeStruct((B, H, W * C), jnp.float32),
                 jax.ShapeDtypeStruct((B, H, W * C), jnp.float32),
                 jax.ShapeDtypeStruct((B, H, W * NP), jnp.float32),
                 jax.ShapeDtypeStruct((B, H, W * NP), jnp.float32))

    feat_spec = pl.BlockSpec((1, H, W * C), lambda b: (b, 0, 0))
    sup_spec = pl.BlockSpec((1, H, W * NP), lambda b: (b, 0, 0))

    seg_feats, edge_feats, seg_sup, edge_sup = pl.pallas_call(
        kernel,
        out_shape=out_shape,
        grid_spec=pltpu.PrefetchScalarGridSpec(
            num_scalar_prefetch=0,
            grid=(B,),
            in_specs=[
                pl.BlockSpec((1, H, W * Cin), lambda b: (b, 0, 0)),
                pl.BlockSpec(w_red.shape, lambda b: (0, 0)),
                pl.BlockSpec(w_f1.shape, lambda b: (0, 0, 0)),
                pl.BlockSpec(band.shape, lambda b: (0, 0, 0, 0)),
                pl.BlockSpec(bias.shape, lambda b: (0, 0, 0)),
                pl.BlockSpec(hband.shape, lambda b: (0, 0, 0, 0)),
                pl.BlockSpec(hbias.shape, lambda b: (0, 0, 0)),
            ],
            out_specs=[feat_spec, feat_spec, sup_spec, sup_spec],
            scratch_shapes=[pltpu.VMEM(
                (1, H + 2 * pmax, (W + 2 * pmax) * C), jnp.float32)]),
        compiler_params=pltpu.CompilerParams(
            dimension_semantics=("parallel",)),
    )(x_pack, w_red, w_f1, band, bias, hband, hbias)

    def feats_to_nchw(t):
        return jnp.transpose(t.reshape(B, H, W, C), (0, 3, 1, 2))

    def sup_to_nchw(t):
        return jnp.transpose(t.reshape(B, H, W, NP)[..., :ncls], (0, 3, 1, 2))

    return (feats_to_nchw(seg_feats), feats_to_nchw(edge_feats),
            sup_to_nchw(seg_sup), sup_to_nchw(edge_sup))


# ----------------------------------------------------------------------------
# Parameters (deterministic synthetic init; shapes match the PyTorch module)
# ----------------------------------------------------------------------------

def init_params(key, n_class, in_channels, out_channels):
    C = out_channels
    keys = iter(jax.random.split(key, 48))

    def nrm(shape, scale=0.1):
        return scale * jax.random.normal(next(keys), shape, jnp.float32)

    def bn(cc):
        gamma = 1.0 + 0.1 * jax.random.normal(next(keys), (cc,), jnp.float32)
        beta = 0.1 * jax.random.normal(next(keys), (cc,), jnp.float32)
        mean = 0.05 * jax.random.normal(next(keys), (cc,), jnp.float32)
        var = jnp.abs(1.0 + 0.1 * jax.random.normal(next(keys), (cc,), jnp.float32))
        eps = 1e-5
        scale = gamma / jnp.sqrt(var + eps)
        bias = beta - mean * scale
        return scale.reshape(1, cc), bias.reshape(1, cc)

    p = {}
    # reduce_conv: Conv2d(in_channels, C, 1, bias=False) -> matmul weight (Cin, C)
    p['reduce_w'] = nrm((in_channels, C))
    # fuse_conv: 1x1(3C->C) + ReLU + depthwise3x3(C) + BN + 1x1(C->C)
    p['fuse_pw1'] = nrm((3 * C, C))
    p['fuse_dw'] = nrm((9, C))          # depthwise weights, (ky*3+kx, channel)
    p['fuse_bn_scale'], p['fuse_bn_bias'] = bn(C)
    p['fuse_pw2'] = nrm((C, C))
    # edge_conv / seg_conv / att_edge / att_seg: depthwise3x3 + BN + 1x1
    for name in ('edge_conv', 'seg_conv', 'att_edge', 'att_seg'):
        p[f'{name}_dw'] = nrm((9, C))
        p[f'{name}_bn_scale'], p[f'{name}_bn_bias'] = bn(C)
        p[f'{name}_pw'] = nrm((C, C))
    # supervision heads: Conv2d(C, n_class, 3, padding=1) with bias
    p['edge_sup_w'] = nrm((9, C, n_class))
    p['edge_sup_b'] = nrm((1, n_class))
    p['seg_sup_w'] = nrm((9, C, n_class))
    p['seg_sup_b'] = nrm((1, n_class))
    return p


# ----------------------------------------------------------------------------
# Main
# ----------------------------------------------------------------------------

if __name__ == "__main__":
    n_class, in_channels, out_channels = 3, 8, 8
    B, H, W = 2, 16, 16
    edge_poolings = (3, 5)

    key = jax.random.PRNGKey(0)
    kx, kp = jax.random.split(key)
    x = jax.random.normal(kx, (B, in_channels, H, W), jnp.float32)
    params = init_params(kp, n_class, in_channels, out_channels)

    fwd = jax.jit(functools.partial(multitask_net_forward,
                                    edge_poolings=edge_poolings))
    seg_feats, edge_feats, seg_sup, edge_sup = fwd(x, params)
    jax.block_until_ready((seg_feats, edge_feats, seg_sup, edge_sup))

    assert seg_feats.shape == (B, out_channels, H, W)
    assert edge_feats.shape == (B, out_channels, H, W)
    assert seg_sup.shape == (B, n_class, H, W)
    assert edge_sup.shape == (B, n_class, H, W)
    print("KERNEL_OK")
</pallas_src>

<mosaic_0001>
module attributes {stable_mosaic.version = 11 : i64} {
  func.func @_fused_kernel(%arg0: i32, %arg1: memref<1x16x128xf32, #tpu.memory_space<vmem>>, %arg2: memref<128x128xf32, #tpu.memory_space<vmem>>, %arg3: memref<3x128x128xf32, #tpu.memory_space<vmem>>, %arg4: memref<5x3x144x128xf32, #tpu.memory_space<vmem>>, %arg5: memref<5x1x128xf32, #tpu.memory_space<vmem>>, %arg6: memref<2x3x144x128xf32, #tpu.memory_space<vmem>>, %arg7: memref<2x1x128xf32, #tpu.memory_space<vmem>>, %arg8: memref<1x16x128xf32, #tpu.memory_space<vmem>>, %arg9: memref<1x16x128xf32, #tpu.memory_space<vmem>>, %arg10: memref<1x16x128xf32, #tpu.memory_space<vmem>>, %arg11: memref<1x16x128xf32, #tpu.memory_space<vmem>>, %arg12: memref<1x20x160xf32, #tpu.memory_space<vmem>>) attributes {dimension_semantics = [#tpu.dimension_semantics<parallel>], iteration_bounds = array<i64: 2>, scalar_prefetch = 0 : i64, scratch_operands = 1 : i64, tpu.core_type = #tpu.core_type<tc>, window_params = [{transform_indices = @transform_0, window_bounds = array<i64: 1, 16, 128>}, {pipeline_mode = #tpu.pipeline_mode<synchronous>, transform_indices = @transform_1, window_bounds = array<i64: 128, 128>}, {pipeline_mode = #tpu.pipeline_mode<synchronous>, transform_indices = @transform_2, window_bounds = array<i64: 3, 128, 128>}, {pipeline_mode = #tpu.pipeline_mode<synchronous>, transform_indices = @transform_3, window_bounds = array<i64: 5, 3, 144, 128>}, {pipeline_mode = #tpu.pipeline_mode<synchronous>, transform_indices = @transform_4, window_bounds = array<i64: 5, 1, 128>}, {pipeline_mode = #tpu.pipeline_mode<synchronous>, transform_indices = @transform_5, window_bounds = array<i64: 2, 3, 144, 128>}, {pipeline_mode = #tpu.pipeline_mode<synchronous>, transform_indices = @transform_6, window_bounds = array<i64: 2, 1, 128>}, {transform_indices = @transform_7, window_bounds = array<i64: 1, 16, 128>}, {transform_indices = @transform_8, window_bounds = array<i64: 1, 16, 128>}, {transform_indices = @transform_9, window_bounds = array<i64: 1, 16, 128>}, {transform_indices = @transform_10, window_bounds = array<i64: 1, 16, 128>}]} {
    %cst = arith.constant 0.000000e+00 : f32
    %0 = vector.broadcast %cst : f32 to vector<1x20x160xf32>
    %c0 = arith.constant 0 : index
    %c0_0 = arith.constant 0 : index
    %c0_1 = arith.constant 0 : index
    %1 = vector.load %arg12[%c0, %c0_0, %c0_1] : memref<1x20x160xf32, #tpu.memory_space<vmem>>, vector<1x20x160xf32>
    tpu.vector_store %arg12[%c0, %c0_0, %c0_1], %0 {strides = array<i32>} : memref<1x20x160xf32, #tpu.memory_space<vmem>>, vector<1x20x160xf32>,
    %c0_2 = arith.constant 0 : index
    %c0_3 = arith.constant 0 : index
    %c0_4 = arith.constant 0 : index
    %2 = vector.load %arg1[%c0_2, %c0_3, %c0_4] : memref<1x16x128xf32, #tpu.memory_space<vmem>>, vector<1x16x128xf32>
    %3 = vector.shape_cast %2 : vector<1x16x128xf32> to vector<16x128xf32>
    %c0_5 = arith.constant 0 : index
    %c0_6 = arith.constant 0 : index
    %4 = vector.load %arg2[%c0_5, %c0_6] : memref<128x128xf32, #tpu.memory_space<vmem>>, vector<128x128xf32>
    %cst_7 = arith.constant dense<0.000000e+00> : vector<16x128xf32>
    %5 = tpu.matmul %3, %4, %cst_7 {dimension_numbers = #tpu.dot_dimension_numbers<[1], [0], [0], [1], [0, 0, 1, 1], [], []>} : vector<16x128xf32>, vector<128x128xf32>, vector<16x128xf32> -> vector<16x128xf32>
    %6 = vector.shape_cast %5 : vector<16x128xf32> to vector<1x16x128xf32>
    %c0_8 = arith.constant 0 : index
    %c2 = arith.constant 2 : index
    %c16 = arith.constant 16 : index
    %7 = vector.load %arg12[%c0_8, %c2, %c16] : memref<1x20x160xf32, #tpu.memory_space<vmem>>, vector<1x16x128xf32>
    tpu.vector_store %arg12[%c0_8, %c2, %c16], %6 {strides = array<i32>} : memref<1x20x160xf32, #tpu.memory_space<vmem>>, vector<1x16x128xf32>,
    %c0_9 = arith.constant 0 : index
    %c0_10 = arith.constant 0 : index
    %c0_11 = arith.constant 0 : index
    %8 = vector.load %arg12[%c0_9, %c0_10, %c0_11] : memref<1x20x160xf32, #tpu.memory_space<vmem>>, vector<1x16x160xf32>
    %9 = vector.shape_cast %8 : vector<1x16x160xf32> to vector<16x160xf32>
    %c0_12 = arith.constant 0 : index
    %c1 = arith.constant 1 : index
    %c0_13 = arith.constant 0 : index
    %10 = vector.load %arg12[%c0_12, %c1, %c0_13] : memref<1x20x160xf32, #tpu.memory_space<vmem>>, vector<1x16x160xf32>
    %11 = vector.shape_cast %10 : vector<1x16x160xf32> to vector<16x160xf32>
    %c0_14 = arith.constant 0 : index
    %c2_15 = arith.constant 2 : index
    %c0_16 = arith.constant 0 : index
    %12 = vector.load %arg12[%c0_14, %c2_15, %c0_16] : memref<1x20x160xf32, #tpu.memory_space<vmem>>, vector<1x16x160xf32>
    %13 = vector.shape_cast %12 : vector<1x16x160xf32> to vector<16x160xf32>
    %c0_17 = arith.constant 0 : index
    %c3 = arith.constant 3 : index
    %c0_18 = arith.constant 0 : index
    %14 = vector.load %arg12[%c0_17, %c3, %c0_18] : memref<1x20x160xf32, #tpu.memory_space<vmem>>, vector<1x16x160xf32>
    %15 = vector.shape_cast %14 : vector<1x16x160xf32> to vector<16x160xf32>
    %c0_19 = arith.constant 0 : index
    %c4 = arith.constant 4 : index
    %c0_20 = arith.constant 0 : index
    %16 = vector.load %arg12[%c0_19, %c4, %c0_20] : memref<1x20x160xf32, #tpu.memory_space<vmem>>, vector<1x16x160xf32>
    %17 = vector.shape_cast %16 : vector<1x16x160xf32> to vector<16x160xf32>
    %18 = arith.addf %11, %13 : vector<16x160xf32>
    %19 = arith.addf %18, %15 : vector<16x160xf32>
    %20 = vector.extract_strided_slice %19 {offsets = [0, 8], sizes = [16, 128], strides = [1, 1]} : vector<16x160xf32> to vector<16x128xf32>
    %21 = vector.extract_strided_slice %19 {offsets = [0, 16], sizes = [16, 128], strides = [1, 1]} : vector<16x160xf32> to vector<16x128xf32>
    %22 = arith.addf %20, %21 : vector<16x128xf32>
    %23 = vector.extract_strided_slice %19 {offsets = [0, 24], sizes = [16, 128], strides = [1, 1]} : vector<16x160xf32> to vector<16x128xf32>
    %24 = arith.addf %22, %23 : vector<16x128xf32>
    %cst_21 = arith.constant 0.111111112 : f32
    %25 = vector.broadcast %cst_21 : f32 to vector<16x128xf32>
    %26 = arith.mulf %24, %25 : vector<16x128xf32>
    %27 = arith.addf %9, %11 : vector<16x160xf32>
    %28 = arith.addf %27, %13 : vector<16x160xf32>
    %29 = arith.addf %28, %15 : vector<16x160xf32>
    %30 = arith.addf %29, %17 : vector<16x160xf32>
    %31 = vector.extract_strided_slice %30 {offsets = [0, 0], sizes = [16, 128], strides = [1, 1]} : vector<16x160xf32> to vector<16x128xf32>
    %32 = vector.extract_strided_slice %30 {offsets = [0, 8], sizes = [16, 128], strides = [1, 1]} : vector<16x160xf32> to vector<16x128xf32>
    %33 = arith.addf %31, %32 : vector<16x128xf32>
    %34 = vector.extract_strided_slice %30 {offsets = [0, 16], sizes = [16, 128], strides = [1, 1]} : vector<16x160xf32> to vector<16x128xf32>
    %35 = arith.addf %33, %34 : vector<16x128xf32>
    %36 = vector.extract_strided_slice %30 {offsets = [0, 24], sizes = [16, 128], strides = [1, 1]} : vector<16x160xf32> to vector<16x128xf32>
    %37 = arith.addf %35, %36 : vector<16x128xf32>
    %38 = vector.extract_strided_slice %30 {offsets = [0, 32], sizes = [16, 128], strides = [1, 1]} : vector<16x160xf32> to vector<16x128xf32>
    %39 = arith.addf %37, %38 : vector<16x128xf32>
    %cst_22 = arith.constant 4.000000e-02 : f32
    %40 = vector.broadcast %cst_22 : f32 to vector<16x128xf32>
    %41 = arith.mulf %39, %40 : vector<16x128xf32>
    %c0_23 = arith.constant 0 : index
    %c0_24 = arith.constant 0 : index
    %c0_25 = arith.constant 0 : index
    %42 = vector.load %arg3[%c0_23, %c0_24, %c0_25] : memref<3x128x128xf32, #tpu.memory_space<vmem>>, vector<1x128x128xf32>
    %43 = vector.shape_cast %42 : vector<1x128x128xf32> to vector<128x128xf32>
    %cst_26 = arith.constant dense<0.000000e+00> : vector<16x128xf32>
    %44 = tpu.matmul %5, %43, %cst_26 {dimension_numbers = #tpu.dot_dimension_numbers<[1], [0], [0], [1], [0, 0, 1, 1], [], []>} : vector<16x128xf32>, vector<128x128xf32>, vector<16x128xf32> -> vector<16x128xf32>
    %c1_27 = arith.constant 1 : index
    %c0_28 = arith.constant 0 : index
    %c0_29 = arith.constant 0 : index
    %45 = vector.load %arg3[%c1_27, %c0_28, %c0_29] : memref<3x128x128xf32, #tpu.memory_space<vmem>>, vector<1x128x128xf32>
    %46 = vector.shape_cast %45 : vector<1x128x128xf32> to vector<128x128xf32>
    %cst_30 = arith.constant dense<0.000000e+00> : vector<16x128xf32>
    %47 = tpu.matmul %26, %46, %cst_30 {dimension_numbers = #tpu.dot_dimension_numbers<[1], [0], [0], [1], [0, 0, 1, 1], [], []>} : vector<16x128xf32>, vector<128x128xf32>, vector<16x128xf32> -> vector<16x128xf32>
    %48 = arith.addf %44, %47 : vector<16x128xf32>
    %c2_31 = arith.constant 2 : index
    %c0_32 = arith.constant 0 : index
    %c0_33 = arith.constant 0 : index
    %49 = vector.load %arg3[%c2_31, %c0_32, %c0_33] : memref<3x128x128xf32, #tpu.memory_space<vmem>>, vector<1x128x128xf32>
    %50 = vector.shape_cast %49 : vector<1x128x128xf32> to vector<128x128xf32>
    %cst_34 = arith.constant dense<0.000000e+00> : vector<16x128xf32>
    %51 = tpu.matmul %41, %50, %cst_34 {dimension_numbers = #tpu.dot_dimension_numbers<[1], [0], [0], [1], [0, 0, 1, 1], [], []>} : vector<16x128xf32>, vector<128x128xf32>, vector<16x128xf32> -> vector<16x128xf32>
    %52 = arith.addf %48, %51 : vector<16x128xf32>
    %cst_35 = arith.constant 0.000000e+00 : f32
    %53 = vector.broadcast %cst_35 : f32 to vector<16x128xf32>
    %54 = arith.maximumf %52, %53 : vector<16x128xf32>
    %55 = vector.shape_cast %54 : vector<16x128xf32> to vector<1x16x128xf32>
    %c0_36 = arith.constant 0 : index
    %c2_37 = arith.constant 2 : index
    %c16_38 = arith.constant 16 : index
    %56 = vector.load %arg12[%c0_36, %c2_37, %c16_38] : memref<1x20x160xf32, #tpu.memory_space<vmem>>, vector<1x16x128xf32>
    tpu.vector_store %arg12[%c0_36, %c2_37, %c16_38], %55 {strides = array<i32>} : memref<1x20x160xf32, #tpu.memory_space<vmem>>, vector<1x16x128xf32>,
    %c0_39 = arith.constant 0 : index
    %c1_40 = arith.constant 1 : index
    %c8 = arith.constant 8 : index
    %57 = vector.load %arg12[%c0_39, %c1_40, %c8] : memref<1x20x160xf32, #tpu.memory_space<vmem>>, vector<1x16x144xf32>
    %58 = vector.shape_cast %57 : vector<1x16x144xf32> to vector<16x144xf32>
    %c0_41 = arith.constant 0 : index
    %c2_42 = arith.constant 2 : index
    %c8_43 = arith.constant 8 : index
    %59 = vector.load %arg12[%c0_41, %c2_42, %c8_43] : memref<1x20x160xf32, #tpu.memory_space<vmem>>, vector<1x16x144xf32>
    %60 = vector.shape_cast %59 : vector<1x16x144xf32> to vector<16x144xf32>
    %c0_44 = arith.constant 0 : index
    %c3_45 = arith.constant 3 : index
    %c8_46 = arith.constant 8 : index
    %61 = vector.load %arg12[%c0_44, %c3_45, %c8_46] : memref<1x20x160xf32, #tpu.memory_space<vmem>>, vector<1x16x144xf32>
    %62 = vector.shape_cast %61 : vector<1x16x144xf32> to vector<16x144xf32>
    %c0_47 = arith.constant 0 : index
    %c0_48 = arith.constant 0 : index
    %c0_49 = arith.constant 0 : index
    %c0_50 = arith.constant 0 : index
    %63 = vector.load %arg4[%c0_47, %c0_48, %c0_49, %c0_50] : memref<5x3x144x128xf32, #tpu.memory_space<vmem>>, vector<1x1x144x128xf32>
    %64 = vector.shape_cast %63 : vector<1x1x144x128xf32> to vector<144x128xf32>
    %cst_51 = arith.constant dense<0.000000e+00> : vector<16x128xf32>
    %65 = tpu.matmul %58, %64, %cst_51 {dimension_numbers = #tpu.dot_dimension_numbers<[1], [0], [0], [1], [0, 0, 1, 1], [], []>} : vector<16x144xf32>, vector<144x128xf32>, vector<16x128xf32> -> vector<16x128xf32>
    %c0_52 = arith.constant 0 : index
    %c1_53 = arith.constant 1 : index
    %c0_54 = arith.constant 0 : index
    %c0_55 = arith.constant 0 : index
    %66 = vector.load %arg4[%c0_52, %c1_53, %c0_54, %c0_55] : memref<5x3x144x128xf32, #tpu.memory_space<vmem>>, vector<1x1x144x128xf32>
    %67 = vector.shape_cast %66 : vector<1x1x144x128xf32> to vector<144x128xf32>
    %cst_56 = arith.constant dense<0.000000e+00> : vector<16x128xf32>
    %68 = tpu.matmul %60, %67, %cst_56 {dimension_numbers = #tpu.dot_dimension_numbers<[1], [0], [0], [1], [0, 0, 1, 1], [], []>} : vector<16x144xf32>, vector<144x128xf32>, vector<16x128xf32> -> vector<16x128xf32>
    %69 = arith.addf %65, %68 : vector<16x128xf32>
    %c0_57 = arith.constant 0 : index
    %c2_58 = arith.constant 2 : index
    %c0_59 = arith.constant 0 : index
    %c0_60 = arith.constant 0 : index
    %70 = vector.load %arg4[%c0_57, %c2_58, %c0_59, %c0_60] : memref<5x3x144x128xf32, #tpu.memory_space<vmem>>, vector<1x1x144x128xf32>
    %71 = vector.shape_cast %70 : vector<1x1x144x128xf32> to vector<144x128xf32>
    %cst_61 = arith.constant dense<0.000000e+00> : vector<16x128xf32>
    %72 = tpu.matmul %62, %71, %cst_61 {dimension_numbers = #tpu.dot_dimension_numbers<[1], [0], [0], [1], [0, 0, 1, 1], [], []>} : vector<16x144xf32>, vector<144x128xf32>, vector<16x128xf32> -> vector<16x128xf32>
    %73 = arith.addf %69, %72 : vector<16x128xf32>
    %c0_62 = arith.constant 0 : index
    %c0_63 = arith.constant 0 : index
    %c0_64 = arith.constant 0 : index
    %74 = vector.load %arg5[%c0_62, %c0_63, %c0_64] : memref<5x1x128xf32, #tpu.memory_space<vmem>>, vector<1x1x128xf32>
    %75 = vector.shape_cast %74 : vector<1x1x128xf32> to vector<1x128xf32>
    %76 = vector.broadcast %75 : vector<1x128xf32> to vector<16x128xf32>
    %77 = arith.addf %73, %76 : vector<16x128xf32>
    %78 = vector.shape_cast %77 : vector<16x128xf32> to vector<1x16x128xf32>
    %c0_65 = arith.constant 0 : index
    %c2_66 = arith.constant 2 : index
    %c16_67 = arith.constant 16 : index
    %79 = vector.load %arg12[%c0_65, %c2_66, %c16_67] : memref<1x20x160xf32, #tpu.memory_space<vmem>>, vector<1x16x128xf32>
    tpu.vector_store %arg12[%c0_65, %c2_66, %c16_67], %78 {strides = array<i32>} : memref<1x20x160xf32, #tpu.memory_space<vmem>>, vector<1x16x128xf32>,
    %c0_68 = arith.constant 0 : index
    %c1_69 = arith.constant 1 : index
    %c8_70 = arith.constant 8 : index
    %80 = vector.load %arg12[%c0_68, %c1_69, %c8_70] : memref<1x20x160xf32, #tpu.memory_space<vmem>>, vector<1x16x144xf32>
    %81 = vector.shape_cast %80 : vector<1x16x144xf32> to vector<16x144xf32>
    %c0_71 = arith.constant 0 : index
    %c2_72 = arith.constant 2 : index
    %c8_73 = arith.constant 8 : index
    %82 = vector.load %arg12[%c0_71, %c2_72, %c8_73] : memref<1x20x160xf32, #tpu.memory_space<vmem>>, vector<1x16x144xf32>
    %83 = vector.shape_cast %82 : vector<1x16x144xf32> to vector<16x144xf32>
    %c0_74 = arith.constant 0 : index
    %c3_75 = arith.constant 3 : index
    %c8_76 = arith.constant 8 : index
    %84 = vector.load %arg12[%c0_74, %c3_75, %c8_76] : memref<1x20x160xf32, #tpu.memory_space<vmem>>, vector<1x16x144xf32>
    %85 = vector.shape_cast %84 : vector<1x16x144xf32> to vector<16x144xf32>
    %c1_77 = arith.constant 1 : index
    %c0_78 = arith.constant 0 : index
    %c0_79 = arith.constant 0 : index
    %c0_80 = arith.constant 0 : index
    %86 = vector.load %arg4[%c1_77, %c0_78, %c0_79, %c0_80] : memref<5x3x144x128xf32, #tpu.memory_space<vmem>>, vector<1x1x144x128xf32>
    %87 = vector.shape_cast %86 : vector<1x1x144x128xf32> to vector<144x128xf32>
    %cst_81 = arith.constant dense<0.000000e+00> : vector<16x128xf32>
    %88 = tpu.matmul %81, %87, %cst_81 {dimension_numbers = #tpu.dot_dimension_numbers<[1], [0], [0], [1], [0, 0, 1, 1], [], []>} : vector<16x144xf32>, vector<144x128xf32>, vector<16x128xf32> -> vector<16x128xf32>
    %c1_82 = arith.constant 1 : index
    %c1_83 = arith.constant 1 : index
    %c0_84 = arith.constant 0 : index
    %c0_85 = arith.constant 0 : index
    %89 = vector.load %arg4[%c1_82, %c1_83, %c0_84, %c0_85] : memref<5x3x144x128xf32, #tpu.memory_space<vmem>>, vector<1x1x144x128xf32>
    %90 = vector.shape_cast %89 : vector<1x1x144x128xf32> to vector<144x128xf32>
    %cst_86 = arith.constant dense<0.000000e+00> : vector<16x128xf32>
    %91 = tpu.matmul %83, %90, %cst_86 {dimension_numbers = #tpu.dot_dimension_numbers<[1], [0], [0], [1], [0, 0, 1, 1], [], []>} : vector<16x144xf32>, vector<144x128xf32>, vector<16x128xf32> -> vector<16x128xf32>
    %92 = arith.addf %88, %91 : vector<16x128xf32>
    %c1_87 = arith.constant 1 : index
    %c2_88 = arith.constant 2 : index
    %c0_89 = arith.constant 0 : index
    %c0_90 = arith.constant 0 : index
    %93 = vector.load %arg4[%c1_87, %c2_88, %c0_89, %c0_90] : memref<5x3x144x128xf32, #tpu.memory_space<vmem>>, vector<1x1x144x128xf32>
    %94 = vector.shape_cast %93 : vector<1x1x144x128xf32> to vector<144x128xf32>
    %cst_91 = arith.constant dense<0.000000e+00> : vector<16x128xf32>
    %95 = tpu.matmul %85, %94, %cst_91 {dimension_numbers = #tpu.dot_dimension_numbers<[1], [0], [0], [1], [0, 0, 1, 1], [], []>} : vector<16x144xf32>, vector<144x128xf32>, vector<16x128xf32> -> vector<16x128xf32>
    %96 = arith.addf %92, %95 : vector<16x128xf32>
    %c1_92 = arith.constant 1 : index
    %c0_93 = arith.constant 0 : index
    %c0_94 = arith.constant 0 : index
    %97 = vector.load %arg5[%c1_92, %c0_93, %c0_94] : memref<5x1x128xf32, #tpu.memory_space<vmem>>, vector<1x1x128xf32>
    %98 = vector.shape_cast %97 : vector<1x1x128xf32> to vector<1x128xf32>
    %99 = vector.broadcast %98 : vector<1x128xf32> to vector<16x128xf32>
    %100 = arith.addf %96, %99 : vector<16x128xf32>
    %c2_95 = arith.constant 2 : index
    %c0_96 = arith.constant 0 : index
    %c0_97 = arith.constant 0 : index
    %c0_98 = arith.constant 0 : index
    %101 = vector.load %arg4[%c2_95, %c0_96, %c0_97, %c0_98] : memref<5x3x144x128xf32, #tpu.memory_space<vmem>>, vector<1x1x144x128xf32>
    %102 = vector.shape_cast %101 : vector<1x1x144x128xf32> to vector<144x128xf32>
    %cst_99 = arith.constant dense<0.000000e+00> : vector<16x128xf32>
    %103 = tpu.matmul %81, %102, %cst_99 {dimension_numbers = #tpu.dot_dimension_numbers<[1], [0], [0], [1], [0, 0, 1, 1], [], []>} : vector<16x144xf32>, vector<144x128xf32>, vector<16x128xf32> -> vector<16x128xf32>
    %c2_100 = arith.constant 2 : index
    %c1_101 = arith.constant 1 : index
    %c0_102 = arith.constant 0 : index
    %c0_103 = arith.constant 0 : index
    %104 = vector.load %arg4[%c2_100, %c1_101, %c0_102, %c0_103] : memref<5x3x144x128xf32, #tpu.memory_space<vmem>>, vector<1x1x144x128xf32>
    %105 = vector.shape_cast %104 : vector<1x1x144x128xf32> to vector<144x128xf32>
    %cst_104 = arith.constant dense<0.000000e+00> : vector<16x128xf32>
    %106 = tpu.matmul %83, %105, %cst_104 {dimension_numbers = #tpu.dot_dimension_numbers<[1], [0], [0], [1], [0, 0, 1, 1], [], []>} : vector<16x144xf32>, vector<144x128xf32>, vector<16x128xf32> -> vector<16x128xf32>
    %107 = arith.addf %103, %106 : vector<16x128xf32>
    %c2_105 = arith.constant 2 : index
    %c2_106 = arith.constant 2 : index
    %c0_107 = arith.constant 0 : index
    %c0_108 = arith.constant 0 : index
    %108 = vector.load %arg4[%c2_105, %c2_106, %c0_107, %c0_108] : memref<5x3x144x128xf32, #tpu.memory_space<vmem>>, vector<1x1x144x128xf32>
    %109 = vector.shape_cast %108 : vector<1x1x144x128xf32> to vector<144x128xf32>
    %cst_109 = arith.constant dense<0.000000e+00> : vector<16x128xf32>
    %110 = tpu.matmul %85, %109, %cst_109 {dimension_numbers = #tpu.dot_dimension_numbers<[1], [0], [0], [1], [0, 0, 1, 1], [], []>} : vector<16x144xf32>, vector<144x128xf32>, vector<16x128xf32> -> vector<16x128xf32>
    %111 = arith.addf %107, %110 : vector<16x128xf32>
    %c2_110 = arith.constant 2 : index
    %c0_111 = arith.constant 0 : index
    %c0_112 = arith.constant 0 : index
    %112 = vector.load %arg5[%c2_110, %c0_111, %c0_112] : memref<5x1x128xf32, #tpu.memory_space<vmem>>, vector<1x1x128xf32>
    %113 = vector.shape_cast %112 : vector<1x1x128xf32> to vector<1x128xf32>
    %114 = vector.broadcast %113 : vector<1x128xf32> to vector<16x128xf32>
    %115 = arith.addf %111, %114 : vector<16x128xf32>
    %116 = vector.shape_cast %100 : vector<16x128xf32> to vector<1x16x128xf32>
    %c0_113 = arith.constant 0 : index
    %c2_114 = arith.constant 2 : index
    %c16_115 = arith.constant 16 : index
    %117 = vector.load %arg12[%c0_113, %c2_114, %c16_115] : memref<1x20x160xf32, #tpu.memory_space<vmem>>, vector<1x16x128xf32>
    tpu.vector_store %arg12[%c0_113, %c2_114, %c16_115], %116 {strides = array<i32>} : memref<1x20x160xf32, #tpu.memory_space<vmem>>, vector<1x16x128xf32>,
    %c0_116 = arith.constant 0 : index
    %c1_117 = arith.constant 1 : index
    %c8_118 = arith.constant 8 : index
    %118 = vector.load %arg12[%c0_116, %c1_117, %c8_118] : memref<1x20x160xf32, #tpu.memory_space<vmem>>, vector<1x16x144xf32>
    %119 = vector.shape_cast %118 : vector<1x16x144xf32> to vector<16x144xf32>
    %c0_119 = arith.constant 0 : index
    %c2_120 = arith.constant 2 : index
    %c8_121 = arith.constant 8 : index
    %120 = vector.load %arg12[%c0_119, %c2_120, %c8_121] : memref<1x20x160xf32, #tpu.memory_space<vmem>>, vector<1x16x144xf32>
    %121 = vector.shape_cast %120 : vector<1x16x144xf32> to vector<16x144xf32>
    %c0_122 = arith.constant 0 : index
    %c3_123 = arith.constant 3 : index
    %c8_124 = arith.constant 8 : index
    %122 = vector.load %arg12[%c0_122, %c3_123, %c8_124] : memref<1x20x160xf32, #tpu.memory_space<vmem>>, vector<1x16x144xf32>
    %123 = vector.shape_cast %122 : vector<1x16x144xf32> to vector<16x144xf32>
    %c3_125 = arith.constant 3 : index
    %c0_126 = arith.constant 0 : index
    %c0_127 = arith.constant 0 : index
    %c0_128 = arith.constant 0 : index
    %124 = vector.load %arg4[%c3_125, %c0_126, %c0_127, %c0_128] : memref<5x3x144x128xf32, #tpu.memory_space<vmem>>, vector<1x1x144x128xf32>
    %125 = vector.shape_cast %124 : vector<1x1x144x128xf32> to vector<144x128xf32>
    %cst_129 = arith.constant dense<0.000000e+00> : vector<16x128xf32>
    %126 = tpu.matmul %119, %125, %cst_129 {dimension_numbers = #tpu.dot_dimension_numbers<[1], [0], [0], [1], [0, 0, 1, 1], [], []>} : vector<16x144xf32>, vector<144x128xf32>, vector<16x128xf32> -> vector<16x128xf32>
    %c3_130 = arith.constant 3 : index
    %c1_131 = arith.constant 1 : index
    %c0_132 = arith.constant 0 : index
    %c0_133 = arith.constant 0 : index
    %127 = vector.load %arg4[%c3_130, %c1_131, %c0_132, %c0_133] : memref<5x3x144x128xf32, #tpu.memory_space<vmem>>, vector<1x1x144x128xf32>
    %128 = vector.shape_cast %127 : vector<1x1x144x128xf32> to vector<144x128xf32>
    %cst_134 = arith.constant dense<0.000000e+00> : vector<16x128xf32>
    %129 = tpu.matmul %121, %128, %cst_134 {dimension_numbers = #tpu.dot_dimension_numbers<[1], [0], [0], [1], [0, 0, 1, 1], [], []>} : vector<16x144xf32>, vector<144x128xf32>, vector<16x128xf32> -> vector<16x128xf32>
    %130 = arith.addf %126, %129 : vector<16x128xf32>
    %c3_135 = arith.constant 3 : index
    %c2_136 = arith.constant 2 : index
    %c0_137 = arith.constant 0 : index
    %c0_138 = arith.constant 0 : index
    %131 = vector.load %arg4[%c3_135, %c2_136, %c0_137, %c0_138] : memref<5x3x144x128xf32, #tpu.memory_space<vmem>>, vector<1x1x144x128xf32>
    %132 = vector.shape_cast %131 : vector<1x1x144x128xf32> to vector<144x128xf32>
    %cst_139 = arith.constant dense<0.000000e+00> : vector<16x128xf32>
    %133 = tpu.matmul %123, %132, %cst_139 {dimension_numbers = #tpu.dot_dimension_numbers<[1], [0], [0], [1], [0, 0, 1, 1], [], []>} : vector<16x144xf32>, vector<144x128xf32>, vector<16x128xf32> -> vector<16x128xf32>
    %134 = arith.addf %130, %133 : vector<16x128xf32>
    %c3_140 = arith.constant 3 : index
    %c0_141 = arith.constant 0 : index
    %c0_142 = arith.constant 0 : index
    %135 = vector.load %arg5[%c3_140, %c0_141, %c0_142] : memref<5x1x128xf32, #tpu.memory_space<vmem>>, vector<1x1x128xf32>
    %136 = vector.shape_cast %135 : vector<1x1x128xf32> to vector<1x128xf32>
    %137 = vector.broadcast %136 : vector<1x128xf32> to vector<16x128xf32>
    %138 = arith.addf %134, %137 : vector<16x128xf32>
    %139 = vector.shape_cast %115 : vector<16x128xf32> to vector<1x16x128xf32>
    %c0_143 = arith.constant 0 : index
    %c2_144 = arith.constant 2 : index
    %c16_145 = arith.constant 16 : index
    %140 = vector.load %arg12[%c0_143, %c2_144, %c16_145] : memref<1x20x160xf32, #tpu.memory_space<vmem>>, vector<1x16x128xf32>
    tpu.vector_store %arg12[%c0_143, %c2_144, %c16_145], %139 {strides = array<i32>} : memref<1x20x160xf32, #tpu.memory_space<vmem>>, vector<1x16x128xf32>,
    %c0_146 = arith.constant 0 : index
    %c1_147 = arith.constant 1 : index
    %c8_148 = arith.constant 8 : index
    %141 = vector.load %arg12[%c0_146, %c1_147, %c8_148] : memref<1x20x160xf32, #tpu.memory_space<vmem>>, vector<1x16x144xf32>
    %142 = vector.shape_cast %141 : vector<1x16x144xf32> to vector<16x144xf32>
    %c0_149 = arith.constant 0 : index
    %c2_150 = arith.constant 2 : index
    %c8_151 = arith.constant 8 : index
    %143 = vector.load %arg12[%c0_149, %c2_150, %c8_151] : memref<1x20x160xf32, #tpu.memory_space<vmem>>, vector<1x16x144xf32>
    %144 = vector.shape_cast %143 : vector<1x16x144xf32> to vector<16x144xf32>
    %c0_152 = arith.constant 0 : index
    %c3_153 = arith.constant 3 : index
    %c8_154 = arith.constant 8 : index
    %145 = vector.load %arg12[%c0_152, %c3_153, %c8_154] : memref<1x20x160xf32, #tpu.memory_space<vmem>>, vector<1x16x144xf32>
    %146 = vector.shape_cast %145 : vector<1x16x144xf32> to vector<16x144xf32>
    %c4_155 = arith.constant 4 : index
    %c0_156 = arith.constant 0 : index
    %c0_157 = arith.constant 0 : index
    %c0_158 = arith.constant 0 : index
    %147 = vector.load %arg4[%c4_155, %c0_156, %c0_157, %c0_158] : memref<5x3x144x128xf32, #tpu.memory_space<vmem>>, vector<1x1x144x128xf32>
    %148 = vector.shape_cast %147 : vector<1x1x144x128xf32> to vector<144x128xf32>
    %cst_159 = arith.constant dense<0.000000e+00> : vector<16x128xf32>
    %149 = tpu.matmul %142, %148, %cst_159 {dimension_numbers = #tpu.dot_dimension_numbers<[1], [0], [0], [1], [0, 0, 1, 1], [], []>} : vector<16x144xf32>, vector<144x128xf32>, vector<16x128xf32> -> vector<16x128xf32>
    %c4_160 = arith.constant 4 : index
    %c1_161 = arith.constant 1 : index
    %c0_162 = arith.constant 0 : index
    %c0_163 = arith.constant 0 : index
    %150 = vector.load %arg4[%c4_160, %c1_161, %c0_162, %c0_163] : memref<5x3x144x128xf32, #tpu.memory_space<vmem>>, vector<1x1x144x128xf32>
    %151 = vector.shape_cast %150 : vector<1x1x144x128xf32> to vector<144x128xf32>
    %cst_164 = arith.constant dense<0.000000e+00> : vector<16x128xf32>
    %152 = tpu.matmul %144, %151, %cst_164 {dimension_numbers = #tpu.dot_dimension_numbers<[1], [0], [0], [1], [0, 0, 1, 1], [], []>} : vector<16x144xf32>, vector<144x128xf32>, vector<16x128xf32> -> vector<16x128xf32>
    %153 = arith.addf %149, %152 : vector<16x128xf32>
    %c4_165 = arith.constant 4 : index
    %c2_166 = arith.constant 2 : index
    %c0_167 = arith.constant 0 : index
    %c0_168 = arith.constant 0 : index
    %154 = vector.load %arg4[%c4_165, %c2_166, %c0_167, %c0_168] : memref<5x3x144x128xf32, #tpu.memory_space<vmem>>, vector<1x1x144x128xf32>
    %155 = vector.shape_cast %154 : vector<1x1x144x128xf32> to vector<144x128xf32>
    %cst_169 = arith.constant dense<0.000000e+00> : vector<16x128xf32>
    %156 = tpu.matmul %146, %155, %cst_169 {dimension_numbers = #tpu.dot_dimension_numbers<[1], [0], [0], [1], [0, 0, 1, 1], [], []>} : vector<16x144xf32>, vector<144x128xf32>, vector<16x128xf32> -> vector<16x128xf32>
    %157 = arith.addf %153, %156 : vector<16x128xf32>
    %c4_170 = arith.constant 4 : index
    %c0_171 = arith.constant 0 : index
    %c0_172 = arith.constant 0 : index
    %158 = vector.load %arg5[%c4_170, %c0_171, %c0_172] : memref<5x1x128xf32, #tpu.memory_space<vmem>>, vector<1x1x128xf32>
    %159 = vector.shape_cast %158 : vector<1x1x128xf32> to vector<1x128xf32>
    %160 = vector.broadcast %159 : vector<1x128xf32> to vector<16x128xf32>
    %161 = arith.addf %157, %160 : vector<16x128xf32>
    %cst_173 = arith.constant 0.000000e+00 : f32
    %162 = vector.broadcast %cst_173 : f32 to vector<16x128xf32>
    %163 = arith.subf %162, %138 : vector<16x128xf32>
    %164 = arith.negf %163 : vector<16x128xf32>
    %165 = math.exp %164 : vector<16x128xf32>
    %cst_174 = arith.constant 1.000000e+00 : f32
    %166 = vector.broadcast %cst_174 : f32 to vector<16x128xf32>
    %167 = arith.addf %166, %165 : vector<16x128xf32>
    %168 = arith.divf %166, %167 : vector<16x128xf32>
    %169 = arith.mulf %168, %115 : vector<16x128xf32>
    %170 = arith.addf %100, %169 : vector<16x128xf32>
    %cst_175 = arith.constant 0.000000e+00 : f32
    %171 = vector.broadcast %cst_175 : f32 to vector<16x128xf32>
    %172 = arith.subf %171, %161 : vector<16x128xf32>
    %173 = arith.negf %172 : vector<16x128xf32>
    %174 = math.exp %173 : vector<16x128xf32>
    %cst_176 = arith.constant 1.000000e+00 : f32
    %175 = vector.broadcast %cst_176 : f32 to vector<16x128xf32>
    %176 = arith.addf %175, %174 : vector<16x128xf32>
    %177 = arith.divf %175, %176 : vector<16x128xf32>
    %178 = arith.mulf %177, %100 : vector<16x128xf32>
    %179 = arith.addf %115, %178 : vector<16x128xf32>
    %180 = vector.shape_cast %170 : vector<16x128xf32> to vector<1x16x128xf32>
    %c0_177 = arith.constant 0 : index
    %c0_178 = arith.constant 0 : index
    %c0_179 = arith.constant 0 : index
    %181 = vector.load %arg9[%c0_177, %c0_178, %c0_179] : memref<1x16x128xf32, #tpu.memory_space<vmem>>, vector<1x16x128xf32>
    tpu.vector_store %arg9[%c0_177, %c0_178, %c0_179], %180 {strides = array<i32>} : memref<1x16x128xf32, #tpu.memory_space<vmem>>, vector<1x16x128xf32>,
    %182 = vector.shape_cast %179 : vector<16x128xf32> to vector<1x16x128xf32>
    %c0_180 = arith.constant 0 : index
    %c0_181 = arith.constant 0 : index
    %c0_182 = arith.constant 0 : index
    %183 = vector.load %arg8[%c0_180, %c0_181, %c0_182] : memref<1x16x128xf32, #tpu.memory_space<vmem>>, vector<1x16x128xf32>
    tpu.vector_store %arg8[%c0_180, %c0_181, %c0_182], %182 {strides = array<i32>} : memref<1x16x128xf32, #tpu.memory_space<vmem>>, vector<1x16x128xf32>,
    %184 = vector.shape_cast %170 : vector<16x128xf32> to vector<1x16x128xf32>
    %c0_183 = arith.constant 0 : index
    %c2_184 = arith.constant 2 : index
    %c16_185 = arith.constant 16 : index
    %185 = vector.load %arg12[%c0_183, %c2_184, %c16_185] : memref<1x20x160xf32, #tpu.memory_space<vmem>>, vector<1x16x128xf32>
    tpu.vector_store %arg12[%c0_183, %c2_184, %c16_185], %184 {strides = array<i32>} : memref<1x20x160xf32, #tpu.memory_space<vmem>>, vector<1x16x128xf32>,
    %c0_186 = arith.constant 0 : index
    %c1_187 = arith.constant 1 : index
    %c8_188 = arith.constant 8 : index
    %186 = vector.load %arg12[%c0_186, %c1_187, %c8_188] : memref<1x20x160xf32, #tpu.memory_space<vmem>>, vector<1x16x144xf32>
    %187 = vector.shape_cast %186 : vector<1x16x144xf32> to vector<16x144xf32>
    %c0_189 = arith.constant 0 : index
    %c2_190 = arith.constant 2 : index
    %c8_191 = arith.constant 8 : index
    %188 = vector.load %arg12[%c0_189, %c2_190, %c8_191] : memref<1x20x160xf32, #tpu.memory_space<vmem>>, vector<1x16x144xf32>
    %189 = vector.shape_cast %188 : vector<1x16x144xf32> to vector<16x144xf32>
    %c0_192 = arith.constant 0 : index
    %c3_193 = arith.constant 3 : index
    %c8_194 = arith.constant 8 : index
    %190 = vector.load %arg12[%c0_192, %c3_193, %c8_194] : memref<1x20x160xf32, #tpu.memory_space<vmem>>, vector<1x16x144xf32>
    %191 = vector.shape_cast %190 : vector<1x16x144xf32> to vector<16x144xf32>
    %c0_195 = arith.constant 0 : index
    %c0_196 = arith.constant 0 : index
    %c0_197 = arith.constant 0 : index
    %c0_198 = arith.constant 0 : index
    %192 = vector.load %arg6[%c0_195, %c0_196, %c0_197, %c0_198] : memref<2x3x144x128xf32, #tpu.memory_space<vmem>>, vector<1x1x144x128xf32>
    %193 = vector.shape_cast %192 : vector<1x1x144x128xf32> to vector<144x128xf32>
    %cst_199 = arith.constant dense<0.000000e+00> : vector<16x128xf32>
    %194 = tpu.matmul %187, %193, %cst_199 {dimension_numbers = #tpu.dot_dimension_numbers<[1], [0], [0], [1], [0, 0, 1, 1], [], []>} : vector<16x144xf32>, vector<144x128xf32>, vector<16x128xf32> -> vector<16x128xf32>
    %c0_200 = arith.constant 0 : index
    %c1_201 = arith.constant 1 : index
    %c0_202 = arith.constant 0 : index
    %c0_203 = arith.constant 0 : index
    %195 = vector.load %arg6[%c0_200, %c1_201, %c0_202, %c0_203] : memref<2x3x144x128xf32, #tpu.memory_space<vmem>>, vector<1x1x144x128xf32>
    %196 = vector.shape_cast %195 : vector<1x1x144x128xf32> to vector<144x128xf32>
    %cst_204 = arith.constant dense<0.000000e+00> : vector<16x128xf32>
    %197 = tpu.matmul %189, %196, %cst_204 {dimension_numbers = #tpu.dot_dimension_numbers<[1], [0], [0], [1], [0, 0, 1, 1], [], []>} : vector<16x144xf32>, vector<144x128xf32>, vector<16x128xf32> -> vector<16x128xf32>
    %198 = arith.addf %194, %197 : vector<16x128xf32>
    %c0_205 = arith.constant 0 : index
    %c2_206 = arith.constant 2 : index
    %c0_207 = arith.constant 0 : index
    %c0_208 = arith.constant 0 : index
    %199 = vector.load %arg6[%c0_205, %c2_206, %c0_207, %c0_208] : memref<2x3x144x128xf32, #tpu.memory_space<vmem>>, vector<1x1x144x128xf32>
    %200 = vector.shape_cast %199 : vector<1x1x144x128xf32> to vector<144x128xf32>
    %cst_209 = arith.constant dense<0.000000e+00> : vector<16x128xf32>
    %201 = tpu.matmul %191, %200, %cst_209 {dimension_numbers = #tpu.dot_dimension_numbers<[1], [0], [0], [1], [0, 0, 1, 1], [], []>} : vector<16x144xf32>, vector<144x128xf32>, vector<16x128xf32> -> vector<16x128xf32>
    %202 = arith.addf %198, %201 : vector<16x128xf32>
    %c0_210 = arith.constant 0 : index
    %c0_211 = arith.constant 0 : index
    %c0_212 = arith.constant 0 : index
    %203 = vector.load %arg7[%c0_210, %c0_211, %c0_212] : memref<2x1x128xf32, #tpu.memory_space<vmem>>, vector<1x1x128xf32>
    %204 = vector.shape_cast %203 : vector<1x1x128xf32> to vector<1x128xf32>
    %205 = vector.broadcast %204 : vector<1x128xf32> to vector<16x128xf32>
    %206 = arith.addf %202, %205 : vector<16x128xf32>
    %207 = vector.shape_cast %179 : vector<16x128xf32> to vector<1x16x128xf32>
    %c0_213 = arith.constant 0 : index
    %c2_214 = arith.constant 2 : index
    %c16_215 = arith.constant 16 : index
    %208 = vector.load %arg12[%c0_213, %c2_214, %c16_215] : memref<1x20x160xf32, #tpu.memory_space<vmem>>, vector<1x16x128xf32>
    tpu.vector_store %arg12[%c0_213, %c2_214, %c16_215], %207 {strides = array<i32>} : memref<1x20x160xf32, #tpu.memory_space<vmem>>, vector<1x16x128xf32>,
    %c0_216 = arith.constant 0 : index
    %c1_217 = arith.constant 1 : index
    %c8_218 = arith.constant 8 : index
    %209 = vector.load %arg12[%c0_216, %c1_217, %c8_218] : memref<1x20x160xf32, #tpu.memory_space<vmem>>, vector<1x16x144xf32>
    %210 = vector.shape_cast %209 : vector<1x16x144xf32> to vector<16x144xf32>
    %c0_219 = arith.constant 0 : index
    %c2_220 = arith.constant 2 : index
    %c8_221 = arith.constant 8 : index
    %211 = vector.load %arg12[%c0_219, %c2_220, %c8_221] : memref<1x20x160xf32, #tpu.memory_space<vmem>>, vector<1x16x144xf32>
    %212 = vector.shape_cast %211 : vector<1x16x144xf32> to vector<16x144xf32>
    %c0_222 = arith.constant 0 : index
    %c3_223 = arith.constant 3 : index
    %c8_224 = arith.constant 8 : index
    %213 = vector.load %arg12[%c0_222, %c3_223, %c8_224] : memref<1x20x160xf32, #tpu.memory_space<vmem>>, vector<1x16x144xf32>
    %214 = vector.shape_cast %213 : vector<1x16x144xf32> to vector<16x144xf32>
    %c1_225 = arith.constant 1 : index
    %c0_226 = arith.constant 0 : index
    %c0_227 = arith.constant 0 : index
    %c0_228 = arith.constant 0 : index
    %215 = vector.load %arg6[%c1_225, %c0_226, %c0_227, %c0_228] : memref<2x3x144x128xf32, #tpu.memory_space<vmem>>, vector<1x1x144x128xf32>
    %216 = vector.shape_cast %215 : vector<1x1x144x128xf32> to vector<144x128xf32>
    %cst_229 = arith.constant dense<0.000000e+00> : vector<16x128xf32>
    %217 = tpu.matmul %210, %216, %cst_229 {dimension_numbers = #tpu.dot_dimension_numbers<[1], [0], [0], [1], [0, 0, 1, 1], [], []>} : vector<16x144xf32>, vector<144x128xf32>, vector<16x128xf32> -> vector<16x128xf32>
    %c1_230 = arith.constant 1 : index
    %c1_231 = arith.constant 1 : index
    %c0_232 = arith.constant 0 : index
    %c0_233 = arith.constant 0 : index
    %218 = vector.load %arg6[%c1_230, %c1_231, %c0_232, %c0_233] : memref<2x3x144x128xf32, #tpu.memory_space<vmem>>, vector<1x1x144x128xf32>
    %219 = vector.shape_cast %218 : vector<1x1x144x128xf32> to vector<144x128xf32>
    %cst_234 = arith.constant dense<0.000000e+00> : vector<16x128xf32>
    %220 = tpu.matmul %212, %219, %cst_234 {dimension_numbers = #tpu.dot_dimension_numbers<[1], [0], [0], [1], [0, 0, 1, 1], [], []>} : vector<16x144xf32>, vector<144x128xf32>, vector<16x128xf32> -> vector<16x128xf32>
    %221 = arith.addf %217, %220 : vector<16x128xf32>
    %c1_235 = arith.constant 1 : index
    %c2_236 = arith.constant 2 : index
    %c0_237 = arith.constant 0 : index
    %c0_238 = arith.constant 0 : index
    %222 = vector.load %arg6[%c1_235, %c2_236, %c0_237, %c0_238] : memref<2x3x144x128xf32, #tpu.memory_space<vmem>>, vector<1x1x144x128xf32>
    %223 = vector.shape_cast %222 : vector<1x1x144x128xf32> to vector<144x128xf32>
    %cst_239 = arith.constant dense<0.000000e+00> : vector<16x128xf32>
    %224 = tpu.matmul %214, %223, %cst_239 {dimension_numbers = #tpu.dot_dimension_numbers<[1], [0], [0], [1], [0, 0, 1, 1], [], []>} : vector<16x144xf32>, vector<144x128xf32>, vector<16x128xf32> -> vector<16x128xf32>
    %225 = arith.addf %221, %224 : vector<16x128xf32>
    %c1_240 = arith.constant 1 : index
    %c0_241 = arith.constant 0 : index
    %c0_242 = arith.constant 0 : index
    %226 = vector.load %arg7[%c1_240, %c0_241, %c0_242] : memref<2x1x128xf32, #tpu.memory_space<vmem>>, vector<1x1x128xf32>
    %227 = vector.shape_cast %226 : vector<1x1x128xf32> to vector<1x128xf32>
    %228 = vector.broadcast %227 : vector<1x128xf32> to vector<16x128xf32>
    %229 = arith.addf %225, %228 : vector<16x128xf32>
    %230 = vector.shape_cast %206 : vector<16x128xf32> to vector<1x16x128xf32>
    %c0_243 = arith.constant 0 : index
    %c0_244 = arith.constant 0 : index
    %c0_245 = arith.constant 0 : index
    %231 = vector.load %arg11[%c0_243, %c0_244, %c0_245] : memref<1x16x128xf32, #tpu.memory_space<vmem>>, vector<1x16x128xf32>
    tpu.vector_store %arg11[%c0_243, %c0_244, %c0_245], %230 {strides = array<i32>} : memref<1x16x128xf32, #tpu.memory_space<vmem>>, vector<1x16x128xf32>,
    %232 = vector.shape_cast %229 : vector<16x128xf32> to vector<1x16x128xf32>
    %c0_246 = arith.constant 0 : index
    %c0_247 = arith.constant 0 : index
    %c0_248 = arith.constant 0 : index
    %233 = vector.load %arg10[%c0_246, %c0_247, %c0_248] : memref<1x16x128xf32, #tpu.memory_space<vmem>>, vector<1x16x128xf32>
    tpu.vector_store %arg10[%c0_246, %c0_247, %c0_248], %232 {strides = array<i32>} : memref<1x16x128xf32, #tpu.memory_space<vmem>>, vector<1x16x128xf32>,
    return
  }
  func.func @transform_0(%arg0: i32) -> (i32, i32, i32) {
    %c0_i32 = arith.constant 0 : i32
    %c0_i32_0 = arith.constant 0 : i32
    %c0_i32_1 = arith.constant 0 : i32
    return %arg0, %c0_i32, %c0_i32_0 : i32, i32, i32
  }
  func.func @transform_1(%arg0: i32) -> (i32, i32) {
    %c0_i32 = arith.constant 0 : i32
    %c0_i32_0 = arith.constant 0 : i32
    %c0_i32_1 = arith.constant 0 : i32
    return %c0_i32, %c0_i32_0 : i32, i32
  }
  func.func @transform_2(%arg0: i32) -> (i32, i32, i32) {
    %c0_i32 = arith.constant 0 : i32
    %c0_i32_0 = arith.constant 0 : i32
    %c0_i32_1 = arith.constant 0 : i32
    %c0_i32_2 = arith.constant 0 : i32
    return %c0_i32, %c0_i32_0, %c0_i32_1 : i32, i32, i32
  }
  func.func @transform_3(%arg0: i32) -> (i32, i32, i32, i32) {
    %c0_i32 = arith.constant 0 : i32
    %c0_i32_0 = arith.constant 0 : i32
    %c0_i32_1 = arith.constant 0 : i32
    %c0_i32_2 = arith.constant 0 : i32
    %c0_i32_3 = arith.constant 0 : i32
    return %c0_i32, %c0_i32_0, %c0_i32_1, %c0_i32_2 : i32, i32, i32, i32
  }
  func.func @transform_4(%arg0: i32) -> (i32, i32, i32) {
    %c0_i32 = arith.constant 0 : i32
    %c0_i32_0 = arith.constant 0 : i32
    %c0_i32_1 = arith.constant 0 : i32
    %c0_i32_2 = arith.constant 0 : i32
    return %c0_i32, %c0_i32_0, %c0_i32_1 : i32, i32, i32
  }
  func.func @transform_5(%arg0: i32) -> (i32, i32, i32, i32) {
    %c0_i32 = arith.constant 0 : i32
    %c0_i32_0 = arith.constant 0 : i32
    %c0_i32_1 = arith.constant 0 : i32
    %c0_i32_2 = arith.constant 0 : i32
    %c0_i32_3 = arith.constant 0 : i32
    return %c0_i32, %c0_i32_0, %c0_i32_1, %c0_i32_2 : i32, i32, i32, i32
  }
  func.func @transform_6(%arg0: i32) -> (i32, i32, i32) {
    %c0_i32 = arith.constant 0 : i32
    %c0_i32_0 = arith.constant 0 : i32
    %c0_i32_1 = arith.constant 0 : i32
    %c0_i32_2 = arith.constant 0 : i32
    return %c0_i32, %c0_i32_0, %c0_i32_1 : i32, i32, i32
  }
  func.func @transform_7(%arg0: i32) -> (i32, i32, i32) {
    %c0_i32 = arith.constant 0 : i32
    %c0_i32_0 = arith.constant 0 : i32
    %c0_i32_1 = arith.constant 0 : i32
    return %arg0, %c0_i32, %c0_i32_0 : i32, i32, i32
  }
  func.func @transform_8(%arg0: i32) -> (i32, i32, i32) {
    %c0_i32 = arith.constant 0 : i32
    %c0_i32_0 = arith.constant 0 : i32
    %c0_i32_1 = arith.constant 0 : i32
    return %arg0, %c0_i32, %c0_i32_0 : i32, i32, i32
  }
  func.func @transform_9(%arg0: i32) -> (i32, i32, i32) {
    %c0_i32 = arith.constant 0 : i32
    %c0_i32_0 = arith.constant 0 : i32
    %c0_i32_1 = arith.constant 0 : i32
    return %arg0, %c0_i32, %c0_i32_0 : i32, i32, i32
  }
  func.func @transform_10(%arg0: i32) -> (i32, i32, i32) {
    %c0_i32 = arith.constant 0 : i32
    %c0_i32_0 = arith.constant 0 : i32
    %c0_i32_1 = arith.constant 0 : i32
    return %arg0, %c0_i32, %c0_i32_0 : i32, i32, i32
  }
}

</mosaic_0001>

<bundles_post_ra>
// kernel: multitask_net_forward.1
= control target key start
LH: loop header
LB: loop body
LE: loop exit
PB: predicated region body
PF: predicated region fallthrough
CT: control target
= control target key end

     0   :  { %s3973_s13 = smov 0   ;;  %s5926_s0 = inlined_call_operand.vmem [shape: f32[2,16,128], index: 0, kind: input, shape index: {}]   ;;  %s5927_s1 = inlined_call_operand.vmem [shape: f32[128,128], index: 1, kind: input, shape index: {}]   ;;  %s5928_s2 = inlined_call_operand.vmem [shape: f32[3,128,128], index: 2, kind: input, shape index: {}]   ;;  %s5929_s3 = inlined_call_operand.vmem [shape: f32[5,3,144,128], index: 3, kind: input, shape index: {}]   ;;  %s5930_s4 = inlined_call_operand.vmem [shape: f32[5,1,128], index: 4, kind: input, shape index: {}]   ;;  %s5931_s5 = inlined_call_operand.vmem [shape: f32[2,3,144,128], index: 5, kind: input, shape index: {}]   ;;  %s5932_s6 = inlined_call_operand.vmem [shape: f32[2,1,128], index: 6, kind: input, shape index: {}]   ;;  %s5933_s7 = inlined_call_operand.vmem [shape: f32[2,16,128], index: 7, kind: output, shape index: {0}]   ;;  %s5934_s8 = inlined_call_operand.vmem [shape: f32[2,16,128], index: 8, kind: output, shape index: {1}]   ;;  %s5935_s9 = inlined_call_operand.vmem [shape: f32[2,16,128], index: 9, kind: output, shape index: {2}]   ;;  %s5936_s10 = inlined_call_operand.vmem [shape: f32[2,16,128], index: 10, kind: output, shape index: {3}]  }
   0x1 LB: > { %s3340_s14 = sadd.s32 4294967295, %s3910_s13   ;;  %p3344_p0 = scmp.ge.s32.totalorder %s3910_s13, 1  ;;  %s3910_s13 = sphi %s3973_s13, %s21_s13  }
   0x2   : > { %p319_p1 = scmp.lt.s32.totalorder %s3910_s13, 3 }
   0x4   : > { %p320_p2 = pnand %p3344_p0, %p319_p1 }
   0x5   : > { %p372_p3 = scmp.lt.s32.totalorder (!%p320_p2), %s3340_s14, 1  ;;  %s3913_s29 = smov (!%p320_p2), 16  }
   0x6   : > { %323 = sbr.rel (%p320_p2) target bundleno = 2400 (0x960), region = 48  ;;  %s3914_s30 = smov (!%p320_p2), 112  }
   0x7   : > { %s3915_s11 = smov (!%p320_p2), 120   ;;  %s3917_s12 = smov (!%p320_p2), 96  }
   0xb   : > { %v422_v0 = vld [vmem:[%s5927_s1 + $0x78] sm:$0xff]  ;;  %v421_v1 = vld [vmem:[%s5927_s1 + $0x70] sm:$0xff]  ;;  %v420_v2 = vld [vmem:[%s5927_s1 + $0x68] sm:$0xff]  ;;  %s5938_s14 = smov (!%p372_p3, %s3340_s14), 1  ;;  %vm398_vm0 = vcmask 261120   ;;  %v3912_v34 = vmov 0.0  }
   0xc   : > { %423 = vmatpush.msra.mxu0 %v422_v0  ;;  %v419_v3 = vld [vmem:[%s5927_s1 + $0x60] sm:$0xff]  ;;  %v418_v4 = vld [vmem:[%s5927_s1 + $0x58] sm:$0xff]  ;;  %v417_v5 = vld [vmem:[%s5927_s1 + $0x50] sm:$0xff]  ;;  %s4051_s23 = sshll.u32 %s5938_s14, 4  ;;  %397 = vst [vmem:[#allocation2] sm:$0xff] %v3912_v34  ;;  %vm448_vm1 = vcmask 1041408  }
   0xd   : > { %v774_v6 = vld [vmem:[%s5928_s2 + $0x78] sm:$0xff]  ;;  %v773_v7 = vld [vmem:[%s5928_s2 + $0x70] sm:$0xff]  ;;  %v416_v8 = vld [vmem:[%s5927_s1 + $0x48] sm:$0xff]  ;;  %s376_s14 = scalar_lea.vmem %s5926_s0, %s4051_s23  ;;  %399 = vst.msk [vmem:[#allocation2 + $0x8] sm:$0xff] %vm398_vm0, %v3912_v34  ;;  %vm403_vm2 = vcmask 257024   ;;  %vm461_vm3 = vcmask 1047682   ;;  %s386_s24 = scalar_lea.vmem %s5934_s8, %s4051_s23 }
   0xe   : > { %424 = vmatpush.msra.mxu0 %v421_v1  ;;  %843 = vmatpush.msra.mxu2 %v774_v6  ;;  %v772_v9 = vld [vmem:[%s5928_s2 + $0x68] sm:$0xff]  ;;  %v415_v10 = vld [vmem:[%s5927_s1 + $0x40] sm:$0xff]  ;;  %v414_v12 = vld [vmem:[%s5927_s1 + $0x38] sm:$0xff]  ;;  %400 = vst [vmem:[#allocation2 + $0x10] sm:$0xff] %v3912_v34  ;;  %vm463_vm4 = vcmask 130050   ;;  %vm469_vm5 = vcmask 1041536   ;;  %s381_s27 = scalar_lea.vmem %s5933_s7, %s4051_s23  ;;  %s391_s19 = scalar_lea.vmem %s5935_s9, %s4051_s23 }
   0xf   : > { %v771_v11 = vld [vmem:[%s5928_s2 + $0x60] sm:$0xff]  ;;  %v770_v13 = vld [vmem:[%s5928_s2 + $0x58] sm:$0xff]  ;;  %v413_v14 = vld [vmem:[%s5927_s1 + $0x30] sm:$0xff]  ;;  %401 = vst.msk [vmem:[#allocation2 + $0x18] sm:$0xff] %vm398_vm0, %v3912_v34  ;;  %vm471_vm6 = vcmask 123904   ;;  %vm465_vm7 = vcmask 1047680  }
  0x10   : > { %425 = vmatpush.msra.mxu0 %v420_v2  ;;  %844 = vmatpush.msra.mxu2 %v773_v7  ;;  %v769_v15 = vld [vmem:[%s5928_s2 + $0x50] sm:$0xff]  ;;  %v412_v16 = vld [vmem:[%s5927_s1 + $0x28] sm:$0xff]  ;;  %v411_v18 = vld [vmem:[%s5927_s1 + $0x20] sm:$0xff]  ;;  %402 = vst [vmem:[#allocation2 + $0x20] sm:$0xf] %v3912_v34  ;;  %vm467_vm8 = vcmask 130048  }
  0x11   : > { %v768_v17 = vld [vmem:[%s5928_s2 + $0x48] sm:$0xff]  ;;  %v767_v19 = vld [vmem:[%s5928_s2 + $0x40] sm:$0xff]  ;;  %v410_v20 = vld [vmem:[%s5927_s1 + $0x18] sm:$0xff]  ;;  %404 = vst.msk [vmem:[#allocation2 + $0x28] sm:$0xf] %vm403_vm2, %v3912_v34  ;;  %vm499_vm9 = vcmask 1046528  }
  0x12   : > { %426 = vmatpush.msra.mxu0 %v419_v3  ;;  %845 = vmatpush.msra.mxu2 %v772_v9  ;;  %v766_v21 = vld [vmem:[%s5928_s2 + $0x38] sm:$0xff]  ;;  %v409_v22 = vld [vmem:[%s5927_s1 + $0x10] sm:$0xff]  ;;  %v408_v24 = vld [vmem:[%s5927_s1 + $0x8] sm:$0xff]  ;;  %vm526_vm10 = vcmask 1045504   ;;  %vm653_vm11 = vcmask 1044480   ;;  %vm676_vm12 = vcmask 1043456  }
  0x13   : > { %v765_v23 = vld [vmem:[%s5928_s2 + $0x30] sm:$0xff]  ;;  %v764_v25 = vld [vmem:[%s5928_s2 + $0x28] sm:$0xff]  ;;  %v407_v26 = vld [vmem:[%s5927_s1] sm:$0xff]  ;;  %vm567_vm13 = vcmask 982016   ;;  %vm595_vm14 = vcmask 916480   ;;  %vm735_vm15 = vcmask 850944  }
  0x14   : > { %427 = vmatpush.msra.mxu0 %v418_v4  ;;  %846 = vmatpush.msra.mxu2 %v771_v11  ;;  %v763_v27 = vld [vmem:[%s5928_s2 + $0x20] sm:$0xff]  ;;  %v762_v29 = vld [vmem:[%s5928_s2 + $0x18] sm:$0xff]  ;;  %v761_v30 = vld [vmem:[%s5928_s2 + $0x10] sm:$0xff]  ;;  %vm750_vm0 = vcmask 785408  }
  0x15   : > { %v405_v28 = vld [vmem:[%s376_s14] sm:$0xff]  ;;  %v760_v31 = vld [vmem:[%s5928_s2 + $0x8] sm:$0xff] }
  0x16   : > { %428 = vmatpush.msra.mxu0 %v417_v5  ;;  %847 = vmatpush.msra.mxu2 %v770_v13  ;;  %v406_v32 = vld [vmem:[%s376_s14 + $0x8] sm:$0xff]  ;;  %v759_v33 = vld [vmem:[%s5928_s2] sm:$0xff]  ;;  %s3916_s14 = smov 104  }
  0x18   : > { %429 = vmatpush.msra.mxu0 %v416_v8  ;;  %848 = vmatpush.msra.mxu2 %v769_v15 }
  0x1a   : > { %430 = vmatpush.msra.mxu0 %v415_v10  ;;  %849 = vmatpush.msra.mxu2 %v768_v17 }
  0x1c   : > { %431 = vmatpush.msra.mxu0 %v414_v12  ;;  %850 = vmatpush.msra.mxu2 %v767_v19 }
  0x1e   : > { %432 = vmatpush.msra.mxu0 %v413_v14  ;;  %851 = vmatpush.msra.mxu2 %v766_v21 }
  0x20   : > { %433 = vmatpush.msra.mxu0 %v412_v16  ;;  %852 = vmatpush.msra.mxu2 %v765_v23 }
  0x22   : > { %434 = vmatpush.msra.mxu0 %v411_v18  ;;  %853 = vmatpush.msra.mxu2 %v764_v25 }
  0x24   : > { %435 = vmatpush.msra.mxu0 %v410_v20  ;;  %854 = vmatpush.msra.mxu2 %v763_v27 }
  0x26   : > { %436 = vmatpush.msra.mxu0 %v409_v22  ;;  %855 = vmatpush.msra.mxu2 %v762_v29 }
  0x28   : > { %437 = vmatpush.msra.mxu0 %v408_v24  ;;  %856 = vmatpush.msra.mxu2 %v761_v30 }
  0x2a   : > { %438 = vmatpush.msra.mxu0 %v407_v26  ;;  %857 = vmatpush.msra.mxu2 %v760_v31 }
  0x2b   : > { %439 = vmatmul.f32.vlgmr.msra.gmra.mxu0 %v405_v28 }
  0x2c   : > { %858 = vmatpush.msra.mxu2 %v759_v33 }
  0x33   : > { %442 = vmatmul.f32.gmra.mxu0 %v406_v32 }
  0xa8   : > { %v440_v35 = vpop.f32.mrf.mxu0 }
  0xa9   : > { %859 = vmatmul.f32.vlgmr.msra.gmra.mxu2 %v440_v35  ;;  %v449_v36 = vrot.slane %v440_v35, 6 }
  0xab   : > { %452 = vrot.lane.b32.xlu0 %v449_v36, %s3913_s29 }
  0xb0   : > { %v443_v37 = vpop.f32.mrf.mxu0 }
  0xb1   : > { %862 = vmatmul.f32.gmra.mxu2 %v443_v37  ;;  %v450_v38 = vrot.slane %v443_v37, 6 }
  0xb3   : > { %456 = vrot.lane.b32.xlu1 %v450_v38, %s3913_s29  ;;  %v451_v39 = vsel %vm448_vm1, %v449_v36, %v450_v38 }
  0xb4   : > { %454 = vrot.lane.b32.xlu0 %v451_v39, %s3913_s29 }
 0x11d   : > { %v453_v40 = vpop.permute.xlu0 %452 }
 0x11e   : > { %462 = vst.msk [vmem:[#allocation2] sm:$0xfc] %vm461_vm3, %v453_v40 }
 0x11f   : > { %464 = vst.msk [vmem:[#allocation2 + $0x8] sm:$0xfc] %vm463_vm4, %v453_v40 }
 0x125   : > { %v457_v41 = vpop.permute.xlu1 %456  ;;  %v481_v48 = vld [vmem:[#allocation2] sm:$0xfc] }
 0x126   : > { %470 = vst.msk [vmem:[#allocation2 + $0x20] sm:$0x3] %vm469_vm5, %v457_v41  ;;  %v455_v42 = vpop.permute.xlu0 %454  ;;  %v4101_v45 = vld [vmem:[#allocation2 + $0x8] sm:$0xfc]  ;;  %v500_v62 = vrot.slane %v481_v48, 1  ;;  %v473_v25 = vld [vmem:[#allocation2] sm:$0xff] }
 0x127   : > { %472 = vst.msk [vmem:[#allocation2 + $0x28] sm:$0x3] %vm471_vm6, %v457_v41  ;;  %v503_v57 = vrot.slane %v4101_v45, 1  ;;  %v486_v4 = vld [vmem:[#allocation2 + $0x8] sm:$0xf8]  ;;  %v637_v27 = vrot.slane %v481_v48, 2 }
 0x128   : > { %466 = vst.msk [vmem:[#allocation2 + $0x10] sm:$0xff] %vm465_vm7, %v455_v42  ;;  %v485_v5 = vld [vmem:[#allocation2] sm:$0xf8]  ;;  %v478_v7 = vld [vmem:[#allocation2 + $0x8] sm:$0xfe]  ;;  %v530_v13 = vrot.slane %v486_v4, 2 }
 0x129   : > { %468 = vst.msk [vmem:[#allocation2 + $0x18] sm:$0xff] %vm467_vm8, %v455_v42  ;;  %v477_v8 = vld [vmem:[#allocation2] sm:$0xfe]  ;;  %v527_v14 = vrot.slane %v485_v5, 2  ;;  %v623_v29 = vrot.slane %v478_v7, 1  ;;  %v654_v35 = vrot.slane %v485_v5, 3 }
 0x12a   : > { %v621_v20 = vrot.slane %v477_v8, 1  ;;  %v489_v36 = vld [vmem:[#allocation2] sm:$0xf0]  ;;  %v474_v37 = vld [vmem:[#allocation2 + $0x8] sm:$0xff]  ;;  %v639_v42 = vrot.slane %v4101_v45, 2 }
 0x12d   : > { %v4097_v43 = vld [vmem:[#allocation2 + $0x20] sm:$0x3] }
 0x12e   : > { %v4099_v44 = vld [vmem:[#allocation2 + $0x20] sm:$0x7]  ;;  %v506_v46 = vrot.slane %v4097_v43, 1  ;;  %v4104_v47 = vld [vmem:[#allocation2 + $0x28] sm:$0x3] }
 0x12f   : > { %v4106_v49 = vld [vmem:[#allocation2 + $0x20] sm:$0x1]  ;;  %v4108_v50 = vld [vmem:[#allocation2 + $0x28] sm:$0x7]  ;;  %v508_v51 = vrot.slane %v4104_v47, 1  ;;  %v4111_v52 = vld [vmem:[#allocation2 + $0x10] sm:$0xff] }
 0x130   : > { %v520_v53 = vadd.f32 %v506_v46, %v4106_v49  ;;  %v533_v54 = vrot.slane %v4099_v44, 2  ;;  %v4115_v55 = vld [vmem:[#allocation2 + $0x28] sm:$0x1]  ;;  %v4117_v56 = vld [vmem:[#allocation2 + $0x18] sm:$0xff]  ;;  %v4121_v58 = vrot.slane %v4111_v52, 1  ;;  %v535_v60 = vrot.slane %v4108_v50, 2 }
 0x131   : > { %v521_v59 = vadd.f32 %v508_v51, %v4115_v55  ;;  %v4126_v61 = vrot.slane %v4117_v56, 1  ;;  %v4145_v6 = vrot.slane %v4117_v56, 2  ;;  %v4148_v9 = vrot.slane %v4111_v52, 2 }
 0x132   : > { %v4128_v63 = vadd.f32 %v533_v54, %v520_v53  ;;  %v502_v2 = vsel %vm499_vm9, %v500_v62, %v4121_v58  ;;  %v507_v22 = vsel %vm499_vm9, %v4121_v58, %v506_v46  ;;  %v622_v23 = vsel %vm499_vm9, %v621_v20, %v4121_v58 }
 0x133   : > { %v4130_v0 = vadd.f32 %v535_v60, %v521_v59  ;;  %v505_v1 = vsel %vm499_vm9, %v503_v57, %v4126_v61  ;;  %v509_v3 = vsel %vm499_vm9, %v4126_v61, %v508_v51  ;;  %v516_v11 = vadd.f32 %v502_v2, %v477_v8 }
 0x134   : > { %591 = vrot.lane.b32.xlu1 %v4128_v63, %s3914_s30  ;;  %563 = vrot.lane.b32.xlu2 %v4128_v63, %s3915_s11  ;;  %v517_v10 = vadd.f32 %v505_v1, %v478_v7  ;;  %v519_v12 = vadd.f32 %v509_v3, %v4117_v56  ;;  %v532_v15 = vsel %vm526_vm10, %v530_v13, %v4145_v6  ;;  %v655_v32 = vrot.slane %v4111_v52, 3  ;;  %v492_v13 = vld [vmem:[#allocation2 + $0x28] sm:$0xf] }
 0x135   : > { %565 = vrot.lane.b32.xlu0 %v4130_v0, %s3915_s11  ;;  %v529_v16 = vsel %vm526_vm10, %v527_v14, %v4148_v9  ;;  %v536_v17 = vsel %vm526_vm10, %v4145_v6, %v535_v60  ;;  %v518_v24 = vadd.f32 %v507_v22, %v4111_v52  ;;  %v633_v26 = vadd.f32 %v622_v23, %v473_v25  ;;  %v490_v60 = vld [vmem:[#allocation2 + $0x8] sm:$0xf0] }
 0x136   : > { %v4157_v18 = vadd.f32 %v532_v15, %v517_v10  ;;  %v4159_v19 = vadd.f32 %v529_v16, %v516_v11  ;;  %v4161_v21 = vadd.f32 %v536_v17, %v519_v12  ;;  %v534_v28 = vsel %vm526_vm10, %v4148_v9, %v533_v54  ;;  %v491_v17 = vld [vmem:[#allocation2 + $0x20] sm:$0xf] }
 0x137   : > { %v4176_v30 = vadd.f32 %v534_v28, %v518_v24  ;;  %v638_v31 = vsel %vm526_vm10, %v637_v27, %v4148_v9  ;;  %v624_v34 = vsel %vm499_vm9, %v623_v29, %v4126_v61  ;;  %v656_v38 = vsel %vm653_vm11, %v654_v35, %v655_v32  ;;  %v3385_v28 = vld [vmem:[%s5928_s2 + $0x170] sm:$0xff]  ;;  %v3384_v29 = vld [vmem:[%s5928_s2 + $0x168] sm:$0xff] }
 0x138   : > { %v649_v33 = vadd.f32 %v638_v31, %v633_v26  ;;  %v678_v39 = vrot.slane %v4111_v52, 4  ;;  %v634_v40 = vadd.f32 %v624_v34, %v474_v37  ;;  %v677_v46 = vrot.slane %v489_v36, 4  ;;  %v3386_v26 = vld [vmem:[%s5928_s2 + $0x178] sm:$0xff]  ;;  %v3381_v35 = vld [vmem:[%s5928_s2 + $0x150] sm:$0xff]  ;;  %v3380_v37 = vld [vmem:[%s5928_s2 + $0x148] sm:$0xff] }
 0x139   : > { %v640_v48 = vsel %vm526_vm10, %v639_v42, %v4145_v6  ;;  %v658_v51 = vrot.slane %v4117_v56, 3  ;;  %v657_v59 = vrot.slane %v486_v4, 3  ;;  %v681_v62 = vrot.slane %v4117_v56, 4  ;;  %883 = vmatpush.msra.mxu3 %v3386_v26  ;;  %v3382_v34 = vld [vmem:[%s5928_s2 + $0x158] sm:$0xff]  ;;  %v3377_v42 = vld [vmem:[%s5928_s2 + $0x130] sm:$0xff] }
 0x13a   : > { %v668_v41 = vadd.f32 %v656_v38, %v649_v33  ;;  %v679_v53 = vsel %vm676_vm12, %v677_v46, %v678_v39  ;;  %v650_v54 = vadd.f32 %v640_v48, %v634_v40  ;;  %v680_v2 = vrot.slane %v490_v60, 4  ;;  %v3376_v46 = vld [vmem:[%s5928_s2 + $0x128] sm:$0xff] }
 0x13b   : > { %v659_v45 = vsel %vm653_vm11, %v657_v59, %v658_v51  ;;  %v627_v3 = vrot.slane %v4115_v55, 1  ;;  %v643_v8 = vrot.slane %v4104_v47, 2  ;;  %v625_v11 = vrot.slane %v4106_v49, 1  ;;  %884 = vmatpush.msra.mxu3 %v3385_v28 }
 0x13c   : > { %557 = vrot.lane.b32.xlu2 %v4157_v18, %s3915_s11  ;;  %555 = vrot.lane.b32.xlu1 %v4159_v19, %s3915_s11  ;;  %v4198_v57 = vadd.f32 %v679_v53, %v668_v41  ;;  %v669_v1 = vadd.f32 %v659_v45, %v650_v54  ;;  %v682_v4 = vsel %vm676_vm12, %v680_v2, %v681_v62  ;;  %v662_v12 = vrot.slane %v4108_v50, 3  ;;  %v3378_v41 = vld [vmem:[%s5928_s2 + $0x138] sm:$0xff]  ;;  %v3375_v53 = vld [vmem:[%s5928_s2 + $0x120] sm:$0xff] }
 0x13d   : > { %561 = vrot.lane.b32.xlu0 %v4161_v21, %s3915_s11  ;;  %v628_v7 = vsel %vm499_vm9, %v4126_v61, %v627_v3  ;;  %v644_v55 = vsel %vm526_vm10, %v4145_v6, %v643_v8  ;;  %v626_v15 = vsel %vm499_vm9, %v4121_v58, %v625_v11  ;;  %v641_v47 = vrot.slane %v4097_v43, 2  ;;  %885 = vmatpush.msra.mxu3 %v3384_v29  ;;  %v3374_v45 = vld [vmem:[%s5928_s2 + $0x118] sm:$0xff] }
 0x13e   : > { %v692_v5 = vadd.f32 %v682_v4, %v669_v1  ;;  %v636_v10 = vadd.f32 %v628_v7, %v4117_v56  ;;  %v663_v49 = vsel %vm653_vm11, %v658_v51, %v662_v12  ;;  %v685_v56 = vrot.slane %v492_v13, 4  ;;  %v3373_v7 = vld [vmem:[%s5928_s2 + $0x110] sm:$0xff]  ;;  %v3371_v13 = vld [vmem:[%s5928_s2 + $0x100] sm:$0xff] }
 0x13f   : > { %v635_v50 = vadd.f32 %v626_v15, %v4111_v52  ;;  %v642_v58 = vsel %vm526_vm10, %v4148_v9, %v641_v47  ;;  %v660_v6 = vrot.slane %v4099_v44, 3  ;;  %v683_v23 = vrot.slane %v491_v17, 4 }
 0x140   : > { %v652_v14 = vadd.f32 %v644_v55, %v636_v10  ;;  %v686_v16 = vsel %vm676_vm12, %v681_v62, %v685_v56  ;;  %v3372_v55 = vld [vmem:[%s5928_s2 + $0x108] sm:$0xff] }
 0x141   : > { %v651_v20 = vadd.f32 %v642_v58, %v635_v50  ;;  %v661_v43 = vsel %vm653_vm11, %v655_v32, %v660_v6  ;;  %v684_v25 = vsel %vm676_vm12, %v678_v39, %v683_v23  ;;  %v3383_v32 = vld [vmem:[%s5928_s2 + $0x160] sm:$0xff] }
 0x142   : > { %v671_v61 = vadd.f32 %v663_v49, %v652_v14  ;;  %886 = vmatpush.msra.mxu3 %v3383_v32  ;;  %v3379_v39 = vld [vmem:[%s5928_s2 + $0x140] sm:$0xff] }
 0x143   : > { %v670_v24 = vadd.f32 %v661_v43, %v651_v20 }
 0x144   : > { %559 = vrot.lane.b32.xlu2 %v4176_v30, %s3915_s11  ;;  %583 = vrot.lane.b32.xlu1 %v4159_v19, %s3914_s30  ;;  %v694_v22 = vadd.f32 %v686_v16, %v671_v61 }
 0x145   : > { %587 = vrot.lane.b32.xlu0 %v4176_v30, %s3914_s30  ;;  %v4240_v9 = vadd.f32 %v684_v25, %v670_v24  ;;  %887 = vmatpush.msra.mxu3 %v3382_v34  ;;  %v3370_v34 = vld [vmem:[%s5928_s2 + $0xf8] sm:$0xff] }
 0x146   : > { %820 = vmatpush.msra.mxu1 %v3370_v34 }
 0x147   : > { %888 = vmatpush.msra.mxu3 %v3381_v35  ;;  %v3369_v35 = vld [vmem:[%s5928_s2 + $0xf0] sm:$0xff] }
 0x148   : > { %821 = vmatpush.msra.mxu1 %v3369_v35 }
 0x149   : > { %889 = vmatpush.msra.mxu3 %v3380_v37 }
 0x14b   : > { %890 = vmatpush.msra.mxu3 %v3379_v39 }
 0x14c   : > { %585 = vrot.lane.b32.xlu2 %v4157_v18, %s3914_s30  ;;  %589 = vrot.lane.b32.xlu1 %v4161_v21, %s3914_s30 }
 0x14d   : > { %699 = vrot.lane.b32.xlu0 %v4198_v57, %s3915_s11  ;;  %891 = vmatpush.msra.mxu3 %v3378_v41 }
 0x14f   : > { %892 = vmatpush.msra.mxu3 %v3377_v42 }
 0x151   : > { %893 = vmatpush.msra.mxu3 %v3376_v46 }
 0x153   : > { %894 = vmatpush.msra.mxu3 %v3375_v53 }
 0x154   : > { %593 = vrot.lane.b32.xlu2 %v4130_v0, %s3914_s30  ;;  %701 = vrot.lane.b32.xlu1 %v692_v5, %s3915_s11 }
 0x155   : > { %715 = vrot.lane.b32.xlu0 %v692_v5, %s3914_s30  ;;  %895 = vmatpush.msra.mxu3 %v3374_v45 }
 0x157   : > { %896 = vmatpush.msra.mxu3 %v3373_v7 }
 0x159   : > { %897 = vmatpush.msra.mxu3 %v3372_v55  ;;  %v3366_v55 = vld [vmem:[%s5928_s2 + $0xd8] sm:$0xff] }
 0x15b   : > { %898 = vmatpush.msra.mxu3 %v3371_v13  ;;  %v3362_v13 = vld [vmem:[%s5928_s2 + $0xb8] sm:$0xff] }
 0x15c   : > { %713 = vrot.lane.b32.xlu2 %v4198_v57, %s3914_s30  ;;  %727 = vrot.lane.b32.xlu1 %v4198_v57, %s3916_s14 }
 0x15d   : > { %742 = vrot.lane.b32.xlu0 %v4198_v57, %s3917_s12 }
 0x164   : > { %729 = vrot.lane.b32.xlu2 %v692_v5, %s3916_s14  ;;  %744 = vrot.lane.b32.xlu1 %v692_v5, %s3917_s12 }
 0x165   : > { %705 = vrot.lane.b32.xlu0 %v694_v22, %s3915_s11 }
 0x16c   : > { %703 = vrot.lane.b32.xlu2 %v4240_v9, %s3915_s11  ;;  %717 = vrot.lane.b32.xlu1 %v4240_v9, %s3914_s30 }
 0x16d   : > { %731 = vrot.lane.b32.xlu0 %v4240_v9, %s3916_s14 }
 0x174   : > { %719 = vrot.lane.b32.xlu2 %v694_v22, %s3914_s30  ;;  %733 = vrot.lane.b32.xlu1 %v694_v22, %s3916_s14 }
 0x175   : > { %748 = vrot.lane.b32.xlu0 %v694_v22, %s3917_s12 }
 0x17c   : > { %746 = vrot.lane.b32.xlu2 %v4240_v9, %s3917_s12  ;;  %s396_s12 = scalar_lea.vmem %s5936_s10, %s4051_s23 }
 0x18e   : > { %v564_v44 = vpop.permute.xlu2 %563 }
 0x196   : > { %v558_v52 = vpop.permute.xlu2 %557 }
 0x197   : > { %v578_v62 = vadd.f32 %v558_v52, %v4157_v18 }
 0x19e   : > { %v560_v27 = vpop.permute.xlu2 %559 }
 0x1a6   : > { %v592_v31 = vpop.permute.xlu1 %591  ;;  %v586_v36 = vpop.permute.xlu2 %585 }
 0x1a7   : > { %v566_v33 = vpop.permute.xlu0 %565  ;;  %v606_v8 = vadd.f32 %v586_v36, %v578_v62 }
 0x1a8   : > { %v570_v54 = vsel %vm567_vm13, %v564_v44, %v566_v33  ;;  %v582_v1 = vadd.f32 %v566_v33, %v4130_v0 }
 0x1a9   : > { %v581_v4 = vadd.f32 %v570_v54, %v4128_v63  ;;  %v612_v14 = vmul.f32 0.11111111, %v606_v8 }
 0x1ae   : > { %v556_v38 = vpop.permute.xlu1 %555  ;;  %v594_v48 = vpop.permute.xlu2 %593 }
 0x1af   : > { %v562_v40 = vpop.permute.xlu0 %561  ;;  %v568_v59 = vsel %vm567_vm13, %v556_v38, %v558_v52  ;;  %v598_v2 = vsel %vm595_vm14, %v592_v31, %v594_v48  ;;  %v610_v10 = vadd.f32 %v594_v48, %v582_v1 }
 0x1b0   : > { %v577_v5 = vadd.f32 %v568_v59, %v4159_v19  ;;  %v569_v11 = vsel %vm567_vm13, %v560_v27, %v562_v40  ;;  %v609_v18 = vadd.f32 %v598_v2, %v581_v4  ;;  %v580_v12 = vadd.f32 %v562_v40, %v4161_v21 }
 0x1b1   : > { %v579_v63 = vadd.f32 %v569_v11, %v4176_v30  ;;  %v616_v15 = vmul.f32 0.11111111, %v610_v10  ;;  %v801_v30 = vrot.slane %v612_v14, 1  ;;  %v3361_v14 = vld [vmem:[%s5928_s2 + $0xb0] sm:$0xff] }
 0x1b2   : > { %v615_v50 = vmul.f32 0.11111111, %v609_v18 }
 0x1b3   : > { %v806_v17 = vrot.slane %v616_v15, 1  ;;  %v3360_v15 = vld [vmem:[%s5928_s2 + $0xa8] sm:$0xff] }
 0x1b4   : > { %v804_v22 = vrot.slane %v615_v50, 1  ;;  %v3356_v50 = vld [vmem:[%s5928_s2 + $0x88] sm:$0xff] }
 0x1b6   : > { %v584_v51 = vpop.permute.xlu1 %583  ;;  %v714_v61 = vpop.permute.xlu2 %713 }
 0x1b7   : > { %v588_v60 = vpop.permute.xlu0 %587  ;;  %v596_v3 = vsel %vm595_vm14, %v584_v51, %v586_v36 }
 0x1b8   : > { %v605_v0 = vadd.f32 %v596_v3, %v577_v5 }
 0x1ba   : > { %v611_v58 = vmul.f32 0.11111111, %v605_v0  ;;  %v3368_v0 = vld [vmem:[%s5928_s2 + $0xe8] sm:$0xff] }
 0x1bb   : > { %822 = vmatpush.msra.mxu1 %v3368_v0 }
 0x1bc   : > { %v798_v43 = vrot.slane %v611_v58, 1 }
 0x1be   : > { %v590_v19 = vpop.permute.xlu1 %589  ;;  %v730_v31 = vpop.permute.xlu2 %729 }
 0x1bf   : > { %v597_v47 = vsel %vm595_vm14, %v588_v60, %v590_v19  ;;  %v608_v49 = vadd.f32 %v590_v19, %v580_v12  ;;  %v700_v56 = vpop.permute.xlu0 %699  ;;  %v3365_v12 = vld [vmem:[%s5928_s2 + $0xd0] sm:$0xff]  ;;  %v3363_v19 = vld [vmem:[%s5928_s2 + $0xc0] sm:$0xff] }
 0x1c0   : > { %v607_v6 = vadd.f32 %v597_v47, %v579_v63  ;;  %v3364_v63 = vld [vmem:[%s5928_s2 + $0xc8] sm:$0xff]  ;;  %v3359_v47 = vld [vmem:[%s5928_s2 + $0xa0] sm:$0xff] }
 0x1c1   : > { %v614_v21 = vmul.f32 0.11111111, %v608_v49  ;;  %v3358_v49 = vld [vmem:[%s5928_s2 + $0x98] sm:$0xff] }
 0x1c2   : > { %v613_v16 = vmul.f32 0.11111111, %v607_v6 }
 0x1c3   : > { %v802_v20 = vrot.slane %v614_v21, 1 }
 0x1c4   : > { %v799_v23 = vrot.slane %v613_v16, 1 }
 0x1c5   : > { %v807_v24 = vsel %vm499_vm9, %v802_v20, %v806_v17  ;;  %v803_v25 = vsel %vm499_vm9, %v801_v30, %v802_v20 }
 0x1c6   : > { %v702_v44 = vpop.permute.xlu1 %701  ;;  %v805_v52 = vsel %vm499_vm9, %v799_v23, %v804_v22  ;;  %v800_v26 = vsel %vm499_vm9, %v798_v43, %v799_v23  ;;  %v704_v40 = vpop.permute.xlu2 %703 }
 0x1c7   : > { %v716_v27 = vpop.permute.xlu0 %715  ;;  %v3806_v28 = vpack.i.bf16 %v807_v24, %v805_v52  ;;  %v3801_v29 = vpack.i.bf16 %v803_v25, %v800_v26  ;;  %v707_v32 = vsel %vm567_vm13, %v700_v56, %v702_v44  ;;  %v3357_v56 = vld [vmem:[%s5928_s2 + $0x90] sm:$0xff]  ;;  %v860_v43 = vpop.f32.mrf.mxu2 }
 0x1c8   : > { %v711_v37 = vadd.f32 %v707_v32, %v4198_v57  ;;  %v721_v38 = vsel %vm595_vm14, %v714_v61, %v716_v27  ;;  %v3355_v61 = vld [vmem:[%s5928_s2 + $0x80] sm:$0xff] }
 0x1c9   : > { %3807 = vrot.lane.b32.xlu2 %v3806_v28, %s3915_s11  ;;  %3802 = vrot.lane.b32.xlu1 %v3801_v29, %s3915_s11 }
 0x1ca   : > { %v725_v41 = vadd.f32 %v721_v38, %v711_v37 }
 0x1ce   : > { %v728_v33 = vpop.permute.xlu1 %727  ;;  %v720_v59 = vpop.permute.xlu2 %719 }
 0x1cf   : > { %v743_v36 = vpop.permute.xlu0 %742  ;;  %v736_v39 = vsel %vm735_vm15, %v728_v33, %v730_v31  ;;  %v863_v27 = vpop.f32.mrf.mxu2 }
 0x1d0   : > { %v740_v42 = vadd.f32 %v736_v39, %v725_v41 }
 0x1d6   : > { %v745_v46 = vpop.permute.xlu1 %744  ;;  %v747_v7 = vpop.permute.xlu2 %746 }
 0x1d7   : > { %v751_v48 = vsel %vm750_vm0, %v743_v36, %v745_v46  ;;  %v706_v51 = vpop.permute.xlu0 %705 }
 0x1d8   : > { %v755_v53 = vadd.f32 %v751_v48, %v740_v42  ;;  %v708_v45 = vsel %vm567_vm13, %v704_v40, %v706_v51 }
 0x1d9   : > { %v712_v1 = vadd.f32 %v708_v45, %v4240_v9  ;;  %v3367_v9 = vld [vmem:[%s5928_s2 + $0xe0] sm:$0xff] }
 0x1da   : > { %v757_v54 = vmul.f32 0.04, %v755_v53  ;;  %823 = vmatpush.msra.mxu1 %v3367_v9 }
 0x1dc   : > { %899 = vmatmul.f32.vlgmr.msra.gmra.mxu3 %v757_v54  ;;  %824 = vmatpush.msra.mxu1 %v3366_v55 }
 0x1de   : > { %v718_v60 = vpop.permute.xlu1 %717  ;;  %825 = vmatpush.msra.mxu1 %v3365_v12 }
 0x1df   : > { %v732_v57 = vpop.permute.xlu0 %731  ;;  %v722_v62 = vsel %vm595_vm14, %v718_v60, %v720_v59 }
 0x1e0   : > { %v726_v2 = vadd.f32 %v722_v62, %v712_v1  ;;  %826 = vmatpush.msra.mxu1 %v3364_v63 }
 0x1e2   : > { %827 = vmatpush.msra.mxu1 %v3363_v19 }
 0x1e4   : > { %828 = vmatpush.msra.mxu1 %v3362_v13 }
 0x1e6   : > { %v734_v3 = vpop.permute.xlu1 %733  ;;  %829 = vmatpush.msra.mxu1 %v3361_v14 }
 0x1e7   : > { %v737_v4 = vsel %vm735_vm15, %v732_v57, %v734_v3  ;;  %v749_v5 = vpop.permute.xlu0 %748 }
 0x1e8   : > { %v741_v8 = vadd.f32 %v737_v4, %v726_v2  ;;  %v752_v10 = vsel %vm750_vm0, %v747_v7, %v749_v5  ;;  %830 = vmatpush.msra.mxu1 %v3360_v15 }
 0x1ea   : > { %v756_v11 = vadd.f32 %v752_v10, %v741_v8  ;;  %831 = vmatpush.msra.mxu1 %v3359_v47 }
 0x1ec   : > { %v758_v18 = vmul.f32 0.04, %v756_v11  ;;  %832 = vmatpush.msra.mxu1 %v3358_v49 }
 0x1ee   : > { %902 = vmatmul.f32.gmra.mxu3 %v758_v18  ;;  %833 = vmatpush.msra.mxu1 %v3357_v56 }
 0x1f0   : > { %834 = vmatpush.msra.mxu1 %v3356_v50 }
 0x1f2   : > { %835 = vmatpush.msra.mxu1 %v3355_v61 }
 0x223   : > { %v3808_v30 = vpop.permute.xlu2 %3807 }
 0x224   : > { %v3810_v17 = vunpack.i.h.bf16 %v3808_v30  ;;  %v3809_v20 = vunpack.i.l.bf16 %v3808_v30 }
 0x226   : > { %v817_v22 = vsel %vm567_vm13, %v3809_v20, %v3810_v17 }
 0x23b   : > { %v3803_v58 = vpop.permute.xlu1 %3802 }
 0x23c   : > { %v3805_v6 = vunpack.i.h.bf16 %v3803_v58  ;;  %v3804_v21 = vunpack.i.l.bf16 %v3803_v58 }
 0x23e   : > { %v816_v16 = vsel %vm567_vm13, %v3804_v21, %v3805_v6 }
 0x23f   : > { %836 = vmatmul.f32.vlgmr.msra.gmra.mxu1 %v816_v16 }
 0x247   : > { %839 = vmatmul.f32.gmra.mxu1 %v817_v22 }
 0x25f   : > { %v900_v25 = vpop.f32.mrf.mxu3 }
 0x271   : > { %v903_v31 = vpop.f32.mrf.mxu3 }
 0x2bc   : > { %v837_v23 = vpop.f32.mrf.mxu1 }
 0x2bd   : > { %v861_v24 = vadd.f32 %v860_v43, %v837_v23  ;;  %v3402_v43 = vld [vmem:[%s5929_s3 + $0x108] sm:$0xff]  ;;  %v959_v23 = vld [vmem:[%s5929_s3 + $0x78] sm:$0xff] }
 0x2be   : > { %1013 = vmatpush.msrb.mxu0 %v3402_v43  ;;  %1089 = vmatpush.msrb.mxu2 %v959_v23 }
 0x2bf   : > { %v906_v44 = vadd.f32 %v900_v25, %v861_v24  ;;  %v3401_v24 = vld [vmem:[%s5929_s3 + $0x100] sm:$0xff]  ;;  %v958_v25 = vld [vmem:[%s5929_s3 + $0x70] sm:$0xff] }
 0x2c0   : > { %1014 = vmatpush.msrb.mxu0 %v3401_v24  ;;  %1090 = vmatpush.msrb.mxu2 %v958_v25 }
 0x2c1   : > { %v908_v52 = vmax.f32 %v906_v44, 0.0  ;;  %v3400_v44 = vld [vmem:[%s5929_s3 + $0xf8] sm:$0xff] }
 0x2c2   : > { %1015 = vmatpush.msrb.mxu0 %v3400_v44 }
 0x2c3   : > { %v912_v26 = vrot.slane %v908_v52, 6  ;;  %v957_v52 = vld [vmem:[%s5929_s3 + $0x68] sm:$0xff] }
 0x2c4   : > { %v840_v28 = vpop.f32.mrf.mxu1  ;;  %1091 = vmatpush.msrb.mxu2 %v957_v52 }
 0x2c5   : > { %v864_v29 = vadd.f32 %v863_v27, %v840_v28  ;;  %915 = vrot.lane.b32.xlu0 %v912_v26, %s3913_s29  ;;  %v3404_v27 = vld [vmem:[%s5929_s3 + $0x118] sm:$0xff]  ;;  %v3399_v28 = vld [vmem:[%s5929_s3 + $0xf0] sm:$0xff] }
 0x2c6   : > { %1050 = vmatpush.msrb.mxu1 %v3404_v27  ;;  %1016 = vmatpush.msrb.mxu0 %v3399_v28 }
 0x2c7   : > { %v907_v32 = vadd.f32 %v903_v31, %v864_v29  ;;  %v956_v29 = vld [vmem:[%s5929_s3 + $0x60] sm:$0xff]  ;;  %v3403_v31 = vld [vmem:[%s5929_s3 + $0x110] sm:$0xff] }
 0x2c8   : > { %1092 = vmatpush.msrb.mxu2 %v956_v29  ;;  %1051 = vmatpush.msrb.mxu1 %v3403_v31 }
 0x2c9   : > { %v909_v33 = vmax.f32 %v907_v32, 0.0  ;;  %v3398_v32 = vld [vmem:[%s5929_s3 + $0xe8] sm:$0xff] }
 0x2ca   : > { %1017 = vmatpush.msrb.mxu0 %v3398_v32 }
 0x2cb   : > { %v913_v34 = vrot.slane %v909_v33, 6  ;;  %v955_v33 = vld [vmem:[%s5929_s3 + $0x58] sm:$0xff] }
 0x2cc   : > { %1093 = vmatpush.msrb.mxu2 %v955_v33 }
 0x2cd   : > { %919 = vrot.lane.b32.xlu2 %v913_v34, %s3913_s29  ;;  %v914_v35 = vsel %vm448_vm1, %v912_v26, %v913_v34  ;;  %v961_v26 = vld [vmem:[%s5929_s3 + $0x88] sm:$0xff]  ;;  %v3424_v34 = vld [vmem:[%s5929_s3 + $0x198] sm:$0xff] }
 0x2ce   : > { %917 = vrot.lane.b32.xlu1 %v914_v35, %s3913_s29  ;;  %1126 = vmatpush.msrb.mxu3 %v961_v26  ;;  %v3397_v35 = vld [vmem:[%s5929_s3 + $0xe0] sm:$0xff] }
 0x2cf   : > { %1184 = vmatpush.msra.mxu1 %v3424_v34  ;;  %1018 = vmatpush.msrb.mxu0 %v3397_v35 }
 0x327   : > { %v920_v36 = vpop.permute.xlu2 %919 }
 0x328   : > { %928 = vst.msk [vmem:[#allocation2 + $0x20] sm:$0x3] %vm469_vm5, %v920_v36 }
 0x329   : > { %929 = vst.msk [vmem:[#allocation2 + $0x28] sm:$0x3] %vm471_vm6, %v920_v36  ;;  %v954_v36 = vld [vmem:[%s5929_s3 + $0x50] sm:$0xff] }
 0x32a   : > { %1094 = vmatpush.msrb.mxu2 %v954_v36 }
 0x32f   : > { %v934_v19 = vld [vmem:[#allocation2 + $0x20] sm:$0x1] }
 0x330   : > { %v935_v39 = vld [vmem:[#allocation2 + $0x28] sm:$0x1]  ;;  %v938_v15 = vld [vmem:[#allocation2 + $0x20] sm:$0x3]  ;;  %v1069_v49 = vrot.slane %v934_v19, 1  ;;  %v3387_v19 = vld [vmem:[%s5929_s3 + $0x90] sm:$0xff] }
 0x331   : > { %v1071_v46 = vrot.slane %v935_v39, 1  ;;  %v939_v5 = vld [vmem:[#allocation2 + $0x28] sm:$0x3]  ;;  %v993_v58 = vrot.slane %v938_v15, 2  ;;  %v942_v17 = vld [vmem:[#allocation2 + $0x20] sm:$0x7] }
 0x332   : > { %v995_v9 = vrot.slane %v939_v5, 2  ;;  %v943_v47 = vld [vmem:[#allocation2 + $0x28] sm:$0x7]  ;;  %v1164_v20 = vrot.slane %v942_v17, 3  ;;  %v3417_v5 = vld [vmem:[%s5929_s3 + $0x160] sm:$0xff]  ;;  %v3412_v15 = vld [vmem:[%s5929_s3 + $0x138] sm:$0xff] }
 0x333   : > { %v1166_v6 = vrot.slane %v943_v47, 3  ;;  %v953_v39 = vld [vmem:[%s5929_s3 + $0x48] sm:$0xff]  ;;  %v3411_v47 = vld [vmem:[%s5929_s3 + $0x130] sm:$0xff] }
 0x334   : > { %1095 = vmatpush.msrb.mxu2 %v953_v39 }
 0x337   : > { %v916_v37 = vpop.permute.xlu0 %915 }
 0x338   : > { %924 = vst.msk [vmem:[#allocation2] sm:$0xfc] %vm461_vm3, %v916_v37 }
 0x339   : > { %925 = vst.msk [vmem:[#allocation2 + $0x8] sm:$0xfc] %vm463_vm4, %v916_v37  ;;  %v3423_v37 = vld [vmem:[%s5929_s3 + $0x190] sm:$0xff] }
 0x33a   : > { %1185 = vmatpush.msra.mxu1 %v3423_v37 }
 0x33f   : > { %v930_v62 = vld [vmem:[#allocation2] sm:$0xfe] }
 0x340   : > { %v918_v38 = vpop.permute.xlu1 %917  ;;  %v937_v40 = vld [vmem:[#allocation2 + $0x8] sm:$0xfc]  ;;  %v936_v1 = vld [vmem:[#allocation2] sm:$0xfc]  ;;  %v1063_v8 = vrot.slane %v930_v62, 1 }
 0x341   : > { %926 = vst.msk [vmem:[#allocation2 + $0x10] sm:$0xff] %vm465_vm7, %v918_v38  ;;  %v931_v41 = vld [vmem:[#allocation2 + $0x8] sm:$0xfe]  ;;  %v990_v51 = vrot.slane %v937_v40, 2  ;;  %v987_v7 = vrot.slane %v936_v1, 2  ;;  %v960_v40 = vld [vmem:[%s5929_s3 + $0x80] sm:$0xff] }
 0x342   : > { %927 = vst.msk [vmem:[#allocation2 + $0x18] sm:$0xff] %vm467_vm8, %v918_v38  ;;  %v1066_v54 = vrot.slane %v931_v41, 1  ;;  %v941_v4 = vld [vmem:[#allocation2 + $0x8] sm:$0xf8]  ;;  %v940_v13 = vld [vmem:[#allocation2] sm:$0xf8]  ;;  %1127 = vmatpush.msrb.mxu3 %v960_v40 }
 0x343   : > { %v1161_v0 = vrot.slane %v941_v4, 3  ;;  %v1158_v56 = vrot.slane %v940_v13, 3  ;;  %v3396_v38 = vld [vmem:[%s5929_s3 + $0xd8] sm:$0xff]  ;;  %v3422_v41 = vld [vmem:[%s5929_s3 + $0x188] sm:$0xff]  ;;  %v948_v4 = vld [vmem:[%s5929_s3 + $0x20] sm:$0xff] }
 0x344   : > { %1019 = vmatpush.msrb.mxu0 %v3396_v38  ;;  %1186 = vmatpush.msra.mxu1 %v3422_v41  ;;  %v949_v62 = vld [vmem:[%s5929_s3 + $0x28] sm:$0xff]  ;;  %v944_v13 = vld [vmem:[%s5929_s3] sm:$0xff] }
 0x345   : > { %v3418_v1 = vld [vmem:[%s5929_s3 + $0x168] sm:$0xff] }
 0x348   : > { %v932_v59 = vld [vmem:[#allocation2 + $0x10] sm:$0xff] }
 0x349   : > { %v933_v42 = vld [vmem:[#allocation2 + $0x18] sm:$0xff]  ;;  %v988_v2 = vrot.slane %v932_v59, 2  ;;  %v1064_v3 = vrot.slane %v932_v59, 1  ;;  %v1159_v14 = vrot.slane %v932_v59, 3  ;;  %v3393_v59 = vld [vmem:[%s5929_s3 + $0xc0] sm:$0xff] }
 0x34a   : > { %v1067_v48 = vrot.slane %v933_v42, 1  ;;  %v991_v53 = vrot.slane %v933_v42, 2  ;;  %v1162_v10 = vrot.slane %v933_v42, 3  ;;  %v3395_v42 = vld [vmem:[%s5929_s3 + $0xd0] sm:$0xff] }
 0x34b   : > { %v989_v11 = vsel %vm526_vm10, %v987_v7, %v988_v2  ;;  %v1065_v18 = vsel %vm499_vm9, %v1063_v8, %v1064_v3  ;;  %v1070_v50 = vsel %vm499_vm9, %v1064_v3, %v1069_v49  ;;  %v1160_v61 = vsel %vm653_vm11, %v1158_v56, %v1159_v14  ;;  %1020 = vmatpush.msrb.mxu0 %v3395_v42  ;;  %v3391_v3 = vld [vmem:[%s5929_s3 + $0xb0] sm:$0xff]  ;;  %v3390_v7 = vld [vmem:[%s5929_s3 + $0xa8] sm:$0xff]  ;;  %v947_v8 = vld [vmem:[%s5929_s3 + $0x18] sm:$0xff] }
 0x34c   : > { %v1072_v60 = vsel %vm499_vm9, %v1067_v48, %v1071_v46  ;;  %v992_v57 = vsel %vm526_vm10, %v990_v51, %v991_v53  ;;  %v1068_v45 = vsel %vm499_vm9, %v1066_v54, %v1067_v48  ;;  %v1163_v55 = vsel %vm653_vm11, %v1161_v0, %v1162_v10  ;;  %v952_v46 = vld [vmem:[%s5929_s3 + $0x40] sm:$0xff]  ;;  %v3394_v51 = vld [vmem:[%s5929_s3 + $0xc8] sm:$0xff]  ;;  %v3420_v54 = vld [vmem:[%s5929_s3 + $0x178] sm:$0xff] }
 0x34d   : > { %1079 = vrot.lane.b32.xlu2 %v1072_v60, %s3915_s11  ;;  %999 = vrot.lane.b32.xlu1 %v992_v57, %s3915_s11  ;;  %v996_v12 = vsel %vm526_vm10, %v991_v53, %v995_v9  ;;  %v3811_v63 = vpack.i.bf16 %v989_v11, %v1065_v18  ;;  %v994_v21 = vsel %vm526_vm10, %v988_v2, %v993_v58  ;;  %v3421_v48 = vld [vmem:[%s5929_s3 + $0x180] sm:$0xff]  ;;  %v951_v53 = vld [vmem:[%s5929_s3 + $0x38] sm:$0xff] }
 0x34e   : > { %1075 = vrot.lane.b32.xlu0 %v1068_v45, %s3915_s11  ;;  %v1167_v16 = vsel %vm653_vm11, %v1162_v10, %v1166_v6  ;;  %v3816_v30 = vpack.i.bf16 %v1160_v61, %v1070_v50  ;;  %v1165_v22 = vsel %vm653_vm11, %v1159_v14, %v1164_v20  ;;  %1096 = vmatpush.msrb.mxu2 %v952_v46  ;;  %v950_v60 = vld [vmem:[%s5929_s3 + $0x30] sm:$0xff]  ;;  %v3392_v45 = vld [vmem:[%s5929_s3 + $0xb8] sm:$0xff]  ;;  %v3426_v2 = vld [vmem:[%s5929_s3 + $0x1a8] sm:$0xff] }
 0x34f   : > { %1187 = vmatpush.msra.mxu1 %v3421_v48  ;;  %1021 = vmatpush.msrb.mxu0 %v3394_v51  ;;  %v3419_v57 = vld [vmem:[%s5929_s3 + $0x170] sm:$0xff]  ;;  %v3416_v10 = vld [vmem:[%s5929_s3 + $0x158] sm:$0xff]  ;;  %v3389_v11 = vld [vmem:[%s5929_s3 + $0xa0] sm:$0xff] }
 0x350   : > { %1097 = vmatpush.msrb.mxu2 %v951_v53  ;;  %1221 = vmatpush.msra.mxu3 %v3426_v2  ;;  %v946_v18 = vld [vmem:[%s5929_s3 + $0x10] sm:$0xff]  ;;  %v3388_v9 = vld [vmem:[%s5929_s3 + $0x98] sm:$0xff]  ;;  %v3413_v14 = vld [vmem:[%s5929_s3 + $0x140] sm:$0xff] }
 0x351   : > { %1188 = vmatpush.msra.mxu1 %v3420_v54  ;;  %1022 = vmatpush.msrb.mxu0 %v3393_v59  ;;  %v3415_v0 = vld [vmem:[%s5929_s3 + $0x150] sm:$0xff]  ;;  %v3410_v49 = vld [vmem:[%s5929_s3 + $0x128] sm:$0xff]  ;;  %v3409_v56 = vld [vmem:[%s5929_s3 + $0x120] sm:$0xff] }
 0x352   : > { %1098 = vmatpush.msrb.mxu2 %v950_v60  ;;  %v3881_v48 = vld [vmem:[%s5930_s4] ss:$0 sm:$0xff] }
 0x353   : > { %1189 = vmatpush.msra.mxu1 %v3419_v57  ;;  %1023 = vmatpush.msrb.mxu0 %v3392_v45 }
 0x354   : > { %1099 = vmatpush.msrb.mxu2 %v949_v62 }
 0x355   : > { %1170 = vrot.lane.b32.xlu2 %v1163_v55, %s3915_s11  ;;  %1003 = vrot.lane.b32.xlu1 %v996_v12, %s3915_s11  ;;  %v945_v55 = vld [vmem:[%s5929_s3 + $0x8] sm:$0xff] }
 0x356   : > { %3812 = vrot.lane.b32.xlu0 %v3811_v63, %s3915_s11  ;;  %1190 = vmatpush.msra.mxu1 %v3418_v1  ;;  %v3414_v12 = vld [vmem:[%s5929_s3 + $0x148] sm:$0xff]  ;;  %v3425_v63 = vld [vmem:[%s5929_s3 + $0x1a0] sm:$0xff] }
 0x357   : > { %1024 = vmatpush.msrb.mxu0 %v3391_v3  ;;  %1100 = vmatpush.msrb.mxu2 %v948_v4 }
 0x358   : > { %1191 = vmatpush.msra.mxu1 %v3417_v5  ;;  %1222 = vmatpush.msra.mxu3 %v3425_v63 }
 0x359   : > { %1025 = vmatpush.msrb.mxu0 %v3390_v7  ;;  %1101 = vmatpush.msrb.mxu2 %v947_v8 }
 0x35a   : > { %1192 = vmatpush.msra.mxu1 %v3416_v10 }
 0x35b   : > { %1026 = vmatpush.msrb.mxu0 %v3389_v11  ;;  %1102 = vmatpush.msrb.mxu2 %v946_v18 }
 0x35c   : > { %1193 = vmatpush.msra.mxu1 %v3415_v0  ;;  %v3462_v0 = vld [vmem:[%s5929_s3 + $0x2b8] sm:$0xff] }
 0x35d   : > { %1001 = vrot.lane.b32.xlu2 %v994_v21, %s3915_s11  ;;  %1174 = vrot.lane.b32.xlu1 %v1167_v16, %s3915_s11 }
 0x35e   : > { %3817 = vrot.lane.b32.xlu0 %v3816_v30, %s3915_s11  ;;  %1027 = vmatpush.msrb.mxu0 %v3388_v9  ;;  %v3444_v9 = vld [vmem:[%s5929_s3 + $0x228] sm:$0xff] }
 0x35f   : > { %1103 = vmatpush.msrb.mxu2 %v945_v55  ;;  %1194 = vmatpush.msra.mxu1 %v3414_v12  ;;  %v3461_v55 = vld [vmem:[%s5929_s3 + $0x2b0] sm:$0xff]  ;;  %v3443_v12 = vld [vmem:[%s5929_s3 + $0x220] sm:$0xff] }
 0x360   : > { %1028 = vmatpush.msrb.mxu0 %v3387_v19 }
 0x361   : > { %1104 = vmatpush.msrb.mxu2 %v944_v13  ;;  %1195 = vmatpush.msra.mxu1 %v3413_v14  ;;  %v3460_v14 = vld [vmem:[%s5929_s3 + $0x2a8] sm:$0xff] }
 0x362   : > { %1342 = vmatpush.msra.mxu0 %v3462_v0  ;;  %v3463_v0 = vld [vmem:[%s5929_s3 + $0x2c0] sm:$0xff] }
 0x363   : > { %1196 = vmatpush.msra.mxu1 %v3412_v15  ;;  %v3442_v15 = vld [vmem:[%s5929_s3 + $0x218] sm:$0xff] }
 0x364   : > { %1343 = vmatpush.msra.mxu0 %v3461_v55  ;;  %v3436_v55 = vld [vmem:[%s5929_s3 + $0x1e8] sm:$0xff] }
 0x365   : > { %1197 = vmatpush.msra.mxu1 %v3411_v47 }
 0x366   : > { %1172 = vrot.lane.b32.xlu0 %v1165_v22, %s3915_s11  ;;  %1344 = vmatpush.msra.mxu0 %v3460_v14  ;;  %v3522_v14 = vld [vmem:[%s5929_s3 + $0x460] sm:$0xff] }
 0x367   : > { %1198 = vmatpush.msra.mxu1 %v3410_v49 }
 0x369   : > { %1199 = vmatpush.msra.mxu1 %v3409_v56 }
 0x3a7   : > { %v1080_v50 = vpop.permute.xlu2 %1079 }
 0x3af   : > { %v1171_v21 = vpop.permute.xlu2 %1170 }
 0x3b7   : > { %v1002_v25 = vpop.permute.xlu2 %1001 }
 0x3bf   : > { %v1000_v61 = vpop.permute.xlu1 %999 }
 0x3c0   : > { %v1076_v58 = vpop.permute.xlu0 %1075  ;;  %3405 = vmatmul.msk.f32.vlgmr.msrb.gmra.mxu1 %vm467_vm8, %v1000_v61 }
 0x3c1   : > { %3407 = vmatmul.msk.f32.vlgmr.msrb.gmra.mxu3 %vm467_vm8, %v1076_v58 }
 0x3c2   : > { %1418 = vmatpush.msrb.mxu3 %v3444_v9  ;;  %v3454_v9 = vld [vmem:[%s5929_s3 + $0x278] sm:$0xff] }
 0x3c4   : > { %1419 = vmatpush.msrb.mxu3 %v3443_v12  ;;  %v3523_v12 = vld [vmem:[%s5929_s3 + $0x468] sm:$0xff] }
 0x3c6   : > { %1420 = vmatpush.msrb.mxu3 %v3442_v15  ;;  %v3452_v15 = vld [vmem:[%s5929_s3 + $0x268] sm:$0xff] }
 0x3c7   : > { %v1004_v6 = vpop.permute.xlu1 %1003 }
 0x3c8   : > { %v3813_v16 = vpop.permute.xlu0 %3812  ;;  %3406 = vmatmul.msk.f32.gmra.mxu1 %vm467_vm8, %v1004_v6  ;;  %v1006_v44 = vsel %vm567_vm13, %v1002_v25, %v1004_v6 }
 0x3c9   : > { %v3815_v30 = vunpack.i.h.bf16 %v3813_v16  ;;  %v3814_v17 = vunpack.i.l.bf16 %v3813_v16  ;;  %3408 = vmatmul.msk.f32.gmra.mxu3 %vm467_vm8, %v1080_v50 }
 0x3cb   : > { %v1005_v20 = vsel %vm567_vm13, %v3815_v30, %v1000_v61  ;;  %v1081_v22 = vsel %vm567_vm13, %v3814_v17, %v1076_v58  ;;  %v3459_v61 = vld [vmem:[%s5929_s3 + $0x2a0] sm:$0xff] }
 0x3cc   : > { %1029 = vmatmul.f32.vlgmr.msrb.gmra.mxu0 %v1005_v20  ;;  %1105 = vmatmul.f32.vlgmr.msrb.gmra.mxu2 %v1081_v22  ;;  %v3441_v20 = vld [vmem:[%s5929_s3 + $0x210] sm:$0xff]  ;;  %v3458_v22 = vld [vmem:[%s5929_s3 + $0x298] sm:$0xff] }
 0x3cd   : > { %1345 = vmatpush.msra.mxu0 %v3459_v61  ;;  %1421 = vmatpush.msrb.mxu3 %v3441_v20  ;;  %v3433_v61 = vld [vmem:[%s5929_s3 + $0x1d0] sm:$0xff] }
 0x3ce   : > { %v3449_v20 = vld [vmem:[%s5929_s3 + $0x250] sm:$0xff] }
 0x3cf   : > { %v1175_v27 = vpop.permute.xlu1 %1174  ;;  %1346 = vmatpush.msra.mxu0 %v3458_v22  ;;  %v3431_v22 = vld [vmem:[%s5929_s3 + $0x1c0] sm:$0xff] }
 0x3d0   : > { %v3818_v43 = vpop.permute.xlu0 %3817 }
 0x3d1   : > { %v3820_v23 = vunpack.i.h.bf16 %v3818_v43  ;;  %v3819_v24 = vunpack.i.l.bf16 %v3818_v43  ;;  %3427 = vmatmul.msk.f32.vlgmr.msra.gmra.mxu3 %vm467_vm8, %v1171_v21 }
 0x3d3   : > { %v1082_v52 = vsel %vm567_vm13, %v3819_v24, %v1080_v50  ;;  %v1176_v26 = vsel %vm567_vm13, %v3820_v23, %v1171_v21 }
 0x3d4   : > { %1032 = vmatmul.f32.gmra.mxu0 %v1006_v44  ;;  %1108 = vmatmul.f32.gmra.mxu2 %v1082_v52  ;;  %v3440_v52 = vld [vmem:[%s5929_s3 + $0x208] sm:$0xff] }
 0x3d5   : > { %1200 = vmatmul.f32.vlgmr.msra.gmra.mxu1 %v1176_v26  ;;  %1422 = vmatpush.msrb.mxu3 %v3440_v52  ;;  %v3517_v52 = vld [vmem:[%s5929_s3 + $0x438] sm:$0xff] }
 0x3d8   : > { %v1173_v28 = vpop.permute.xlu0 %1172 }
 0x3d9   : > { %3428 = vmatmul.msk.f32.gmra.mxu3 %vm467_vm8, %v1175_v27  ;;  %v1177_v29 = vsel %vm567_vm13, %v1173_v28, %v1175_v27 }
 0x3dd   : > { %1203 = vmatmul.f32.gmra.mxu1 %v1177_v29 }
 0x43d   : > { %v1053_v31 = vpop.f32.mrf.mxu1 }
 0x444   : > { %v1129_v32 = vpop.f32.mrf.mxu3 }
 0x445   : > { %v1056_v33 = vpop.f32.mrf.mxu1 }
 0x449   : > { %v1030_v34 = vpop.f32.mrf.mxu0 }
 0x44a   : > { %v1054_v36 = vadd.f32 %v1053_v31, %v1030_v34 }
 0x44c   : > { %v1132_v35 = vpop.f32.mrf.mxu3 }
 0x44f   : > { %v1106_v37 = vpop.f32.mrf.mxu2 }
 0x450   : > { %v1107_v38 = vadd.f32 %v1106_v37, %v1054_v36 }
 0x451   : > { %v1033_v40 = vpop.f32.mrf.mxu0 }
 0x452   : > { %v1201_v39 = vpop.f32.mrf.mxu1  ;;  %v1130_v42 = vadd.f32 %v1129_v32, %v1107_v38  ;;  %v1057_v51 = vadd.f32 %v1056_v33, %v1033_v40 }
 0x454   : > { %v1224_v41 = vpop.f32.mrf.mxu3 }
 0x455   : > { %v1225_v46 = vadd.f32 %v1224_v41, %v1201_v39 }
 0x457   : > { %v1230_v53 = vadd.f32 %v1225_v46, %v1130_v42  ;;  %v1109_v54 = vpop.f32.mrf.mxu2 }
 0x458   : > { %v1110_v59 = vadd.f32 %v1109_v54, %v1057_v51 }
 0x459   : > { %v1236_v60 = vadd.f32 %v3881_v48, %v1230_v53 }
 0x45a   : > { %v1204_v45 = vpop.f32.mrf.mxu1  ;;  %v1133_v1 = vadd.f32 %v1132_v35, %v1110_v59 }
 0x45b   : > { %v1240_v57 = vrot.slane %v1236_v60, 6 }
 0x45c   : > { %v1227_v62 = vpop.f32.mrf.mxu3 }
 0x45d   : > { %v1228_v2 = vadd.f32 %v1227_v62, %v1204_v45  ;;  %1243 = vrot.lane.b32.xlu1 %v1240_v57, %s3913_s29 }
 0x45f   : > { %v1231_v3 = vadd.f32 %v1228_v2, %v1133_v1  ;;  %v3457_v2 = vld [vmem:[%s5929_s3 + $0x290] sm:$0xff] }
 0x460   : > { %1347 = vmatpush.msra.mxu0 %v3457_v2 }
 0x461   : > { %v1237_v4 = vadd.f32 %v3881_v48, %v1231_v3  ;;  %v3439_v3 = vld [vmem:[%s5929_s3 + $0x200] sm:$0xff] }
 0x462   : > { %1423 = vmatpush.msrb.mxu3 %v3439_v3 }
 0x463   : > { %v1241_v5 = vrot.slane %v1237_v4, 6  ;;  %v3456_v4 = vld [vmem:[%s5929_s3 + $0x288] sm:$0xff] }
 0x464   : > { %1348 = vmatpush.msra.mxu0 %v3456_v4 }
 0x465   : > { %1247 = vrot.lane.b32.xlu0 %v1241_v5, %s3913_s29  ;;  %v1242_v7 = vsel %vm448_vm1, %v1240_v57, %v1241_v5  ;;  %v3438_v5 = vld [vmem:[%s5929_s3 + $0x1f8] sm:$0xff] }
 0x466   : > { %1245 = vrot.lane.b32.xlu2 %v1242_v7, %s3913_s29  ;;  %v3455_v7 = vld [vmem:[%s5929_s3 + $0x280] sm:$0xff]  ;;  %1424 = vmatpush.msrb.mxu3 %v3438_v5  ;;  %v3505_v5 = vld [vmem:[%s5929_s3 + $0x3d8] sm:$0xff] }
 0x467   : > { %1349 = vmatpush.msra.mxu0 %v3455_v7  ;;  %v3545_v7 = vld [vmem:[%s5929_s3 + $0x4f8] sm:$0xff] }
 0x469   : > { %1350 = vmatpush.msra.mxu0 %v3454_v9  ;;  %v3544_v9 = vld [vmem:[%s5929_s3 + $0x4f0] sm:$0xff] }
 0x4c0   : > { %v1246_v8 = vpop.permute.xlu2 %1245 }
 0x4c1   : > { %1254 = vst.msk [vmem:[#allocation2 + $0x10] sm:$0xff] %vm465_vm7, %v1246_v8 }
 0x4c2   : > { %1255 = vst.msk [vmem:[#allocation2 + $0x18] sm:$0xff] %vm467_vm8, %v1246_v8  ;;  %v3437_v8 = vld [vmem:[%s5929_s3 + $0x1f0] sm:$0xff] }
 0x4c3   : > { %1425 = vmatpush.msrb.mxu3 %v3437_v8 }
 0x4c5   : > { %1426 = vmatpush.msrb.mxu3 %v3436_v55  ;;  %v3506_v55 = vld [vmem:[%s5929_s3 + $0x3e0] sm:$0xff] }
 0x4c8   : > { %v4594_v18 = vld [vmem:[#allocation2 + $0x10] sm:$0xff] }
 0x4c9   : > { %v4592_v11 = vld [vmem:[#allocation2 + $0x18] sm:$0xff]  ;;  %v1317_v19 = vrot.slane %v4594_v18, 2  ;;  %v1393_v13 = vrot.slane %v4594_v18, 1  ;;  %v1488_v51 = vrot.slane %v4594_v18, 3  ;;  %v3445_v18 = vld [vmem:[%s5929_s3 + $0x230] sm:$0xff] }
 0x4ca   : > { %v1396_v63 = vrot.slane %v4592_v11, 1  ;;  %v1320_v49 = vrot.slane %v4592_v11, 2  ;;  %v1491_v60 = vrot.slane %v4592_v11, 3  ;;  %v3464_v11 = vld [vmem:[%s5929_s3 + $0x2c8] sm:$0xff] }
 0x4cb   : > { %1379 = vmatpush.msra.mxu2 %v3464_v11  ;;  %v3507_v11 = vld [vmem:[%s5929_s3 + $0x3e8] sm:$0xff] }
 0x4cd   : > { %1380 = vmatpush.msra.mxu2 %v3463_v0  ;;  %v3504_v0 = vld [vmem:[%s5929_s3 + $0x3d0] sm:$0xff] }
 0x4cf   : > { %v1244_v10 = vpop.permute.xlu1 %1243 }
 0x4d0   : > { %1252 = vst.msk [vmem:[#allocation2] sm:$0xfc] %vm461_vm3, %v1244_v10 }
 0x4d1   : > { %1253 = vst.msk [vmem:[#allocation2 + $0x8] sm:$0xfc] %vm463_vm4, %v1244_v10  ;;  %v3446_v10 = vld [vmem:[%s5929_s3 + $0x238] sm:$0xff] }
 0x4d2   : > { %1455 = vmatpush.msrb.mxu1 %v3446_v10 }
 0x4d4   : > { %1456 = vmatpush.msrb.mxu1 %v3445_v18  ;;  %v3547_v18 = vld [vmem:[%s5929_s3 + $0x508] sm:$0xff] }
 0x4d6   : > { %1606 = vmatpush.msra.mxu1 %v3523_v12  ;;  %v3546_v12 = vld [vmem:[%s5929_s3 + $0x500] sm:$0xff] }
 0x4d7   : > { %v1248_v47 = vpop.permute.xlu0 %1247  ;;  %v1258_v56 = vld [vmem:[#allocation2] sm:$0xfe] }
 0x4d8   : > { %v1264_v50 = vld [vmem:[#allocation2] sm:$0xfc]  ;;  %1256 = vst.msk [vmem:[#allocation2 + $0x20] sm:$0x3] %vm469_vm5, %v1248_v47  ;;  %v1259_v58 = vld [vmem:[#allocation2 + $0x8] sm:$0xfe]  ;;  %1607 = vmatpush.msra.mxu1 %v3522_v14 }
 0x4d9   : > { %v1265_v6 = vld [vmem:[#allocation2 + $0x8] sm:$0xfc]  ;;  %1257 = vst.msk [vmem:[#allocation2 + $0x28] sm:$0x3] %vm471_vm6, %v1248_v47  ;;  %v1395_v21 = vrot.slane %v1259_v58, 1  ;;  %v1316_v30 = vrot.slane %v1264_v50, 2 }
 0x4da   : > { %v1319_v16 = vrot.slane %v1265_v6, 2  ;;  %v1392_v17 = vrot.slane %v1258_v56, 1  ;;  %v1268_v41 = vld [vmem:[#allocation2] sm:$0xf8]  ;;  %v1269_v42 = vld [vmem:[#allocation2 + $0x8] sm:$0xf8] }
 0x4db   : > { %v1397_v43 = vsel %vm499_vm9, %v1395_v21, %v1396_v63  ;;  %v1318_v24 = vsel %vm526_vm10, %v1316_v30, %v1317_v19  ;;  %v1487_v48 = vrot.slane %v1268_v41, 3  ;;  %v1490_v53 = vrot.slane %v1269_v42, 3  ;;  %v3434_v47 = vld [vmem:[%s5929_s3 + $0x1d8] sm:$0xff]  ;;  %v3451_v50 = vld [vmem:[%s5929_s3 + $0x260] sm:$0xff]  ;;  %v3520_v6 = vld [vmem:[%s5929_s3 + $0x450] sm:$0xff] }
 0x4dc   : > { %v1321_v23 = vsel %vm526_vm10, %v1319_v16, %v1320_v49  ;;  %v1394_v25 = vsel %vm499_vm9, %v1392_v17, %v1393_v13  ;;  %1404 = vrot.lane.b32.xlu0 %v1397_v43, %s3915_s11  ;;  %v3521_v56 = vld [vmem:[%s5929_s3 + $0x458] sm:$0xff]  ;;  %v3432_v16 = vld [vmem:[%s5929_s3 + $0x1c8] sm:$0xff]  ;;  %v3481_v30 = vld [vmem:[%s5929_s3 + $0x330] sm:$0xff] }
 0x4dd   : > { %1328 = vrot.lane.b32.xlu1 %v1321_v23, %s3915_s11  ;;  %v3821_v44 = vpack.i.bf16 %v1318_v24, %v1394_v25  ;;  %v1489_v59 = vsel %vm653_vm11, %v1487_v48, %v1488_v51  ;;  %v1492_v45 = vsel %vm653_vm11, %v1490_v53, %v1491_v60  ;;  %v3482_v58 = vld [vmem:[%s5929_s3 + $0x338] sm:$0xff]  ;;  %1608 = vmatpush.msra.mxu1 %v3521_v56  ;;  %v3519_v17 = vld [vmem:[%s5929_s3 + $0x448] sm:$0xff]  ;;  %v3518_v23 = vld [vmem:[%s5929_s3 + $0x440] sm:$0xff] }
 0x4de   : > { %v3450_v21 = vld [vmem:[%s5929_s3 + $0x258] sm:$0xff]  ;;  %v3480_v43 = vld [vmem:[%s5929_s3 + $0x328] sm:$0xff]  ;;  %v3512_v42 = vld [vmem:[%s5929_s3 + $0x410] sm:$0xff] }
 0x4df   : > { %3822 = vrot.lane.b32.xlu2 %v3821_v44, %s3915_s11  ;;  %v1262_v26 = vld [vmem:[#allocation2 + $0x20] sm:$0x1]  ;;  %1609 = vmatpush.msra.mxu1 %v3520_v6  ;;  %v3448_v24 = vld [vmem:[%s5929_s3 + $0x248] sm:$0xff]  ;;  %v3430_v25 = vld [vmem:[%s5929_s3 + $0x1b8] sm:$0xff] }
 0x4e0   : > { %v1266_v27 = vld [vmem:[#allocation2 + $0x20] sm:$0x3]  ;;  %v1263_v28 = vld [vmem:[#allocation2 + $0x28] sm:$0x1]  ;;  %v1398_v32 = vrot.slane %v1262_v26, 1  ;;  %v3474_v41 = vld [vmem:[%s5929_s3 + $0x2f8] sm:$0xff] }
 0x4e1   : > { %v1267_v29 = vld [vmem:[#allocation2 + $0x28] sm:$0x3]  ;;  %v1322_v31 = vrot.slane %v1266_v27, 2  ;;  %v1400_v33 = vrot.slane %v1263_v28, 1  ;;  %v1270_v40 = vld [vmem:[#allocation2 + $0x20] sm:$0x7]  ;;  %1610 = vmatpush.msra.mxu1 %v3519_v17 }
 0x4e2   : > { %v1324_v34 = vrot.slane %v1267_v29, 2  ;;  %v1399_v36 = vsel %vm499_vm9, %v1393_v13, %v1398_v32  ;;  %v1493_v46 = vrot.slane %v1270_v40, 3  ;;  %v1271_v57 = vld [vmem:[#allocation2 + $0x28] sm:$0x7]  ;;  %v3479_v44 = vld [vmem:[%s5929_s3 + $0x320] sm:$0xff]  ;;  %v3429_v27 = vld [vmem:[%s5929_s3 + $0x1b0] sm:$0xff] }
 0x4e3   : > { %v1323_v35 = vsel %vm526_vm10, %v1317_v19, %v1322_v31  ;;  %v1401_v37 = vsel %vm499_vm9, %v1396_v63, %v1400_v33  ;;  %v1495_v62 = vrot.slane %v1271_v57, 3  ;;  %v3453_v63 = vld [vmem:[%s5929_s3 + $0x270] sm:$0xff]  ;;  %v3435_v19 = vld [vmem:[%s5929_s3 + $0x1e0] sm:$0xff]  ;;  %v3484_v13 = vld [vmem:[%s5929_s3 + $0x348] sm:$0xff]  ;;  %1611 = vmatpush.msra.mxu1 %v3518_v23 }
 0x4e4   : > { %v1325_v38 = vsel %vm526_vm10, %v1320_v49, %v1324_v34  ;;  %v3826_v39 = vpack.i.bf16 %v1323_v35, %v1399_v36  ;;  %1408 = vrot.lane.b32.xlu0 %v1401_v37, %s3915_s11  ;;  %v1494_v54 = vsel %vm653_vm11, %v1488_v51, %v1493_v46  ;;  %1351 = vmatpush.msra.mxu0 %v3453_v63  ;;  %v3483_v49 = vld [vmem:[%s5929_s3 + $0x340] sm:$0xff]  ;;  %v3478_v28 = vld [vmem:[%s5929_s3 + $0x318] sm:$0xff]  ;;  %v3516_v31 = vld [vmem:[%s5929_s3 + $0x430] sm:$0xff] }
 0x4e5   : > { %1332 = vrot.lane.b32.xlu1 %v1325_v38, %s3915_s11  ;;  %v1496_v1 = vsel %vm653_vm11, %v1491_v60, %v1495_v62  ;;  %1427 = vmatpush.msrb.mxu3 %v3435_v19  ;;  %v3447_v26 = vld [vmem:[%s5929_s3 + $0x240] sm:$0xff]  ;;  %v3486_v29 = vld [vmem:[%s5929_s3 + $0x358] sm:$0xff]  ;;  %v3477_v33 = vld [vmem:[%s5929_s3 + $0x310] sm:$0xff] }
 0x4e6   : > { %1513 = vmatpush.msrb.mxu2 %v3484_v13  ;;  %1352 = vmatpush.msra.mxu0 %v3452_v15  ;;  %v3525_v32 = vld [vmem:[%s5929_s3 + $0x478] sm:$0xff]  ;;  %v3485_v34 = vld [vmem:[%s5929_s3 + $0x350] sm:$0xff]  ;;  %v3515_v35 = vld [vmem:[%s5929_s3 + $0x428] sm:$0xff] }
 0x4e7   : > { %3827 = vrot.lane.b32.xlu2 %v3826_v39, %s3915_s11  ;;  %1428 = vmatpush.msrb.mxu3 %v3434_v47  ;;  %v3524_v36 = vld [vmem:[%s5929_s3 + $0x470] sm:$0xff]  ;;  %v3476_v37 = vld [vmem:[%s5929_s3 + $0x308] sm:$0xff]  ;;  %v3514_v38 = vld [vmem:[%s5929_s3 + $0x420] sm:$0xff] }
 0x4e8   : > { %1514 = vmatpush.msrb.mxu2 %v3483_v49  ;;  %1353 = vmatpush.msra.mxu0 %v3451_v50  ;;  %v3475_v39 = vld [vmem:[%s5929_s3 + $0x300] sm:$0xff]  ;;  %v3513_v40 = vld [vmem:[%s5929_s3 + $0x418] sm:$0xff]  ;;  %v3473_v46 = vld [vmem:[%s5929_s3 + $0x2f0] sm:$0xff] }
 0x4e9   : > { %1429 = vmatpush.msrb.mxu3 %v3433_v61  ;;  %1612 = vmatpush.msra.mxu1 %v3517_v52  ;;  %v3511_v48 = vld [vmem:[%s5929_s3 + $0x408] sm:$0xff]  ;;  %v3510_v53 = vld [vmem:[%s5929_s3 + $0x400] sm:$0xff]  ;;  %v3470_v60 = vld [vmem:[%s5929_s3 + $0x2d8] sm:$0xff] }
 0x4ea   : > { %1515 = vmatpush.msrb.mxu2 %v3482_v58  ;;  %1354 = vmatpush.msra.mxu0 %v3450_v21  ;;  %v3472_v51 = vld [vmem:[%s5929_s3 + $0x2e8] sm:$0xff]  ;;  %v3508_v57 = vld [vmem:[%s5929_s3 + $0x3f0] sm:$0xff]  ;;  %v3502_v47 = vld [vmem:[%s5929_s3 + $0x3c0] sm:$0xff] }
 0x4eb   : > { %1430 = vmatpush.msrb.mxu3 %v3432_v16  ;;  %1613 = vmatpush.msra.mxu1 %v3516_v31  ;;  %v3503_v19 = vld [vmem:[%s5929_s3 + $0x3c8] sm:$0xff]  ;;  %v3542_v49 = vld [vmem:[%s5929_s3 + $0x4e0] sm:$0xff]  ;;  %v3501_v6 = vld [vmem:[%s5929_s3 + $0x3b8] sm:$0xff] }
 0x4ec   : > { %1501 = vrot.lane.b32.xlu0 %v1494_v54, %s3915_s11  ;;  %1516 = vmatpush.msrb.mxu2 %v3481_v30  ;;  %v3471_v54 = vld [vmem:[%s5929_s3 + $0x2e0] sm:$0xff]  ;;  %v3543_v13 = vld [vmem:[%s5929_s3 + $0x4e8] sm:$0xff]  ;;  %v3541_v21 = vld [vmem:[%s5929_s3 + $0x4d8] sm:$0xff] }
 0x4ed   : > { %1497 = vrot.lane.b32.xlu1 %v1489_v59, %s3915_s11  ;;  %1355 = vmatpush.msra.mxu0 %v3449_v20  ;;  %v3509_v59 = vld [vmem:[%s5929_s3 + $0x3f8] sm:$0xff]  ;;  %v3500_v16 = vld [vmem:[%s5929_s3 + $0x3b0] sm:$0xff]  ;;  %v3499_v17 = vld [vmem:[%s5929_s3 + $0x3a8] sm:$0xff] }
 0x4ee   : > { %1431 = vmatpush.msrb.mxu3 %v3431_v22  ;;  %1517 = vmatpush.msrb.mxu2 %v3480_v43  ;;  %v3540_v30 = vld [vmem:[%s5929_s3 + $0x4d0] sm:$0xff]  ;;  %v3539_v20 = vld [vmem:[%s5929_s3 + $0x4c8] sm:$0xff]  ;;  %v3498_v22 = vld [vmem:[%s5929_s3 + $0x3a0] sm:$0xff] }
 0x4ef   : > { %1499 = vrot.lane.b32.xlu2 %v1492_v45, %s3915_s11  ;;  %1356 = vmatpush.msra.mxu0 %v3448_v24  ;;  %v3469_v45 = vld [vmem:[%s5929_s3 + $0x2d0] sm:$0xff]  ;;  %v3538_v43 = vld [vmem:[%s5929_s3 + $0x4c0] sm:$0xff]  ;;  %v3537_v52 = vld [vmem:[%s5929_s3 + $0x4b8] sm:$0xff] }
 0x4f0   : > { %1432 = vmatpush.msrb.mxu3 %v3430_v25  ;;  %1518 = vmatpush.msrb.mxu2 %v3479_v44  ;;  %v3497_v44 = vld [vmem:[%s5929_s3 + $0x398] sm:$0xff]  ;;  %v3494_v31 = vld [vmem:[%s5929_s3 + $0x380] sm:$0xff] }
 0x4f1   : > { %1357 = vmatpush.msra.mxu0 %v3447_v26  ;;  %1614 = vmatpush.msra.mxu1 %v3515_v35  ;;  %v3496_v26 = vld [vmem:[%s5929_s3 + $0x390] sm:$0xff] }
 0x4f2   : > { %1433 = vmatpush.msrb.mxu3 %v3429_v27  ;;  %1519 = vmatpush.msrb.mxu2 %v3478_v28  ;;  %v3536_v27 = vld [vmem:[%s5929_s3 + $0x4b0] sm:$0xff]  ;;  %v3495_v28 = vld [vmem:[%s5929_s3 + $0x388] sm:$0xff] }
 0x4f3   : > { %1550 = vmatpush.msrb.mxu0 %v3486_v29  ;;  %1615 = vmatpush.msra.mxu1 %v3514_v38  ;;  %v3535_v29 = vld [vmem:[%s5929_s3 + $0x4a8] sm:$0xff]  ;;  %v3492_v38 = vld [vmem:[%s5929_s3 + $0x370] sm:$0xff] }
 0x4f4   : > { %1643 = vmatpush.msra.mxu3 %v3525_v32  ;;  %1520 = vmatpush.msrb.mxu2 %v3477_v33 }
 0x4f5   : > { %1503 = vrot.lane.b32.xlu1 %v1496_v1, %s3915_s11  ;;  %1551 = vmatpush.msrb.mxu0 %v3485_v34  ;;  %v3534_v34 = vld [vmem:[%s5929_s3 + $0x4a0] sm:$0xff] }
 0x4f6   : > { %1644 = vmatpush.msra.mxu3 %v3524_v36  ;;  %1521 = vmatpush.msrb.mxu2 %v3476_v37  ;;  %v3493_v36 = vld [vmem:[%s5929_s3 + $0x378] sm:$0xff] }
 0x4f7   : > { %1616 = vmatpush.msra.mxu1 %v3513_v40  ;;  %v3533_v37 = vld [vmem:[%s5929_s3 + $0x498] sm:$0xff]  ;;  %v3491_v40 = vld [vmem:[%s5929_s3 + $0x368] sm:$0xff] }
 0x4f8   : > { %1522 = vmatpush.msrb.mxu2 %v3475_v39  ;;  %v3532_v39 = vld [vmem:[%s5929_s3 + $0x490] sm:$0xff] }
 0x4f9   : > { %1617 = vmatpush.msra.mxu1 %v3512_v42  ;;  %v3490_v42 = vld [vmem:[%s5929_s3 + $0x360] sm:$0xff] }
 0x4fa   : > { %1523 = vmatpush.msrb.mxu2 %v3474_v41  ;;  %v3531_v41 = vld [vmem:[%s5929_s3 + $0x488] sm:$0xff] }
 0x4fb   : > { %1618 = vmatpush.msra.mxu1 %v3511_v48 }
 0x4fc   : > { %1524 = vmatpush.msrb.mxu2 %v3473_v46  ;;  %v3530_v46 = vld [vmem:[%s5929_s3 + $0x480] sm:$0xff] }
 0x4fd   : > { %1619 = vmatpush.msra.mxu1 %v3510_v53 }
 0x4fe   : > { %1525 = vmatpush.msrb.mxu2 %v3472_v51 }
 0x4ff   : > { %1620 = vmatpush.msra.mxu1 %v3509_v59 }
 0x500   : > { %1526 = vmatpush.msrb.mxu2 %v3471_v54 }
 0x501   : > { %1621 = vmatpush.msra.mxu1 %v3508_v57 }
 0x502   : > { %1527 = vmatpush.msrb.mxu2 %v3470_v60 }
 0x504   : > { %1528 = vmatpush.msrb.mxu2 %v3469_v45 }
 0x539   : > { %v3823_v62 = vpop.permute.xlu2 %3822 }
 0x53a   : > { %v3825_v1 = vunpack.i.h.bf16 %v3823_v62  ;;  %v3824_v2 = vunpack.i.l.bf16 %v3823_v62 }
 0x541   : > { %v3828_v63 = vpop.permute.xlu2 %3827 }
 0x542   : > { %v3830_v14 = vunpack.i.h.bf16 %v3828_v63  ;;  %v3829_v15 = vunpack.i.l.bf16 %v3828_v63 }
 0x549   : > { %v1500_v23 = vpop.permute.xlu2 %1499 }
 0x54e   : > { %v4842_v3 = vpop.permute.xlu0 %1404 }
 0x54f   : > { %v4844_v4 = vpop.permute.xlu1 %1328  ;;  %3467 = vmatmul.msk.f32.vlgmr.msrb.gmra.mxu1 %vm467_vm8, %v4842_v3  ;;  %v4860_v10 = vsel %vm567_vm13, %v3824_v2, %v4842_v3 }
 0x550   : > { %3465 = vmatmul.msk.f32.vlgmr.msra.gmra.mxu2 %vm467_vm8, %v4844_v4  ;;  %v1334_v8 = vsel %vm567_vm13, %v3825_v1, %v4844_v4  ;;  %1434 = vmatmul.f32.vlgmr.msrb.gmra.mxu3 %v4860_v10 }
 0x551   : > { %1358 = vmatmul.f32.vlgmr.msra.gmra.mxu0 %v1334_v8  ;;  %1717 = vmatpush.msrb.mxu3 %v3545_v7 }
 0x552   : > { %1652 = vmatpush.msra.mxu0 %v3505_v5  ;;  %1689 = vmatpush.msra.mxu2 %v3507_v11 }
 0x553   : > { %1754 = vmatpush.msrb.mxu1 %v3547_v18  ;;  %1718 = vmatpush.msrb.mxu3 %v3544_v9 }
 0x554   : > { %1653 = vmatpush.msra.mxu0 %v3504_v0  ;;  %1690 = vmatpush.msra.mxu2 %v3506_v55 }
 0x555   : > { %1755 = vmatpush.msrb.mxu1 %v3546_v12  ;;  %1719 = vmatpush.msrb.mxu3 %v3543_v13 }
 0x556   : > { %1654 = vmatpush.msra.mxu0 %v3503_v19  ;;  %v4893_v56 = vpop.permute.xlu0 %1408 }
 0x557   : > { %v1333_v50 = vpop.permute.xlu1 %1332  ;;  %3468 = vmatmul.msk.f32.gmra.mxu1 %vm467_vm8, %v4893_v56  ;;  %v4901_v58 = vsel %vm567_vm13, %v3829_v15, %v4893_v56  ;;  %1720 = vmatpush.msrb.mxu3 %v3542_v49 }
 0x558   : > { %3466 = vmatmul.msk.f32.gmra.mxu2 %vm467_vm8, %v1333_v50  ;;  %v1335_v61 = vsel %vm567_vm13, %v3830_v14, %v1333_v50  ;;  %1655 = vmatpush.msra.mxu0 %v3502_v47 }
 0x559   : > { %1361 = vmatmul.f32.gmra.mxu0 %v1335_v61  ;;  %1437 = vmatmul.f32.gmra.mxu3 %v4901_v58 }
 0x55a   : > { %1656 = vmatpush.msra.mxu0 %v3501_v6  ;;  %1721 = vmatpush.msrb.mxu3 %v3541_v21 }
 0x55c   : > { %1657 = vmatpush.msra.mxu0 %v3500_v16  ;;  %1722 = vmatpush.msrb.mxu3 %v3540_v30 }
 0x55e   : > { %1658 = vmatpush.msra.mxu0 %v3499_v17  ;;  %1723 = vmatpush.msrb.mxu3 %v3539_v20  ;;  %v1502_v32 = vpop.permute.xlu0 %1501 }
 0x55f   : > { %v1498_v24 = vpop.permute.xlu1 %1497  ;;  %1622 = vmatmul.f32.vlgmr.msra.gmra.mxu1 %v1334_v8 }
 0x560   : > { %v1505_v25 = vsel %vm567_vm13, %v1498_v24, %v1500_v23  ;;  %1659 = vmatpush.msra.mxu0 %v3498_v22  ;;  %1724 = vmatpush.msrb.mxu3 %v3538_v43  ;;  %v3883_v22 = vld [vmem:[%s5930_s4 + $0x2] ss:$0 sm:$0xff] }
 0x561   : > { %1529 = vmatmul.f32.vlgmr.msrb.gmra.mxu2 %v1505_v25  ;;  %3487 = vmatmul.msk.f32.vlgmr.msrb.gmra.mxu0 %vm467_vm8, %v1500_v23 }
 0x562   : > { %3526 = vmatmul.msk.f32.vlgmr.msra.gmra.mxu3 %vm467_vm8, %v4844_v4  ;;  %1660 = vmatpush.msra.mxu0 %v3497_v44 }
 0x563   : > { %1725 = vmatpush.msrb.mxu3 %v3537_v52 }
 0x564   : > { %1661 = vmatpush.msra.mxu0 %v3496_v26 }
 0x565   : > { %1726 = vmatpush.msrb.mxu3 %v3536_v27 }
 0x566   : > { %1662 = vmatpush.msra.mxu0 %v3495_v28 }
 0x567   : > { %v1504_v33 = vpop.permute.xlu1 %1503  ;;  %1727 = vmatpush.msrb.mxu3 %v3535_v29  ;;  %1625 = vmatmul.f32.gmra.mxu1 %v1335_v61 }
 0x568   : > { %v1506_v35 = vsel %vm567_vm13, %v1502_v32, %v1504_v33  ;;  %1663 = vmatpush.msra.mxu0 %v3494_v31 }
 0x569   : > { %1728 = vmatpush.msrb.mxu3 %v3534_v34  ;;  %1532 = vmatmul.f32.gmra.mxu2 %v1506_v35 }
 0x56a   : > { %3488 = vmatmul.msk.f32.gmra.mxu0 %vm467_vm8, %v1504_v33  ;;  %3527 = vmatmul.msk.f32.gmra.mxu3 %vm467_vm8, %v1333_v50 }
 0x56b   : > { %1664 = vmatpush.msra.mxu0 %v3493_v36  ;;  %1729 = vmatpush.msrb.mxu3 %v3533_v37 }
 0x56d   : > { %1665 = vmatpush.msra.mxu0 %v3492_v38  ;;  %1730 = vmatpush.msrb.mxu3 %v3532_v39 }
 0x56f   : > { %1666 = vmatpush.msra.mxu0 %v3491_v40  ;;  %1731 = vmatpush.msrb.mxu3 %v3531_v41 }
 0x570   : > { %3548 = vmatmul.msk.f32.vlgmr.msrb.gmra.mxu1 %vm467_vm8, %v1500_v23 }
 0x571   : > { %1667 = vmatpush.msra.mxu0 %v3490_v42  ;;  %1732 = vmatpush.msrb.mxu3 %v3530_v46 }
 0x572   : > { %1668 = vmatmul.f32.vlgmr.msra.gmra.mxu0 %v4860_v10  ;;  %3528 = vmatmul.msk.f32.vlgmr.msra.gmra.mxu2 %vm467_vm8, %v4842_v3  ;;  %v3882_v10 = vld [vmem:[%s5930_s4 + $0x1] ss:$0 sm:$0xff] }
 0x573   : > { %1733 = vmatmul.f32.vlgmr.msrb.gmra.mxu3 %v1505_v25 }
 0x578   : > { %3549 = vmatmul.msk.f32.gmra.mxu1 %vm467_vm8, %v1504_v33 }
 0x57a   : > { %1671 = vmatmul.f32.gmra.mxu0 %v4901_v58  ;;  %3529 = vmatmul.msk.f32.gmra.mxu2 %vm467_vm8, %v4893_v56 }
 0x57b   : > { %1736 = vmatmul.f32.gmra.mxu3 %v1506_v35 }
 0x5cc   : > { %v1458_v48 = vpop.f32.mrf.mxu1 }
 0x5ce   : > { %v1359_v51 = vpop.f32.mrf.mxu0 }
 0x5d3   : > { %v1382_v53 = vpop.f32.mrf.mxu2  ;;  %v1435_v54 = vpop.f32.mrf.mxu3 }
 0x5d4   : > { %v1461_v59 = vpop.f32.mrf.mxu1  ;;  %v1383_v62 = vadd.f32 %v1382_v53, %v1359_v51 }
 0x5d6   : > { %v1362_v60 = vpop.f32.mrf.mxu0  ;;  %v1436_v3 = vadd.f32 %v1435_v54, %v1383_v62 }
 0x5d8   : > { %v1459_v5 = vadd.f32 %v1458_v48, %v1436_v3 }
 0x5db   : > { %v1385_v57 = vpop.f32.mrf.mxu2 }
 0x5dc   : > { %v1438_v45 = vpop.f32.mrf.mxu3  ;;  %v1623_v2 = vpop.f32.mrf.mxu1  ;;  %v1386_v7 = vadd.f32 %v1385_v57, %v1362_v60 }
 0x5de   : > { %v1553_v1 = vpop.f32.mrf.mxu0  ;;  %v1439_v9 = vadd.f32 %v1438_v45, %v1386_v7 }
 0x5e0   : > { %v1462_v13 = vadd.f32 %v1461_v59, %v1439_v9 }
 0x5e4   : > { %v1530_v4 = vpop.f32.mrf.mxu2  ;;  %v1626_v12 = vpop.f32.mrf.mxu1 }
 0x5e5   : > { %v1554_v8 = vadd.f32 %v1553_v1, %v1530_v4  ;;  %v1646_v11 = vpop.f32.mrf.mxu3 }
 0x5e6   : > { %v1647_v50 = vadd.f32 %v1646_v11, %v1623_v2 }
 0x5e7   : > { %v1559_v18 = vadd.f32 %v1554_v8, %v1459_v5  ;;  %v1556_v0 = vpop.f32.mrf.mxu0 }
 0x5e9   : > { %v4994_v55 = vadd.f32 %v3882_v10, %v1559_v18 }
 0x5eb   : > { %v1774_v63 = vrot.slane %v4994_v55, 6 }
 0x5ec   : > { %v1533_v19 = vpop.f32.mrf.mxu2 }
 0x5ed   : > { %v1557_v14 = vadd.f32 %v1556_v0, %v1533_v19  ;;  %v1649_v15 = vpop.f32.mrf.mxu3  ;;  %1777 = vrot.lane.b32.xlu2 %v1774_v63, %s3913_s29  ;;  %v1757_v58 = vpop.f32.mrf.mxu1 }
 0x5ee   : > { %v1650_v24 = vadd.f32 %v1649_v15, %v1626_v12 }
 0x5ef   : > { %v1560_v47 = vadd.f32 %v1557_v14, %v1462_v13  ;;  %v1669_v49 = vpop.f32.mrf.mxu0 }
 0x5f0   : > { %v1670_v6 = vadd.f32 %v1669_v49, %v1647_v50 }
 0x5f1   : > { %v4998_v56 = vadd.f32 %v3882_v10, %v1560_v47 }
 0x5f3   : > { %v1775_v61 = vrot.slane %v4998_v56, 6 }
 0x5f5   : > { %v1692_v21 = vpop.f32.mrf.mxu2  ;;  %1781 = vrot.lane.b32.xlu1 %v1775_v61, %s3913_s29  ;;  %v1776_v16 = vsel %vm448_vm1, %v1774_v63, %v1775_v61  ;;  %v1760_v27 = vpop.f32.mrf.mxu1 }
 0x5f6   : > { %v1693_v30 = vadd.f32 %v1692_v21, %v1670_v6  ;;  %v1734_v17 = vpop.f32.mrf.mxu3  ;;  %1779 = vrot.lane.b32.xlu0 %v1776_v16, %s3913_s29 }
 0x5f7   : > { %v1758_v20 = vadd.f32 %v1757_v58, %v1734_v17  ;;  %v1672_v23 = vpop.f32.mrf.mxu0 }
 0x5f8   : > { %v1673_v44 = vadd.f32 %v1672_v23, %v1650_v24 }
 0x5f9   : > { %v1763_v43 = vadd.f32 %v1758_v20, %v1693_v30 }
 0x5fb   : > { %v5007_v25 = vadd.f32 %v3883_v22, %v1763_v43 }
 0x5fd   : > { %v1695_v52 = vpop.f32.mrf.mxu2  ;;  %v2104_v26 = vrot.slane %v5007_v25, 6 }
 0x5fe   : > { %v1696_v28 = vadd.f32 %v1695_v52, %v1673_v44  ;;  %v1737_v29 = vpop.f32.mrf.mxu3 }
 0x5ff   : > { %v1761_v31 = vadd.f32 %v1760_v27, %v1737_v29  ;;  %2107 = vrot.lane.b32.xlu2 %v2104_v26, %s3913_s29 }
 0x601   : > { %v1764_v32 = vadd.f32 %v1761_v31, %v1696_v28 }
 0x603   : > { %v5011_v33 = vadd.f32 %v3883_v22, %v1764_v32 }
 0x605   : > { %v2105_v34 = vrot.slane %v5011_v33, 6 }
 0x607   : > { %2111 = vrot.lane.b32.xlu1 %v2105_v34, %s3913_s29  ;;  %v2106_v35 = vsel %vm448_vm1, %v2104_v26, %v2105_v34 }
 0x608   : > { %2109 = vrot.lane.b32.xlu0 %v2106_v35, %s3913_s29 }
 0x647   : > { %v1778_v36 = vpop.permute.xlu2 %1777 }
 0x648   : > { %1786 = vst.msk [vmem:[#allocation2] sm:$0xfc] %vm461_vm3, %v1778_v36 }
 0x649   : > { %1787 = vst.msk [vmem:[#allocation2 + $0x8] sm:$0xfc] %vm463_vm4, %v1778_v36 }
 0x64f   : > { %v1798_v37 = vld [vmem:[#allocation2] sm:$0xfc] }
 0x650   : > { %v1793_v39 = vld [vmem:[#allocation2 + $0x8] sm:$0xfe]  ;;  %v1792_v42 = vld [vmem:[#allocation2] sm:$0xfe]  ;;  %v1850_v45 = vrot.slane %v1798_v37, 2 }
 0x651   : > { %v5019_v40 = vld [vmem:[#allocation2 + $0x8] sm:$0xf8]  ;;  %v5022_v46 = vld [vmem:[#allocation2] sm:$0xf8]  ;;  %v1929_v1 = vrot.slane %v1793_v39, 1  ;;  %v1926_v12 = vrot.slane %v1792_v42, 1 }
 0x652   : > { %v1799_v41 = vld [vmem:[#allocation2 + $0x8] sm:$0xfc]  ;;  %v2021_v23 = vrot.slane %v5022_v46, 3  ;;  %v2024_v27 = vrot.slane %v5019_v40, 3  ;;  %v3583_v39 = vld [vmem:[%s5929_s3 + $0x610] sm:$0xff] }
 0x653   : > { %v1853_v3 = vrot.slane %v1799_v41, 2  ;;  %v3582_v42 = vld [vmem:[%s5929_s3 + $0x608] sm:$0xff] }
 0x659   : > { %v2108_v38 = vpop.permute.xlu2 %2107 }
 0x65a   : > { %2117 = vst.msk [vmem:[#allocation2 + $0x8] sm:$0xfc] %vm463_vm4, %v2108_v38 }
 0x65b   : > { %2116 = vst.msk [vmem:[#allocation2] sm:$0xfc] %vm461_vm3, %v2108_v38  ;;  %v3584_v38 = vld [vmem:[%s5929_s3 + $0x618] sm:$0xff] }
 0x65c   : > { %1876 = vmatpush.msrb.mxu2 %v3584_v38  ;;  %v3645_v38 = vld [vmem:[%s5929_s3 + $0x7c8] sm:$0xff] }
 0x65e   : > { %1877 = vmatpush.msrb.mxu2 %v3583_v39  ;;  %v3605_v39 = vld [vmem:[%s5929_s3 + $0x6a0] sm:$0xff] }
 0x660   : > { %1878 = vmatpush.msrb.mxu2 %v3582_v42  ;;  %v3644_v42 = vld [vmem:[%s5929_s3 + $0x7c0] sm:$0xff] }
 0x661   : > { %v2129_v30 = vld [vmem:[#allocation2 + $0x8] sm:$0xfc] }
 0x662   : > { %v2128_v16 = vld [vmem:[#allocation2] sm:$0xfc]  ;;  %v2183_v52 = vrot.slane %v2129_v30, 2  ;;  %v3580_v30 = vld [vmem:[%s5929_s3 + $0x5f8] sm:$0xff] }
 0x663   : > { %v2180_v24 = vrot.slane %v2128_v16, 2 }
 0x667   : > { %v1782_v48 = vpop.permute.xlu1 %1781 }
 0x668   : > { %1790 = vst.msk [vmem:[#allocation2 + $0x20] sm:$0x3] %vm469_vm5, %v1782_v48  ;;  %v1780_v51 = vpop.permute.xlu0 %1779 }
 0x669   : > { %1791 = vst.msk [vmem:[#allocation2 + $0x28] sm:$0x3] %vm471_vm6, %v1782_v48 }
 0x66a   : > { %1788 = vst.msk [vmem:[#allocation2 + $0x10] sm:$0xff] %vm465_vm7, %v1780_v51 }
 0x66b   : > { %1789 = vst.msk [vmem:[#allocation2 + $0x18] sm:$0xff] %vm467_vm8, %v1780_v51 }
 0x66f   : > { %v1800_v53 = vld [vmem:[#allocation2 + $0x20] sm:$0x3] }
 0x670   : > { %v1856_v54 = vrot.slane %v1800_v53, 2  ;;  %v1796_v60 = vld [vmem:[#allocation2 + $0x20] sm:$0x1]  ;;  %v1797_v9 = vld [vmem:[#allocation2 + $0x28] sm:$0x1] }
 0x671   : > { %v5029_v59 = vld [vmem:[#allocation2 + $0x10] sm:$0xff]  ;;  %v1932_v8 = vrot.slane %v1796_v60, 1  ;;  %v1801_v63 = vld [vmem:[#allocation2 + $0x28] sm:$0x3]  ;;  %v1934_v14 = vrot.slane %v1797_v9, 1  ;;  %v3581_v53 = vld [vmem:[%s5929_s3 + $0x600] sm:$0xff] }
 0x672   : > { %v5031_v57 = vld [vmem:[#allocation2 + $0x18] sm:$0xff]  ;;  %v1851_v62 = vrot.slane %v5029_v59, 2  ;;  %v1927_v0 = vrot.slane %v5029_v59, 1  ;;  %v1805_v19 = vld [vmem:[#allocation2 + $0x28] sm:$0x7]  ;;  %v1858_v50 = vrot.slane %v1801_v63, 2  ;;  %1879 = vmatpush.msrb.mxu2 %v3581_v53 }
 0x673   : > { %v1930_v2 = vrot.slane %v5031_v57, 1  ;;  %v1854_v4 = vrot.slane %v5031_v57, 2  ;;  %v1804_v58 = vld [vmem:[#allocation2 + $0x20] sm:$0x7]  ;;  %v2022_v17 = vrot.slane %v5029_v59, 3  ;;  %v2025_v20 = vrot.slane %v5031_v57, 3 }
 0x674   : > { %v1852_v5 = vsel %vm526_vm10, %v1850_v45, %v1851_v62  ;;  %v1857_v7 = vsel %vm526_vm10, %v1851_v62, %v1856_v54  ;;  %v1928_v15 = vsel %vm499_vm9, %v1926_v12, %v1927_v0  ;;  %v1933_v47 = vsel %vm499_vm9, %v1927_v0, %v1932_v8  ;;  %v2122_v60 = vld [vmem:[#allocation2] sm:$0xfe]  ;;  %v2123_v8 = vld [vmem:[#allocation2 + $0x8] sm:$0xfe]  ;;  %1880 = vmatpush.msrb.mxu2 %v3580_v30  ;;  %v3643_v53 = vld [vmem:[%s5929_s3 + $0x7b8] sm:$0xff] }
 0x675   : > { %v1931_v10 = vsel %vm499_vm9, %v1929_v1, %v1930_v2  ;;  %v1855_v11 = vsel %vm526_vm10, %v1853_v3, %v1854_v4  ;;  %v3831_v18 = vpack.i.bf16 %v1857_v7, %v1852_v5  ;;  %v3836_v61 = vpack.i.bf16 %v1933_v47, %v1928_v15  ;;  %v2133_v3 = vld [vmem:[#allocation2 + $0x8] sm:$0xf8]  ;;  %v2132_v15 = vld [vmem:[#allocation2] sm:$0xf8] }
 0x676   : > { %1938 = vrot.lane.b32.xlu1 %v1931_v10, %s3915_s11  ;;  %1862 = vrot.lane.b32.xlu0 %v1855_v11, %s3915_s11  ;;  %v1935_v6 = vsel %vm499_vm9, %v1930_v2, %v1934_v14  ;;  %v1859_v21 = vsel %vm526_vm10, %v1854_v4, %v1858_v50  ;;  %v2023_v29 = vsel %vm653_vm11, %v2021_v23, %v2022_v17  ;;  %v2029_v40 = vrot.slane %v1805_v19, 3  ;;  %v3564_v23 = vld [vmem:[%s5929_s3 + $0x578] sm:$0xff]  ;;  %v3594_v30 = vld [vmem:[%s5929_s3 + $0x648] sm:$0xff] }
 0x677   : > { %3832 = vrot.lane.b32.xlu2 %v3831_v18, %s3915_s11  ;;  %v2026_v34 = vsel %vm653_vm11, %v2024_v27, %v2025_v20  ;;  %v2027_v41 = vrot.slane %v1804_v58, 3  ;;  %v2256_v2 = vrot.slane %v2122_v60, 1  ;;  %v2354_v11 = vrot.slane %v2133_v3, 3  ;;  %v3586_v27 = vld [vmem:[%s5929_s3 + $0x628] sm:$0xff]  ;;  %v3603_v60 = vld [vmem:[%s5929_s3 + $0x690] sm:$0xff]  ;;  %v3569_v3 = vld [vmem:[%s5929_s3 + $0x5a0] sm:$0xff] }
 0x678   : > { %v2030_v54 = vsel %vm653_vm11, %v2025_v20, %v2029_v40  ;;  %v2259_v0 = vrot.slane %v2123_v8, 1  ;;  %v3579_v20 = vld [vmem:[%s5929_s3 + $0x5f0] sm:$0xff]  ;;  %1913 = vmatpush.msrb.mxu0 %v3586_v27  ;;  %v3573_v40 = vld [vmem:[%s5929_s3 + $0x5c0] sm:$0xff]  ;;  %v3608_v8 = vld [vmem:[%s5929_s3 + $0x6b8] sm:$0xff] }
 0x679   : > { %v2112_v13 = vpop.permute.xlu1 %2111  ;;  %v2028_v59 = vsel %vm653_vm11, %v2022_v17, %v2027_v41  ;;  %v3566_v17 = vld [vmem:[%s5929_s3 + $0x588] sm:$0xff]  ;;  %1881 = vmatpush.msrb.mxu2 %v3579_v20  ;;  %v3559_v41 = vld [vmem:[%s5929_s3 + $0x550] sm:$0xff]  ;;  %v3593_v20 = vld [vmem:[%s5929_s3 + $0x640] sm:$0xff] }
 0x67a   : > { %v2110_v49 = vpop.permute.xlu0 %2109  ;;  %2121 = vst.msk [vmem:[#allocation2 + $0x28] sm:$0x3] %vm471_vm6, %v2112_v13  ;;  %1952 = vmatpush.msra.mxu1 %v3566_v17  ;;  %v3633_v17 = vld [vmem:[%s5929_s3 + $0x768] sm:$0xff] }
 0x67b   : > { %2118 = vst.msk [vmem:[#allocation2 + $0x10] sm:$0xff] %vm465_vm7, %v2110_v49 }
 0x67c   : > { %2119 = vst.msk [vmem:[#allocation2 + $0x18] sm:$0xff] %vm467_vm8, %v2110_v49  ;;  %v2351_v49 = vrot.slane %v2132_v15, 3  ;;  %v3551_v15 = vld [vmem:[%s5929_s3 + $0x510] sm:$0xff] }
 0x67d   : > { %2120 = vst.msk [vmem:[#allocation2 + $0x20] sm:$0x3] %vm469_vm5, %v2112_v13 }
 0x67e   : > { %1942 = vrot.lane.b32.xlu1 %v1935_v6, %s3915_s11  ;;  %3837 = vrot.lane.b32.xlu0 %v3836_v61, %s3915_s11 }
 0x67f   : > { %1866 = vrot.lane.b32.xlu2 %v1859_v21, %s3915_s11 }
 0x681   : > { %v2131_v36 = vld [vmem:[#allocation2 + $0x28] sm:$0x3] }
 0x682   : > { %v5057_v22 = vld [vmem:[#allocation2 + $0x10] sm:$0xff]  ;;  %v2188_v46 = vrot.slane %v2131_v36, 2  ;;  %v2135_v63 = vld [vmem:[#allocation2 + $0x28] sm:$0x7]  ;;  %v3560_v36 = vld [vmem:[%s5929_s3 + $0x558] sm:$0xff] }
 0x683   : > { %v5059_v43 = vld [vmem:[#allocation2 + $0x18] sm:$0xff]  ;;  %v2181_v44 = vrot.slane %v5057_v22, 2  ;;  %v2257_v62 = vrot.slane %v5057_v22, 1  ;;  %v2127_v19 = vld [vmem:[#allocation2 + $0x28] sm:$0x1]  ;;  %v2359_v13 = vrot.slane %v2135_v63, 3 }
 0x684   : > { %v2184_v26 = vrot.slane %v5059_v43, 2  ;;  %v2130_v28 = vld [vmem:[#allocation2 + $0x20] sm:$0x3]  ;;  %v2355_v4 = vrot.slane %v5059_v43, 3  ;;  %v2260_v10 = vrot.slane %v5059_v43, 1  ;;  %v2264_v14 = vrot.slane %v2127_v19, 1 }
 0x685   : > { %v2182_v31 = vsel %vm526_vm10, %v2180_v24, %v2181_v44  ;;  %v2186_v37 = vrot.slane %v2130_v28, 2  ;;  %v2126_v51 = vld [vmem:[#allocation2 + $0x20] sm:$0x1]  ;;  %v2258_v5 = vsel %vm499_vm9, %v2256_v2, %v2257_v62  ;;  %v2352_v47 = vrot.slane %v5057_v22, 3  ;;  %v3578_v43 = vld [vmem:[%s5929_s3 + $0x5e8] sm:$0xff]  ;;  %v3568_v28 = vld [vmem:[%s5929_s3 + $0x598] sm:$0xff] }
 0x686   : > { %v2185_v32 = vsel %vm526_vm10, %v2183_v52, %v2184_v26  ;;  %v3841_v35 = vpack.i.bf16 %v2023_v29, %v2182_v31  ;;  %v2189_v57 = vsel %vm526_vm10, %v2184_v26, %v2188_v46  ;;  %v2262_v1 = vrot.slane %v2126_v51, 1  ;;  %v2134_v6 = vld [vmem:[#allocation2 + $0x20] sm:$0x7]  ;;  %1882 = vmatpush.msrb.mxu2 %v3578_v43  ;;  %v3576_v52 = vld [vmem:[%s5929_s3 + $0x5d8] sm:$0xff]  ;;  %v3562_v26 = vld [vmem:[%s5929_s3 + $0x568] sm:$0xff]  ;;  %1989 = vmatpush.msra.mxu3 %v3568_v28 }
 0x687   : > { %2192 = vrot.lane.b32.xlu1 %v2185_v32, %s3915_s11  ;;  %2033 = vrot.lane.b32.xlu2 %v2026_v34, %s3915_s11  ;;  %v2187_v48 = vsel %vm526_vm10, %v2181_v44, %v2186_v37  ;;  %v2356_v9 = vsel %vm653_vm11, %v2354_v11, %v2355_v4  ;;  %v2261_v12 = vsel %vm499_vm9, %v2259_v0, %v2260_v10  ;;  %v2357_v21 = vrot.slane %v2134_v6, 3  ;;  %v3565_v22 = vld [vmem:[%s5929_s3 + $0x580] sm:$0xff]  ;;  %v3563_v44 = vld [vmem:[%s5929_s3 + $0x570] sm:$0xff] }
 0x688   : > { %3842 = vrot.lane.b32.xlu0 %v3841_v35, %s3915_s11  ;;  %v3846_v45 = vpack.i.bf16 %v2028_v59, %v2187_v48  ;;  %v2263_v7 = vsel %vm499_vm9, %v2257_v62, %v2262_v1  ;;  %v2360_v50 = vsel %vm653_vm11, %v2355_v4, %v2359_v13  ;;  %v2265_v61 = vsel %vm499_vm9, %v2260_v10, %v2264_v14  ;;  %v3577_v24 = vld [vmem:[%s5929_s3 + $0x5e0] sm:$0xff]  ;;  %v3575_v29 = vld [vmem:[%s5929_s3 + $0x5d0] sm:$0xff]  ;;  %v3574_v35 = vld [vmem:[%s5929_s3 + $0x5c8] sm:$0xff] }
 0x689   : > { %v3851_v18 = vpack.i.bf16 %v2263_v7, %v2258_v5  ;;  %v2353_v58 = vsel %vm653_vm11, %v2351_v49, %v2352_v47  ;;  %v2358_v16 = vsel %vm653_vm11, %v2352_v47, %v2357_v21  ;;  %1953 = vmatpush.msra.mxu1 %v3565_v22  ;;  %1883 = vmatpush.msrb.mxu2 %v3577_v24  ;;  %v3561_v31 = vld [vmem:[%s5929_s3 + $0x560] sm:$0xff]  ;;  %v3567_v34 = vld [vmem:[%s5929_s3 + $0x590] sm:$0xff]  ;;  %v3606_v37 = vld [vmem:[%s5929_s3 + $0x6a8] sm:$0xff] }
 0x68a   : > { %v3585_v32 = vld [vmem:[%s5929_s3 + $0x620] sm:$0xff]  ;;  %1990 = vmatpush.msra.mxu3 %v3567_v34  ;;  %v3572_v46 = vld [vmem:[%s5929_s3 + $0x5b8] sm:$0xff]  ;;  %v3558_v48 = vld [vmem:[%s5929_s3 + $0x548] sm:$0xff] }
 0x68b   : > { %1954 = vmatpush.msra.mxu1 %v3564_v23  ;;  %1884 = vmatpush.msrb.mxu2 %v3576_v52  ;;  %v3604_v51 = vld [vmem:[%s5929_s3 + $0x698] sm:$0xff]  ;;  %v3557_v59 = vld [vmem:[%s5929_s3 + $0x540] sm:$0xff]  ;;  %v3602_v1 = vld [vmem:[%s5929_s3 + $0x688] sm:$0xff] }
 0x68c   : > { %1914 = vmatpush.msrb.mxu0 %v3585_v32  ;;  %2206 = vmatpush.msrb.mxu3 %v3645_v38  ;;  %v3556_v62 = vld [vmem:[%s5929_s3 + $0x538] sm:$0xff]  ;;  %v3641_v2 = vld [vmem:[%s5929_s3 + $0x7a8] sm:$0xff]  ;;  %v3555_v4 = vld [vmem:[%s5929_s3 + $0x530] sm:$0xff] }
 0x68d   : > { %1955 = vmatpush.msra.mxu1 %v3563_v44  ;;  %1885 = vmatpush.msrb.mxu2 %v3575_v29  ;;  %v3601_v5 = vld [vmem:[%s5929_s3 + $0x680] sm:$0xff]  ;;  %v3554_v10 = vld [vmem:[%s5929_s3 + $0x528] sm:$0xff]  ;;  %v3600_v11 = vld [vmem:[%s5929_s3 + $0x678] sm:$0xff] }
 0x68e   : > { %2047 = vmatpush.msra.mxu0 %v3606_v37  ;;  %2207 = vmatpush.msrb.mxu3 %v3644_v42  ;;  %v3640_v7 = vld [vmem:[%s5929_s3 + $0x7a0] sm:$0xff]  ;;  %v3607_v0 = vld [vmem:[%s5929_s3 + $0x6b0] sm:$0xff]  ;;  %v3552_v19 = vld [vmem:[%s5929_s3 + $0x518] sm:$0xff] }
 0x68f   : > { %2196 = vrot.lane.b32.xlu1 %v2189_v57, %s3915_s11  ;;  %2037 = vrot.lane.b32.xlu2 %v2030_v54, %s3915_s11  ;;  %v3571_v54 = vld [vmem:[%s5929_s3 + $0x5b0] sm:$0xff]  ;;  %v3598_v13 = vld [vmem:[%s5929_s3 + $0x668] sm:$0xff] }
 0x690   : > { %3847 = vrot.lane.b32.xlu0 %v3846_v45, %s3915_s11  ;;  %1956 = vmatpush.msra.mxu1 %v3562_v26  ;;  %v3642_v57 = vld [vmem:[%s5929_s3 + $0x7b0] sm:$0xff]  ;;  %v3570_v45 = vld [vmem:[%s5929_s3 + $0x5a8] sm:$0xff]  ;;  %v3597_v47 = vld [vmem:[%s5929_s3 + $0x660] sm:$0xff] }
 0x691   : > { %1886 = vmatpush.msrb.mxu2 %v3574_v35  ;;  %2048 = vmatpush.msra.mxu0 %v3605_v39  ;;  %v3638_v63 = vld [vmem:[%s5929_s3 + $0x790] sm:$0xff]  ;;  %v3637_v14 = vld [vmem:[%s5929_s3 + $0x788] sm:$0xff]  ;;  %v3636_v49 = vld [vmem:[%s5929_s3 + $0x780] sm:$0xff] }
 0x692   : > { %1957 = vmatpush.msra.mxu1 %v3561_v31  ;;  %2208 = vmatpush.msrb.mxu3 %v3643_v53  ;;  %v3646_v6 = vld [vmem:[%s5929_s3 + $0x7d0] sm:$0xff]  ;;  %v3632_v22 = vld [vmem:[%s5929_s3 + $0x760] sm:$0xff]  ;;  %v3592_v43 = vld [vmem:[%s5929_s3 + $0x638] sm:$0xff] }
 0x693   : > { %1887 = vmatpush.msrb.mxu2 %v3573_v40  ;;  %2049 = vmatpush.msra.mxu0 %v3604_v51  ;;  %v3595_v21 = vld [vmem:[%s5929_s3 + $0x650] sm:$0xff]  ;;  %v3631_v23 = vld [vmem:[%s5929_s3 + $0x758] sm:$0xff]  ;;  %v3669_v28 = vld [vmem:[%s5929_s3 + $0x868] sm:$0xff] }
 0x694   : > { %1958 = vmatpush.msra.mxu1 %v3560_v36  ;;  %2209 = vmatpush.msrb.mxu3 %v3642_v57  ;;  %v3591_v24 = vld [vmem:[%s5929_s3 + $0x630] sm:$0xff]  ;;  %v3627_v32 = vld [vmem:[%s5929_s3 + $0x738] sm:$0xff]  ;;  %v3629_v34 = vld [vmem:[%s5929_s3 + $0x748] sm:$0xff] }
 0x695   : > { %1888 = vmatpush.msrb.mxu2 %v3572_v46  ;;  %2050 = vmatpush.msra.mxu0 %v3603_v60  ;;  %v3630_v44 = vld [vmem:[%s5929_s3 + $0x750] sm:$0xff]  ;;  %v3668_v36 = vld [vmem:[%s5929_s3 + $0x860] sm:$0xff]  ;;  %v3625_v38 = vld [vmem:[%s5929_s3 + $0x728] sm:$0xff] }
 0x696   : > { %1959 = vmatpush.msra.mxu1 %v3559_v41  ;;  %2210 = vmatpush.msrb.mxu3 %v3641_v2  ;;  %v3626_v37 = vld [vmem:[%s5929_s3 + $0x730] sm:$0xff]  ;;  %v3628_v39 = vld [vmem:[%s5929_s3 + $0x740] sm:$0xff] }
 0x697   : > { %2363 = vrot.lane.b32.xlu1 %v2356_v9, %s3915_s11  ;;  %3852 = vrot.lane.b32.xlu2 %v3851_v18, %s3915_s11  ;;  %v3639_v18 = vld [vmem:[%s5929_s3 + $0x798] sm:$0xff]  ;;  %v3553_v9 = vld [vmem:[%s5929_s3 + $0x520] sm:$0xff] }
 0x698   : > { %2268 = vrot.lane.b32.xlu0 %v2261_v12, %s3915_s11  ;;  %1960 = vmatpush.msra.mxu1 %v3558_v48  ;;  %v3599_v12 = vld [vmem:[%s5929_s3 + $0x670] sm:$0xff]  ;;  %v3624_v46 = vld [vmem:[%s5929_s3 + $0x720] sm:$0xff] }
 0x699   : > { %1889 = vmatpush.msrb.mxu2 %v3571_v54  ;;  %2051 = vmatpush.msra.mxu0 %v3602_v1  ;;  %v3623_v54 = vld [vmem:[%s5929_s3 + $0x718] sm:$0xff]  ;;  %v3622_v57 = vld [vmem:[%s5929_s3 + $0x710] sm:$0xff]  ;;  %v3665_v1 = vld [vmem:[%s5929_s3 + $0x848] sm:$0xff] }
 0x69a   : > { %1961 = vmatpush.msra.mxu1 %v3557_v59  ;;  %2211 = vmatpush.msrb.mxu3 %v3640_v7  ;;  %v3667_v59 = vld [vmem:[%s5929_s3 + $0x858] sm:$0xff] }
 0x69b   : > { %1890 = vmatpush.msrb.mxu2 %v3570_v45  ;;  %2052 = vmatpush.msra.mxu0 %v3601_v5  ;;  %v3666_v45 = vld [vmem:[%s5929_s3 + $0x850] sm:$0xff] }
 0x69c   : > { %1962 = vmatpush.msra.mxu1 %v3556_v62  ;;  %2212 = vmatpush.msrb.mxu3 %v3639_v18  ;;  %v3621_v62 = vld [vmem:[%s5929_s3 + $0x708] sm:$0xff] }
 0x69d   : > { %1891 = vmatpush.msrb.mxu2 %v3569_v3  ;;  %2053 = vmatpush.msra.mxu0 %v3600_v11  ;;  %v3620_v3 = vld [vmem:[%s5929_s3 + $0x700] sm:$0xff] }
 0x69e   : > { %1963 = vmatpush.msra.mxu1 %v3555_v4  ;;  %2213 = vmatpush.msrb.mxu3 %v3638_v63  ;;  %v3664_v4 = vld [vmem:[%s5929_s3 + $0x840] sm:$0xff]  ;;  %v3662_v63 = vld [vmem:[%s5929_s3 + $0x830] sm:$0xff] }
 0x69f   : > { %2367 = vrot.lane.b32.xlu1 %v2360_v50, %s3915_s11  ;;  %2272 = vrot.lane.b32.xlu2 %v2265_v61, %s3915_s11  ;;  %v3647_v50 = vld [vmem:[%s5929_s3 + $0x7d8] sm:$0xff] }
 0x6a0   : > { %2361 = vrot.lane.b32.xlu0 %v2353_v58, %s3915_s11  ;;  %2084 = vmatpush.msra.mxu2 %v3608_v8  ;;  %v3596_v61 = vld [vmem:[%s5929_s3 + $0x658] sm:$0xff] }
 0x6a1   : > { %1964 = vmatpush.msra.mxu1 %v3554_v10  ;;  %2054 = vmatpush.msra.mxu0 %v3599_v12  ;;  %v3635_v58 = vld [vmem:[%s5929_s3 + $0x778] sm:$0xff]  ;;  %v3618_v12 = vld [vmem:[%s5929_s3 + $0x6f0] sm:$0xff] }
 0x6a2   : > { %2085 = vmatpush.msra.mxu2 %v3607_v0  ;;  %2214 = vmatpush.msrb.mxu3 %v3637_v14  ;;  %v3619_v8 = vld [vmem:[%s5929_s3 + $0x6f8] sm:$0xff]  ;;  %v3617_v14 = vld [vmem:[%s5929_s3 + $0x6e8] sm:$0xff] }
 0x6a3   : > { %1965 = vmatpush.msra.mxu1 %v3553_v9  ;;  %2055 = vmatpush.msra.mxu0 %v3598_v13  ;;  %v3663_v10 = vld [vmem:[%s5929_s3 + $0x838] sm:$0xff] }
 0x6a4   : > { %2215 = vmatpush.msrb.mxu3 %v3636_v49  ;;  %v3660_v49 = vld [vmem:[%s5929_s3 + $0x820] sm:$0xff] }
 0x6a5   : > { %1966 = vmatpush.msra.mxu1 %v3552_v19  ;;  %2056 = vmatpush.msra.mxu0 %v3597_v47  ;;  %v3616_v47 = vld [vmem:[%s5929_s3 + $0x6e0] sm:$0xff] }
 0x6a6   : > { %2216 = vmatpush.msrb.mxu3 %v3635_v58  ;;  %v3615_v58 = vld [vmem:[%s5929_s3 + $0x6d8] sm:$0xff] }
 0x6a7   : > { %2365 = vrot.lane.b32.xlu2 %v2358_v16, %s3915_s11  ;;  %1967 = vmatpush.msra.mxu1 %v3551_v15  ;;  %v3634_v16 = vld [vmem:[%s5929_s3 + $0x770] sm:$0xff]  ;;  %v3661_v15 = vld [vmem:[%s5929_s3 + $0x828] sm:$0xff] }
 0x6a8   : > { %2057 = vmatpush.msra.mxu0 %v3596_v61  ;;  %2217 = vmatpush.msrb.mxu3 %v3634_v16 }
 0x6a9   : > { %2243 = vmatpush.msrb.mxu1 %v3647_v50 }
 0x6aa   : > { %2058 = vmatpush.msra.mxu0 %v3595_v21  ;;  %2218 = vmatpush.msrb.mxu3 %v3633_v17  ;;  %v3658_v17 = vld [vmem:[%s5929_s3 + $0x810] sm:$0xff] }
 0x6ab   : > { %2244 = vmatpush.msrb.mxu1 %v3646_v6  ;;  %v3659_v6 = vld [vmem:[%s5929_s3 + $0x818] sm:$0xff] }
 0x6ac   : > { %2059 = vmatpush.msra.mxu0 %v3594_v30  ;;  %2219 = vmatpush.msrb.mxu3 %v3632_v22  ;;  %v3614_v30 = vld [vmem:[%s5929_s3 + $0x6d0] sm:$0xff] }
 0x6ae   : > { %2060 = vmatpush.msra.mxu0 %v3593_v20  ;;  %2220 = vmatpush.msrb.mxu3 %v3631_v23  ;;  %v3613_v23 = vld [vmem:[%s5929_s3 + $0x6c8] sm:$0xff] }
 0x6b0   : > { %2061 = vmatpush.msra.mxu0 %v3592_v43  ;;  %2221 = vmatpush.msrb.mxu3 %v3630_v44  ;;  %v3612_v44 = vld [vmem:[%s5929_s3 + $0x6c0] sm:$0xff] }
 0x6b2   : > { %2062 = vmatpush.msra.mxu0 %v3591_v24  ;;  %v3657_v24 = vld [vmem:[%s5929_s3 + $0x808] sm:$0xff] }
 0x6d1   : > { %v3833_v52 = vpop.permute.xlu2 %3832 }
 0x6d2   : > { %v3834_v26 = vunpack.i.l.bf16 %v3833_v52  ;;  %v3835_v40 = vunpack.i.h.bf16 %v3833_v52  ;;  %v3656_v52 = vld [vmem:[%s5929_s3 + $0x800] sm:$0xff] }
 0x6d9   : > { %v1867_v27 = vpop.permute.xlu2 %1866 }
 0x6da   : > { %v1869_v51 = vsel %vm567_vm13, %v3835_v40, %v1867_v27 }
 0x6e1   : > { %v2034_v53 = vpop.permute.xlu2 %2033 }
 0x6e8   : > { %v1939_v29 = vpop.permute.xlu1 %1938  ;;  %v1863_v31 = vpop.permute.xlu0 %1862 }
 0x6e9   : > { %v1868_v35 = vsel %vm567_vm13, %v3834_v26, %v1863_v31  ;;  %3587 = vmatmul.msk.f32.vlgmr.msrb.gmra.mxu0 %vm467_vm8, %v1863_v31  ;;  %3589 = vmatmul.msk.f32.vlgmr.msra.gmra.mxu3 %vm467_vm8, %v1939_v29  ;;  %v2038_v9 = vpop.permute.xlu2 %2037 }
 0x6ea   : > { %1892 = vmatmul.f32.vlgmr.msrb.gmra.mxu2 %v1868_v35  ;;  %2414 = vmatpush.msra.mxu3 %v3669_v28  ;;  %v3655_v28 = vld [vmem:[%s5929_s3 + $0x7f8] sm:$0xff] }
 0x6eb   : > { %2282 = vmatpush.msrb.mxu2 %v3627_v32  ;;  %2319 = vmatpush.msrb.mxu0 %v3629_v34  ;;  %v3654_v32 = vld [vmem:[%s5929_s3 + $0x7f0] sm:$0xff]  ;;  %v3653_v34 = vld [vmem:[%s5929_s3 + $0x7e8] sm:$0xff] }
 0x6ec   : > { %2415 = vmatpush.msra.mxu3 %v3668_v36  ;;  %v3652_v36 = vld [vmem:[%s5929_s3 + $0x7e0] sm:$0xff] }
 0x6ed   : > { %2283 = vmatpush.msrb.mxu2 %v3626_v37  ;;  %2320 = vmatpush.msrb.mxu0 %v3628_v39 }
 0x6ef   : > { %2284 = vmatpush.msrb.mxu2 %v3625_v38 }
 0x6f0   : > { %v1943_v41 = vpop.permute.xlu1 %1942  ;;  %v3838_v42 = vpop.permute.xlu0 %3837 }
 0x6f1   : > { %v3839_v48 = vunpack.i.l.bf16 %v3838_v42  ;;  %3588 = vmatmul.msk.f32.gmra.mxu0 %vm467_vm8, %v1867_v27  ;;  %3590 = vmatmul.msk.f32.gmra.mxu3 %vm467_vm8, %v1943_v41  ;;  %v3840_v2 = vunpack.i.h.bf16 %v3838_v42  ;;  %v3853_v43 = vpop.permute.xlu2 %3852 }
 0x6f2   : > { %1895 = vmatmul.f32.gmra.mxu2 %v1869_v51  ;;  %v3854_v26 = vunpack.i.l.bf16 %v3853_v43  ;;  %v3855_v37 = vunpack.i.h.bf16 %v3853_v43 }
 0x6f3   : > { %2285 = vmatpush.msrb.mxu2 %v3624_v46  ;;  %v1944_v60 = vsel %vm567_vm13, %v3839_v48, %v1939_v29  ;;  %v1945_v0 = vsel %vm567_vm13, %v3840_v2, %v1943_v41 }
 0x6f4   : > { %1968 = vmatmul.f32.vlgmr.msra.gmra.mxu1 %v1944_v60 }
 0x6f5   : > { %2286 = vmatpush.msrb.mxu2 %v3623_v54  ;;  %2377 = vmatpush.msra.mxu1 %v3667_v59 }
 0x6f7   : > { %2287 = vmatpush.msrb.mxu2 %v3622_v57  ;;  %2378 = vmatpush.msra.mxu1 %v3666_v45 }
 0x6f9   : > { %v2193_v5 = vpop.permute.xlu1 %2192  ;;  %2288 = vmatpush.msrb.mxu2 %v3621_v62  ;;  %2379 = vmatpush.msra.mxu1 %v3665_v1  ;;  %v2273_v35 = vpop.permute.xlu2 %2272 }
 0x6fa   : > { %3609 = vmatmul.msk.f32.vlgmr.msra.gmra.mxu2 %vm467_vm8, %v2034_v53  ;;  %v3843_v7 = vpop.permute.xlu0 %3842  ;;  %v2275_v40 = vsel %vm567_vm13, %v3855_v37, %v2273_v35 }
 0x6fb   : > { %v3845_v11 = vunpack.i.h.bf16 %v3843_v7  ;;  %v3844_v18 = vunpack.i.l.bf16 %v3843_v7  ;;  %2289 = vmatpush.msrb.mxu2 %v3620_v3  ;;  %2380 = vmatpush.msra.mxu1 %v3664_v4  ;;  %v3884_v7 = vld [vmem:[%s5930_s4 + $0x3] ss:$0 sm:$0xff] }
 0x6fc   : > { %1971 = vmatmul.f32.gmra.mxu1 %v1945_v0 }
 0x6fd   : > { %2290 = vmatpush.msrb.mxu2 %v3619_v8  ;;  %2381 = vmatpush.msra.mxu1 %v3663_v10  ;;  %v2039_v19 = vsel %vm567_vm13, %v3845_v11, %v2034_v53  ;;  %v2198_v13 = vsel %vm567_vm13, %v3844_v18, %v2193_v5 }
 0x6fe   : > { %2063 = vmatmul.f32.vlgmr.msra.gmra.mxu0 %v2039_v19  ;;  %2222 = vmatmul.f32.vlgmr.msrb.gmra.mxu3 %v2198_v13 }
 0x6ff   : > { %2291 = vmatpush.msrb.mxu2 %v3618_v12  ;;  %2382 = vmatpush.msra.mxu1 %v3662_v63 }
 0x701   : > { %v2197_v50 = vpop.permute.xlu1 %2196  ;;  %2292 = vmatpush.msrb.mxu2 %v3617_v14  ;;  %2383 = vmatpush.msra.mxu1 %v3661_v15  ;;  %v2366_v42 = vpop.permute.xlu2 %2365 }
 0x702   : > { %3610 = vmatmul.msk.f32.gmra.mxu2 %vm467_vm8, %v2038_v9  ;;  %v3848_v61 = vpop.permute.xlu0 %3847 }
 0x703   : > { %v3850_v21 = vunpack.i.h.bf16 %v3848_v61  ;;  %v3849_v16 = vunpack.i.l.bf16 %v3848_v61  ;;  %2293 = vmatpush.msrb.mxu2 %v3616_v47  ;;  %2384 = vmatpush.msra.mxu1 %v3660_v49 }
 0x704   : > { %3648 = vmatmul.msk.f32.vlgmr.msrb.gmra.mxu1 %vm467_vm8, %v2193_v5 }
 0x705   : > { %2294 = vmatpush.msrb.mxu2 %v3615_v58  ;;  %2385 = vmatpush.msra.mxu1 %v3659_v6  ;;  %v2040_v20 = vsel %vm567_vm13, %v3850_v21, %v2038_v9  ;;  %v2199_v22 = vsel %vm567_vm13, %v3849_v16, %v2197_v50 }
 0x706   : > { %2066 = vmatmul.f32.gmra.mxu0 %v2040_v20  ;;  %2225 = vmatmul.f32.gmra.mxu3 %v2199_v22 }
 0x707   : > { %2295 = vmatpush.msrb.mxu2 %v3614_v30  ;;  %2386 = vmatpush.msra.mxu1 %v3658_v17 }
 0x709   : > { %2296 = vmatpush.msrb.mxu2 %v3613_v23  ;;  %2387 = vmatpush.msra.mxu1 %v3657_v24  ;;  %v2364_v29 = vpop.permute.xlu1 %2363 }
 0x70a   : > { %v2269_v27 = vpop.permute.xlu0 %2268 }
 0x70b   : > { %v2274_v31 = vsel %vm567_vm13, %v3854_v26, %v2269_v27  ;;  %2297 = vmatpush.msrb.mxu2 %v3612_v44  ;;  %2388 = vmatpush.msra.mxu1 %v3656_v52  ;;  %v3885_v52 = vld [vmem:[%s5930_s4 + $0x4] ss:$0 sm:$0xff] }
 0x70c   : > { %3649 = vmatmul.msk.f32.gmra.mxu1 %vm467_vm8, %v2197_v50  ;;  %2298 = vmatmul.f32.vlgmr.msrb.gmra.mxu2 %v2274_v31 }
 0x70d   : > { %2389 = vmatpush.msra.mxu1 %v3655_v28 }
 0x70e   : > { %3650 = vmatmul.msk.f32.vlgmr.msrb.gmra.mxu0 %vm467_vm8, %v2269_v27  ;;  %3670 = vmatmul.msk.f32.vlgmr.msra.gmra.mxu3 %vm467_vm8, %v2364_v29 }
 0x70f   : > { %2390 = vmatpush.msra.mxu1 %v3654_v32 }
 0x711   : > { %2391 = vmatpush.msra.mxu1 %v3653_v34  ;;  %v2368_v41 = vpop.permute.xlu1 %2367 }
 0x712   : > { %v2362_v38 = vpop.permute.xlu0 %2361  ;;  %v2370_v46 = vsel %vm567_vm13, %v2366_v42, %v2368_v41 }
 0x713   : > { %v2369_v39 = vsel %vm567_vm13, %v2362_v38, %v2364_v29  ;;  %2392 = vmatpush.msra.mxu1 %v3652_v36 }
 0x714   : > { %2301 = vmatmul.f32.gmra.mxu2 %v2275_v40  ;;  %2393 = vmatmul.f32.vlgmr.msra.gmra.mxu1 %v2369_v39 }
 0x716   : > { %3651 = vmatmul.msk.f32.gmra.mxu0 %vm467_vm8, %v2273_v35  ;;  %3671 = vmatmul.msk.f32.gmra.mxu3 %vm467_vm8, %v2368_v41 }
 0x71c   : > { %2396 = vmatmul.f32.gmra.mxu1 %v2370_v46 }
 0x766   : > { %v1916_v48 = vpop.f32.mrf.mxu0 }
 0x76c   : > { %v1992_v53 = vpop.f32.mrf.mxu3 }
 0x76d   : > { %v1893_v51 = vpop.f32.mrf.mxu2 }
 0x76e   : > { %v1919_v59 = vpop.f32.mrf.mxu0  ;;  %v1917_v57 = vadd.f32 %v1916_v48, %v1893_v51 }
 0x771   : > { %v1969_v54 = vpop.f32.mrf.mxu1 }
 0x772   : > { %v1970_v1 = vadd.f32 %v1969_v54, %v1917_v57 }
 0x774   : > { %v1995_v45 = vpop.f32.mrf.mxu3  ;;  %v1993_v4 = vadd.f32 %v1992_v53, %v1970_v1 }
 0x775   : > { %v1896_v60 = vpop.f32.mrf.mxu2 }
 0x776   : > { %v1920_v8 = vadd.f32 %v1919_v59, %v1896_v60 }
 0x779   : > { %v1972_v62 = vpop.f32.mrf.mxu1 }
 0x77a   : > { %v1973_v0 = vadd.f32 %v1972_v62, %v1920_v8 }
 0x77b   : > { %v2064_v2 = vpop.f32.mrf.mxu0 }
 0x77c   : > { %v1996_v13 = vadd.f32 %v1995_v45, %v1973_v0 }
 0x77d   : > { %v2087_v3 = vpop.f32.mrf.mxu2 }
 0x77e   : > { %v2088_v5 = vadd.f32 %v2087_v3, %v2064_v2 }
 0x780   : > { %v2093_v10 = vadd.f32 %v2088_v5, %v1993_v4 }
 0x781   : > { %v2223_v11 = vpop.f32.mrf.mxu3  ;;  %v2246_v18 = vpop.f32.mrf.mxu1 }
 0x782   : > { %v2100_v9 = vadd.f32 %v3884_v7, %v2093_v10  ;;  %v2247_v21 = vadd.f32 %v2246_v18, %v2223_v11 }
 0x783   : > { %v2067_v63 = vpop.f32.mrf.mxu0 }
 0x784   : > { %v2432_v12 = vsub.f32 0.0, %v2100_v9 }
 0x785   : > { %v2090_v19 = vpop.f32.mrf.mxu2 }
 0x786   : > { %v3673_v14 = vmul.f32 -1.442695, %v2432_v12  ;;  %v2091_v15 = vadd.f32 %v2090_v19, %v2067_v63 }
 0x788   : > { %3888 = vpow2.f32 %v3673_v14  ;;  %v2094_v47 = vadd.f32 %v2091_v15, %v1996_v13 }
 0x789   : > { %v2226_v49 = vpop.f32.mrf.mxu3  ;;  %v2249_v50 = vpop.f32.mrf.mxu1 }
 0x78a   : > { %v2101_v61 = vadd.f32 %v3884_v7, %v2094_v47  ;;  %v2250_v28 = vadd.f32 %v2249_v50, %v2226_v49 }
 0x78b   : > { %v2322_v30 = vpop.f32.mrf.mxu0 }
 0x78c   : > { %v2433_v58 = vsub.f32 0.0, %v2101_v61 }
 0x78e   : > { %v3889_v6 = vpop.eup %3888  ;;  %v3674_v16 = vmul.f32 -1.442695, %v2433_v58 }
 0x78f   : > { %v2440_v17 = vadd.f32 1.0, %v3889_v6  ;;  %v2299_v20 = vpop.f32.mrf.mxu2 }
 0x790   : > { %3890 = vpow2.f32 %v3674_v16  ;;  %v2300_v22 = vadd.f32 %v2299_v20, %v2247_v21 }
 0x791   : > { %3892 = vrcp.f32 %v2440_v17  ;;  %v2394_v43 = vpop.f32.mrf.mxu1  ;;  %v2417_v23 = vpop.f32.mrf.mxu3  ;;  %v2451_v51 = vand.u32 2147483647, %v2440_v17  ;;  %v2453_v53 = vand.u32 2147483648, %v2440_v17  ;;  %vm2447_vm12 = vweird.f32 %v2440_v17 }
 0x792   : > { %v2323_v24 = vadd.f32 %v2322_v30, %v2300_v22  ;;  %v2418_v44 = vadd.f32 %v2417_v23, %v2394_v43 }
 0x793   : > { %v2325_v36 = vpop.f32.mrf.mxu0  ;;  %v2454_v62 = vor.u32 1.1754944e-38, %v2453_v53  ;;  %vm2452_vm15 = vcmp.eq.f32.partialorder %v2451_v51, 8.507059e+37 }
 0x794   : > { %v2423_v26 = vadd.f32 %v2418_v44, %v2323_v24 }
 0x796   : > { %v3891_v27 = vpop.eup %3890  ;;  %v2430_v29 = vadd.f32 %v3885_v52, %v2423_v26 }
 0x797   : > { %v3893_v31 = vpop.eup %3892  ;;  %v2441_v32 = vadd.f32 1.0, %v3891_v27  ;;  %v2302_v34 = vpop.f32.mrf.mxu2 }
 0x798   : > { %v2476_v35 = vsub.f32 0.0, %v2430_v29  ;;  %v2303_v37 = vadd.f32 %v2302_v34, %v2250_v28  ;;  %v2443_v38 = vmul.f32 %v3893_v31, %v2440_v17  ;;  %vm2448_vm2 = vweird.f32 %v3893_v31 }
 0x799   : > { %3894 = vrcp.f32 %v2441_v32  ;;  %v2397_v39 = vpop.f32.mrf.mxu1  ;;  %v2420_v40 = vpop.f32.mrf.mxu3  ;;  %vm2449_vm14 = vmor %vm2447_vm12, %vm2448_vm2  ;;  %v2466_v18 = vand.u32 2147483647, %v2441_v32  ;;  %v2468_v0 = vand.u32 2147483648, %v2441_v32  ;;  %vm2462_vm2 = vweird.f32 %v2441_v32 }
 0x79a   : > { %v3675_v41 = vmul.f32 -1.442695, %v2476_v35  ;;  %v2326_v42 = vadd.f32 %v2325_v36, %v2303_v37  ;;  %v2421_v46 = vadd.f32 %v2420_v40, %v2397_v39  ;;  %v2444_v48 = vsub.f32 1.0, %v2443_v38 }
 0x79b   : > { %v2469_v13 = vor.u32 1.1754944e-38, %v2468_v0 }
 0x79c   : > { %3896 = vpow2.f32 %v3675_v41  ;;  %v2424_v54 = vadd.f32 %v2421_v46, %v2326_v42  ;;  %v2445_v59 = vmul.f32 %v3893_v31, %v2444_v48 }
 0x79e   : > { %v2431_v60 = vadd.f32 %v3885_v52, %v2424_v54  ;;  %v2446_v57 = vadd.f32 %v3893_v31, %v2445_v59 }
 0x79f   : > { %v3895_v45 = vpop.eup %3894 }
 0x7a0   : > { %v2477_v1 = vsub.f32 0.0, %v2431_v60  ;;  %v2450_v2 = vsel %vm2449_vm14, %v3893_v31, %v2446_v57  ;;  %v2458_v3 = vmul.f32 %v3895_v45, %v2441_v32  ;;  %vm2463_vm0 = vweird.f32 %v3895_v45 }
 0x7a1   : > { %v2455_v4 = vsel %vm2452_vm15, %v2454_v62, %v2450_v2  ;;  %vm2464_vm12 = vmor %vm2462_vm2, %vm2463_vm0  ;;  %vm2467_vm14 = vcmp.eq.f32.partialorder %v2466_v18, 8.507059e+37 }
 0x7a2   : > { %v3897_v5 = vpop.eup %3896  ;;  %v3676_v7 = vmul.f32 -1.442695, %v2477_v1  ;;  %v2472_v8 = vmul.f32 %v2455_v4, %v5007_v25  ;;  %v2459_v10 = vsub.f32 1.0, %v2458_v3 }
 0x7a3   : > { %v2484_v11 = vadd.f32 1.0, %v3897_v5 }
 0x7a4   : > { %3898 = vpow2.f32 %v3676_v7  ;;  %v2474_v9 = vadd.f32 %v2472_v8, %v4994_v55  ;;  %v2460_v12 = vmul.f32 %v3895_v45, %v2459_v10 }
 0x7a5   : > { %3900 = vrcp.f32 %v2484_v11  ;;  %v2497_v30 = vand.u32 2147483648, %v2484_v11  ;;  %v2495_v22 = vand.u32 2147483647, %v2484_v11  ;;  %vm2491_vm0 = vweird.f32 %v2484_v11 }
 0x7a6   : > { %v2526_v63 = vrot.slane %v2474_v9, 6  ;;  %2520 = vst [vmem:[%s386_s24] sm:$0xff] %v2474_v9  ;;  %v2461_v19 = vadd.f32 %v3895_v45, %v2460_v12 }
 0x7a7   : > { %v2498_v24 = vor.u32 1.1754944e-38, %v2497_v30 }
 0x7a8   : > { %2529 = vrot.lane.b32.xlu0 %v2526_v63, %s3913_s29  ;;  %v2465_v14 = vsel %vm2464_vm12, %v3895_v45, %v2461_v19  ;;  %vm2496_vm12 = vcmp.eq.f32.partialorder %v2495_v22, 8.507059e+37 }
 0x7a9   : > { %v2470_v15 = vsel %vm2467_vm14, %v2469_v13, %v2465_v14 }
 0x7aa   : > { %v3899_v47 = vpop.eup %3898  ;;  %v2473_v49 = vmul.f32 %v2470_v15, %v5011_v33 }
 0x7ab   : > { %v3901_v50 = vpop.eup %3900  ;;  %v2485_v61 = vadd.f32 1.0, %v3899_v47 }
 0x7ac   : > { %v2475_v58 = vadd.f32 %v2473_v49, %v4998_v56  ;;  %v2487_v6 = vmul.f32 %v3901_v50, %v2484_v11  ;;  %vm2492_vm15 = vweird.f32 %v3901_v50 }
 0x7ad   : > { %3902 = vrcp.f32 %v2485_v61  ;;  %vm2493_vm2 = vmor %vm2491_vm0, %vm2492_vm15  ;;  %v2512_v29 = vand.u32 2147483648, %v2485_v61  ;;  %v2510_v34 = vand.u32 2147483647, %v2485_v61  ;;  %vm2506_vm15 = vweird.f32 %v2485_v61 }
 0x7ae   : > { %v2527_v21 = vrot.slane %v2475_v58, 6  ;;  %2521 = vst [vmem:[%s386_s24 + $0x8] sm:$0xff] %v2475_v58  ;;  %v2488_v16 = vsub.f32 1.0, %v2487_v6 }
 0x7af   : > { %v2513_v37 = vor.u32 1.1754944e-38, %v2512_v29 }
 0x7b0   : > { %2533 = vrot.lane.b32.xlu2 %v2527_v21, %s3913_s29  ;;  %v2528_v17 = vsel %vm448_vm1, %v2526_v63, %v2527_v21  ;;  %v2489_v20 = vmul.f32 %v3901_v50, %v2488_v16 }
 0x7b1   : > { %2531 = vrot.lane.b32.xlu1 %v2528_v17, %s3913_s29 }
 0x7b2   : > { %v2490_v43 = vadd.f32 %v3901_v50, %v2489_v20 }
 0x7b3   : > { %v3903_v23 = vpop.eup %3902 }
 0x7b4   : > { %v2494_v44 = vsel %vm2493_vm2, %v3901_v50, %v2490_v43  ;;  %v2502_v52 = vmul.f32 %v3903_v23, %v2485_v61  ;;  %vm2507_vm14 = vweird.f32 %v3903_v23  ;;  %vm2511_vm2 = vcmp.eq.f32.partialorder %v2510_v34, 8.507059e+37 }
 0x7b5   : > { %v2499_v26 = vsel %vm2496_vm12, %v2498_v24, %v2494_v44  ;;  %vm2508_vm0 = vmor %vm2506_vm15, %vm2507_vm14 }
 0x7b6   : > { %v2516_v27 = vmul.f32 %v2499_v26, %v4994_v55  ;;  %v2503_v28 = vsub.f32 1.0, %v2502_v52 }
 0x7b8   : > { %v2518_v31 = vadd.f32 %v2516_v27, %v5007_v25  ;;  %v2504_v32 = vmul.f32 %v3903_v23, %v2503_v28 }
 0x7ba   : > { %2522 = vst [vmem:[%s381_s27] sm:$0xff] %v2518_v31  ;;  %v2854_v35 = vrot.slane %v2518_v31, 6  ;;  %v2505_v36 = vadd.f32 %v3903_v23, %v2504_v32 }
 0x7bc   : > { %2857 = vrot.lane.b32.xlu0 %v2854_v35, %s3913_s29  ;;  %v2509_v55 = vsel %vm2508_vm0, %v3903_v23, %v2505_v36 }
 0x7bd   : > { %v2514_v38 = vsel %vm2511_vm2, %v2513_v37, %v2509_v55 }
 0x7be   : > { %v2517_v39 = vmul.f32 %v2514_v38, %v4998_v56 }
 0x7c0   : > { %v2519_v40 = vadd.f32 %v2517_v39, %v5011_v33 }
 0x7c2   : > { %2523 = vst [vmem:[%s381_s27 + $0x8] sm:$0xff] %v2519_v40  ;;  %v2855_v25 = vrot.slane %v2519_v40, 6  ;;  %v3694_v40 = vld [vmem:[%s5931_s5 + $0x118] sm:$0xff] }
 0x7c3   : > { %2664 = vmatpush.msra.mxu2 %v3694_v40  ;;  %v3682_v40 = vld [vmem:[%s5931_s5 + $0xb8] sm:$0xff] }
 0x7c4   : > { %2861 = vrot.lane.b32.xlu2 %v2855_v25, %s3913_s29  ;;  %v2856_v41 = vsel %vm448_vm1, %v2854_v35, %v2855_v25  ;;  %v3692_v25 = vld [vmem:[%s5931_s5 + $0x108] sm:$0xff] }
 0x7c5   : > { %2859 = vrot.lane.b32.xlu1 %v2856_v41, %s3913_s29  ;;  %v2573_v41 = vld [vmem:[%s5931_s5 + $0x78] sm:$0xff]  ;;  %2627 = vmatpush.msra.mxu0 %v3692_v25  ;;  %v2563_v25 = vld [vmem:[%s5931_s5 + $0x28] sm:$0xff] }
 0x7c6   : > { %2703 = vmatpush.msrb.mxu3 %v2573_v41  ;;  %v3681_v41 = vld [vmem:[%s5931_s5 + $0xb0] sm:$0xff] }
 0x80a   : > { %v2534_v42 = vpop.permute.xlu2 %2533 }
 0x80b   : > { %2542 = vst.msk [vmem:[#allocation2 + $0x20] sm:$0x3] %vm469_vm5, %v2534_v42 }
 0x80c   : > { %2543 = vst.msk [vmem:[#allocation2 + $0x28] sm:$0x3] %vm471_vm6, %v2534_v42 }
 0x812   : > { %v2548_v56 = vld [vmem:[#allocation2 + $0x20] sm:$0x1] }
 0x813   : > { %v2549_v48 = vld [vmem:[#allocation2 + $0x28] sm:$0x1]  ;;  %v2552_v54 = vld [vmem:[#allocation2 + $0x20] sm:$0x3]  ;;  %v2683_v50 = vrot.slane %v2548_v56, 1  ;;  %v3693_v56 = vld [vmem:[%s5931_s5 + $0x110] sm:$0xff] }
 0x814   : > { %v2553_v51 = vld [vmem:[#allocation2 + $0x28] sm:$0x3]  ;;  %v5483_v59 = vld [vmem:[#allocation2 + $0x20] sm:$0x7]  ;;  %v2607_v49 = vrot.slane %v2552_v54, 2  ;;  %v2685_v6 = vrot.slane %v2549_v48, 1  ;;  %2665 = vmatpush.msra.mxu2 %v3693_v56 }
 0x815   : > { %v5480_v53 = vld [vmem:[#allocation2 + $0x28] sm:$0x7]  ;;  %v2609_v21 = vrot.slane %v2553_v51, 2  ;;  %v2778_v48 = vrot.slane %v5483_v59, 3  ;;  %v3751_v56 = vld [vmem:[%s5931_s5 + $0x2b0] sm:$0xff] }
 0x816   : > { %v2780_v39 = vrot.slane %v5480_v53, 3 }
 0x81a   : > { %v2530_v46 = vpop.permute.xlu0 %2529 }
 0x81b   : > { %2538 = vst.msk [vmem:[#allocation2] sm:$0xfc] %vm461_vm3, %v2530_v46 }
 0x81c   : > { %2539 = vst.msk [vmem:[#allocation2 + $0x8] sm:$0xfc] %vm463_vm4, %v2530_v46 }
 0x81e   : > { %v2862_v33 = vpop.permute.xlu2 %2861 }
 0x81f   : > { %2871 = vst.msk [vmem:[#allocation2 + $0x28] sm:$0x3] %vm471_vm6, %v2862_v33 }
 0x820   : > { %2870 = vst.msk [vmem:[#allocation2 + $0x20] sm:$0x3] %vm469_vm5, %v2862_v33 }
 0x822   : > { %v2544_v57 = vld [vmem:[#allocation2] sm:$0xfe] }
 0x823   : > { %v2532_v60 = vpop.permute.xlu1 %2531  ;;  %v2550_v45 = vld [vmem:[#allocation2] sm:$0xfc]  ;;  %v2545_v62 = vld [vmem:[#allocation2 + $0x8] sm:$0xfe]  ;;  %v2677_v7 = vrot.slane %v2544_v57, 1 }
 0x824   : > { %2540 = vst.msk [vmem:[#allocation2 + $0x10] sm:$0xff] %vm465_vm7, %v2532_v60  ;;  %v2551_v1 = vld [vmem:[#allocation2 + $0x8] sm:$0xfc]  ;;  %v2601_v4 = vrot.slane %v2550_v45, 2  ;;  %v2680_v10 = vrot.slane %v2545_v62, 1 }
 0x825   : > { %2541 = vst.msk [vmem:[#allocation2 + $0x18] sm:$0xff] %vm467_vm8, %v2532_v60  ;;  %v2604_v18 = vrot.slane %v2551_v1, 2  ;;  %v2555_v19 = vld [vmem:[#allocation2 + $0x8] sm:$0xf8]  ;;  %v2554_v47 = vld [vmem:[#allocation2] sm:$0xf8] }
 0x826   : > { %v2775_v43 = vrot.slane %v2555_v19, 3  ;;  %v2772_v28 = vrot.slane %v2554_v47, 3  ;;  %v2881_v42 = vld [vmem:[#allocation2 + $0x28] sm:$0x3] }
 0x827   : > { %v2880_v38 = vld [vmem:[#allocation2 + $0x20] sm:$0x3]  ;;  %v2938_v53 = vrot.slane %v2881_v42, 2 }
 0x828   : > { %v2936_v46 = vrot.slane %v2880_v38, 2  ;;  %v2884_v47 = vld [vmem:[#allocation2 + $0x20] sm:$0x7] }
 0x829   : > { %v3683_v38 = vld [vmem:[%s5931_s5 + $0xc0] sm:$0xff] }
 0x82a   : > { %v2562_v42 = vld [vmem:[%s5931_s5 + $0x20] sm:$0xff] }
 0x82b   : > { %v5488_v2 = vld [vmem:[#allocation2 + $0x10] sm:$0xff] }
 0x82c   : > { %v5490_v3 = vld [vmem:[#allocation2 + $0x18] sm:$0xff]  ;;  %v2602_v5 = vrot.slane %v5488_v2, 2  ;;  %v2678_v8 = vrot.slane %v5488_v2, 1  ;;  %v2773_v44 = vrot.slane %v5488_v2, 3 }
 0x82d   : > { %v2681_v11 = vrot.slane %v5490_v3, 1  ;;  %v2605_v0 = vrot.slane %v5490_v3, 2  ;;  %v2776_v22 = vrot.slane %v5490_v3, 3 }
 0x82e   : > { %v2858_v9 = vpop.permute.xlu0 %2857  ;;  %v2603_v12 = vsel %vm526_vm10, %v2601_v4, %v2602_v5  ;;  %v2679_v63 = vsel %vm499_vm9, %v2677_v7, %v2678_v8  ;;  %v2608_v61 = vsel %vm526_vm10, %v2602_v5, %v2607_v49  ;;  %v2684_v58 = vsel %vm499_vm9, %v2678_v8, %v2683_v50 }
 0x82f   : > { %v2682_v13 = vsel %vm499_vm9, %v2680_v10, %v2681_v11  ;;  %v2606_v14 = vsel %vm526_vm10, %v2604_v18, %v2605_v0  ;;  %v3856_v15 = vpack.i.bf16 %v2603_v12, %v2679_v63  ;;  %2867 = vst.msk [vmem:[#allocation2 + $0x8] sm:$0xfc] %vm463_vm4, %v2858_v9  ;;  %v2686_v16 = vsel %vm499_vm9, %v2681_v11, %v2685_v6  ;;  %v2885_v12 = vld [vmem:[#allocation2 + $0x28] sm:$0x7]  ;;  %v2876_v6 = vld [vmem:[#allocation2 + $0x20] sm:$0x1] }
 0x830   : > { %2689 = vrot.lane.b32.xlu1 %v2682_v13, %s3915_s11  ;;  %2613 = vrot.lane.b32.xlu2 %v2606_v14, %s3915_s11  ;;  %2866 = vst.msk [vmem:[#allocation2] sm:$0xfc] %vm461_vm3, %v2858_v9  ;;  %v2610_v30 = vsel %vm526_vm10, %v2605_v0, %v2609_v21  ;;  %v3861_v20 = vpack.i.bf16 %v2608_v61, %v2684_v58  ;;  %v3109_v13 = vrot.slane %v2885_v12, 3  ;;  %v2877_v14 = vld [vmem:[#allocation2 + $0x28] sm:$0x1]  ;;  %v3107_v50 = vrot.slane %v2884_v47, 3 }
 0x831   : > { %3857 = vrot.lane.b32.xlu0 %v3856_v15, %s3915_s11  ;;  %v2777_v52 = vsel %vm653_vm11, %v2775_v43, %v2776_v22  ;;  %v2774_v35 = vsel %vm653_vm11, %v2772_v28, %v2773_v44  ;;  %v2781_v33 = vsel %vm653_vm11, %v2776_v22, %v2780_v39  ;;  %v2779_v54 = vsel %vm653_vm11, %v2773_v44, %v2778_v48  ;;  %v2571_v22 = vld [vmem:[%s5931_s5 + $0x68] sm:$0xff]  ;;  %v3689_v43 = vld [vmem:[%s5931_s5 + $0xf0] sm:$0xff]  ;;  %v2569_v44 = vld [vmem:[%s5931_s5 + $0x58] sm:$0xff] }
 0x832   : > { %v3014_v49 = vrot.slane %v2877_v14, 1  ;;  %v3012_v21 = vrot.slane %v2876_v6, 1  ;;  %v2567_v28 = vld [vmem:[%s5931_s5 + $0x48] sm:$0xff]  ;;  %v2564_v39 = vld [vmem:[%s5931_s5 + $0x30] sm:$0xff]  ;;  %v2561_v48 = vld [vmem:[%s5931_s5 + $0x18] sm:$0xff] }
 0x833   : > { %v3745_v12 = vld [vmem:[%s5931_s5 + $0x280] sm:$0xff]  ;;  %v3744_v14 = vld [vmem:[%s5931_s5 + $0x278] sm:$0xff]  ;;  %v3743_v47 = vld [vmem:[%s5931_s5 + $0x270] sm:$0xff] }
 0x834   : > { %v3741_v6 = vld [vmem:[%s5931_s5 + $0x260] sm:$0xff] }
 0x836   : > { %v2879_v24 = vld [vmem:[#allocation2 + $0x8] sm:$0xfc] }
 0x837   : > { %v2860_v17 = vpop.permute.xlu1 %2859  ;;  %v2878_v23 = vld [vmem:[#allocation2] sm:$0xfc]  ;;  %v2933_v32 = vrot.slane %v2879_v24, 2  ;;  %v2883_v60 = vld [vmem:[#allocation2 + $0x8] sm:$0xf8] }
 0x838   : > { %2693 = vrot.lane.b32.xlu1 %v2686_v16, %s3915_s11  ;;  %2617 = vrot.lane.b32.xlu2 %v2610_v30, %s3915_s11  ;;  %2868 = vst.msk [vmem:[#allocation2 + $0x10] sm:$0xff] %vm465_vm7, %v2860_v17  ;;  %v2930_v29 = vrot.slane %v2878_v23, 2  ;;  %v2872_v1 = vld [vmem:[#allocation2] sm:$0xfe]  ;;  %v3104_v4 = vrot.slane %v2883_v60, 3  ;;  %v3688_v24 = vld [vmem:[%s5931_s5 + $0xe8] sm:$0xff] }
 0x839   : > { %2869 = vst.msk [vmem:[#allocation2 + $0x18] sm:$0xff] %vm467_vm8, %v2860_v17  ;;  %3862 = vrot.lane.b32.xlu0 %v3861_v20, %s3915_s11  ;;  %v2882_v2 = vld [vmem:[#allocation2] sm:$0xf8]  ;;  %v2873_v5 = vld [vmem:[#allocation2 + $0x8] sm:$0xfe]  ;;  %v3006_v7 = vrot.slane %v2872_v1, 1 }
 0x83a   : > { %v3101_v8 = vrot.slane %v2882_v2, 3  ;;  %v3009_v9 = vrot.slane %v2873_v5, 1  ;;  %v3691_v30 = vld [vmem:[%s5931_s5 + $0x100] sm:$0xff]  ;;  %v2572_v17 = vld [vmem:[%s5931_s5 + $0x70] sm:$0xff]  ;;  %v3690_v20 = vld [vmem:[%s5931_s5 + $0xf8] sm:$0xff] }
 0x83b   : > { %2628 = vmatpush.msra.mxu0 %v3691_v30  ;;  %2704 = vmatpush.msrb.mxu3 %v2572_v17  ;;  %v2570_v23 = vld [vmem:[%s5931_s5 + $0x60] sm:$0xff]  ;;  %v2560_v60 = vld [vmem:[%s5931_s5 + $0x10] sm:$0xff]  ;;  %v2559_v1 = vld [vmem:[%s5931_s5 + $0x8] sm:$0xff] }
 0x83c   : > { %v3710_v2 = vld [vmem:[%s5931_s5 + $0x178] sm:$0xff]  ;;  %v3709_v5 = vld [vmem:[%s5931_s5 + $0x170] sm:$0xff] }
 0x83d   : > { %2629 = vmatpush.msra.mxu0 %v3690_v20  ;;  %2705 = vmatpush.msrb.mxu3 %v2571_v22  ;;  %v3701_v30 = vld [vmem:[%s5931_s5 + $0x130] sm:$0xff]  ;;  %v3700_v20 = vld [vmem:[%s5931_s5 + $0x128] sm:$0xff] }
 0x83e   : > { %v3739_v17 = vld [vmem:[%s5931_s5 + $0x250] sm:$0xff]  ;;  %v3738_v22 = vld [vmem:[%s5931_s5 + $0x248] sm:$0xff] }
 0x83f   : > { %v5517_v26 = vld [vmem:[#allocation2 + $0x10] sm:$0xff]  ;;  %2630 = vmatpush.msra.mxu0 %v3689_v43  ;;  %2706 = vmatpush.msrb.mxu3 %v2570_v23  ;;  %v3699_v43 = vld [vmem:[%s5931_s5 + $0x120] sm:$0xff] }
 0x840   : > { %2784 = vrot.lane.b32.xlu1 %v2777_v52, %s3915_s11  ;;  %v5520_v27 = vld [vmem:[#allocation2 + $0x18] sm:$0xff]  ;;  %v2931_v31 = vrot.slane %v5517_v26, 2  ;;  %v3007_v3 = vrot.slane %v5517_v26, 1  ;;  %v3102_v59 = vrot.slane %v5517_v26, 3  ;;  %v3687_v52 = vld [vmem:[%s5931_s5 + $0xe0] sm:$0xff]  ;;  %v2568_v26 = vld [vmem:[%s5931_s5 + $0x50] sm:$0xff] }
 0x841   : > { %v2934_v34 = vrot.slane %v5520_v27, 2  ;;  %v3105_v62 = vrot.slane %v5520_v27, 3  ;;  %v3010_v11 = vrot.slane %v5520_v27, 1  ;;  %2631 = vmatpush.msra.mxu0 %v3688_v24  ;;  %2707 = vmatpush.msrb.mxu3 %v2569_v44  ;;  %v3686_v27 = vld [vmem:[%s5931_s5 + $0xd8] sm:$0xff]  ;;  %v3737_v23 = vld [vmem:[%s5931_s5 + $0x240] sm:$0xff] }
 0x842   : > { %v2932_v36 = vsel %vm526_vm10, %v2930_v29, %v2931_v31  ;;  %v2937_v51 = vsel %vm526_vm10, %v2931_v31, %v2936_v46  ;;  %v3008_v18 = vsel %vm499_vm9, %v3006_v7, %v3007_v3  ;;  %v3103_v0 = vsel %vm653_vm11, %v3101_v8, %v3102_v59  ;;  %v3685_v29 = vld [vmem:[%s5931_s5 + $0xd0] sm:$0xff]  ;;  %v2566_v31 = vld [vmem:[%s5931_s5 + $0x40] sm:$0xff]  ;;  %v3708_v8 = vld [vmem:[%s5931_s5 + $0x168] sm:$0xff] }
 0x843   : > { %v2935_v37 = vsel %vm526_vm10, %v2933_v32, %v2934_v34  ;;  %v3866_v55 = vpack.i.bf16 %v2932_v36, %v2774_v35  ;;  %v2939_v57 = vsel %vm526_vm10, %v2934_v34, %v2938_v53  ;;  %v3871_v45 = vpack.i.bf16 %v2937_v51, %v2779_v54  ;;  %2632 = vmatpush.msra.mxu0 %v3687_v52  ;;  %v2575_v32 = vld [vmem:[%s5931_s5 + $0x88] sm:$0xff]  ;;  %v2574_v35 = vld [vmem:[%s5931_s5 + $0x80] sm:$0xff]  ;;  %v2565_v36 = vld [vmem:[%s5931_s5 + $0x38] sm:$0xff] }
 0x844   : > { %2942 = vrot.lane.b32.xlu2 %v2935_v37, %s3915_s11  ;;  %v3106_v10 = vsel %vm653_vm11, %v3104_v4, %v3105_v62  ;;  %v3011_v63 = vsel %vm499_vm9, %v3009_v9, %v3010_v11  ;;  %v3876_v19 = vpack.i.bf16 %v3008_v18, %v3103_v0  ;;  %v3110_v15 = vsel %vm653_vm11, %v3105_v62, %v3109_v13  ;;  %v3684_v34 = vld [vmem:[%s5931_s5 + $0xc8] sm:$0xff]  ;;  %v3714_v37 = vld [vmem:[%s5931_s5 + $0x198] sm:$0xff]  ;;  %v3713_v46 = vld [vmem:[%s5931_s5 + $0x190] sm:$0xff] }
 0x845   : > { %3867 = vrot.lane.b32.xlu0 %v3866_v55, %s3915_s11  ;;  %v3015_v61 = vsel %vm499_vm9, %v3010_v11, %v3014_v49  ;;  %v3108_v58 = vsel %vm653_vm11, %v3102_v59, %v3107_v50  ;;  %v3013_v16 = vsel %vm499_vm9, %v3007_v3, %v3012_v21  ;;  %2708 = vmatpush.msrb.mxu3 %v2568_v26  ;;  %v3752_v55 = vld [vmem:[%s5931_s5 + $0x2b8] sm:$0xff]  ;;  %v3712_v51 = vld [vmem:[%s5931_s5 + $0x188] sm:$0xff]  ;;  %v3679_v54 = vld [vmem:[%s5931_s5 + $0xa0] sm:$0xff] }
 0x846   : > { %2633 = vmatpush.msra.mxu0 %v3686_v27  ;;  %2740 = vmatpush.msrb.mxu1 %v2575_v32  ;;  %v3750_v53 = vld [vmem:[%s5931_s5 + $0x2a8] sm:$0xff]  ;;  %v3678_v62 = vld [vmem:[%s5931_s5 + $0x98] sm:$0xff]  ;;  %v3677_v59 = vld [vmem:[%s5931_s5 + $0x90] sm:$0xff] }
 0x847   : > { %2709 = vmatpush.msrb.mxu3 %v2567_v28  ;;  %2798 = vmatpush.msrb.mxu2 %v3714_v37  ;;  %v3748_v3 = vld [vmem:[%s5931_s5 + $0x298] sm:$0xff]  ;;  %v2558_v4 = vld [vmem:[%s5931_s5] sm:$0xff]  ;;  %v3747_v7 = vld [vmem:[%s5931_s5 + $0x290] sm:$0xff] }
 0x848   : > { %2788 = vrot.lane.b32.xlu1 %v2781_v33, %s3915_s11  ;;  %2634 = vmatpush.msra.mxu0 %v3685_v29  ;;  %v3680_v33 = vld [vmem:[%s5931_s5 + $0xa8] sm:$0xff]  ;;  %v3707_v9 = vld [vmem:[%s5931_s5 + $0x160] sm:$0xff]  ;;  %v3706_v13 = vld [vmem:[%s5931_s5 + $0x158] sm:$0xff] }
 0x849   : > { %2710 = vmatpush.msrb.mxu3 %v2566_v31  ;;  %2741 = vmatpush.msrb.mxu1 %v2574_v35  ;;  %v3716_v11 = vld [vmem:[%s5931_s5 + $0x1a8] sm:$0xff]  ;;  %v3702_v21 = vld [vmem:[%s5931_s5 + $0x138] sm:$0xff]  ;;  %v3735_v29 = vld [vmem:[%s5931_s5 + $0x230] sm:$0xff] }
 0x84a   : > { %2635 = vmatpush.msra.mxu0 %v3684_v34  ;;  %2799 = vmatpush.msrb.mxu2 %v3713_v46  ;;  %v3754_v18 = vld [vmem:[%s5931_s5 + $0x2c8] sm:$0xff]  ;;  %v3736_v24 = vld [vmem:[%s5931_s5 + $0x238] sm:$0xff]  ;;  %v3773_v37 = vld [vmem:[%s5931_s5 + $0x340] sm:$0xff] }
 0x84b   : > { %2711 = vmatpush.msrb.mxu3 %v2565_v36  ;;  %2956 = vmatpush.msra.mxu1 %v3752_v55  ;;  %v3704_v49 = vld [vmem:[%s5931_s5 + $0x148] sm:$0xff]  ;;  %v3776_v26 = vld [vmem:[%s5931_s5 + $0x358] sm:$0xff]  ;;  %v3733_v36 = vld [vmem:[%s5931_s5 + $0x220] sm:$0xff] }
 0x84c   : > { %2946 = vrot.lane.b32.xlu2 %v2939_v57, %s3915_s11  ;;  %2636 = vmatpush.msra.mxu0 %v3683_v38  ;;  %v3711_v57 = vld [vmem:[%s5931_s5 + $0x180] sm:$0xff]  ;;  %v3742_v50 = vld [vmem:[%s5931_s5 + $0x268] sm:$0xff]  ;;  %v3732_v55 = vld [vmem:[%s5931_s5 + $0x218] sm:$0xff] }
 0x84d   : > { %3872 = vrot.lane.b32.xlu0 %v3871_v45, %s3915_s11  ;;  %2712 = vmatpush.msrb.mxu3 %v2564_v39  ;;  %v3749_v45 = vld [vmem:[%s5931_s5 + $0x2a0] sm:$0xff]  ;;  %v3734_v31 = vld [vmem:[%s5931_s5 + $0x228] sm:$0xff]  ;;  %v3772_v38 = vld [vmem:[%s5931_s5 + $0x338] sm:$0xff] }
 0x84e   : > { %2637 = vmatpush.msra.mxu0 %v3682_v40  ;;  %2957 = vmatpush.msra.mxu1 %v3751_v56  ;;  %v3774_v32 = vld [vmem:[%s5931_s5 + $0x348] sm:$0xff]  ;;  %v3775_v40 = vld [vmem:[%s5931_s5 + $0x350] sm:$0xff] }
 0x84f   : > { %2713 = vmatpush.msrb.mxu3 %v2563_v25  ;;  %2800 = vmatpush.msrb.mxu2 %v3712_v51 }
 0x850   : > { %3113 = vrot.lane.b32.xlu1 %v3106_v10, %s3915_s11  ;;  %2638 = vmatpush.msra.mxu0 %v3681_v41  ;;  %v3746_v10 = vld [vmem:[%s5931_s5 + $0x288] sm:$0xff]  ;;  %v3731_v41 = vld [vmem:[%s5931_s5 + $0x210] sm:$0xff] }
 0x851   : > { %2714 = vmatpush.msrb.mxu3 %v2562_v42  ;;  %2958 = vmatpush.msra.mxu1 %v3750_v53  ;;  %v3771_v42 = vld [vmem:[%s5931_s5 + $0x330] sm:$0xff] }
 0x852   : > { %2639 = vmatpush.msra.mxu0 %v3680_v33  ;;  %2801 = vmatpush.msrb.mxu2 %v3711_v57  ;;  %v3730_v33 = vld [vmem:[%s5931_s5 + $0x208] sm:$0xff]  ;;  %v3728_v57 = vld [vmem:[%s5931_s5 + $0x1f8] sm:$0xff] }
 0x853   : > { %2715 = vmatpush.msrb.mxu3 %v2561_v48  ;;  %2959 = vmatpush.msra.mxu1 %v3749_v45  ;;  %v3770_v48 = vld [vmem:[%s5931_s5 + $0x328] sm:$0xff]  ;;  %v3768_v45 = vld [vmem:[%s5931_s5 + $0x318] sm:$0xff] }
 0x854   : > { %3018 = vrot.lane.b32.xlu2 %v3011_v63, %s3915_s11  ;;  %2640 = vmatpush.msra.mxu0 %v3679_v54  ;;  %v3715_v63 = vld [vmem:[%s5931_s5 + $0x1a0] sm:$0xff] }
 0x855   : > { %3877 = vrot.lane.b32.xlu0 %v3876_v19, %s3915_s11  ;;  %2716 = vmatpush.msrb.mxu3 %v2560_v60  ;;  %v3753_v19 = vld [vmem:[%s5931_s5 + $0x2c0] sm:$0xff] }
 0x856   : > { %2641 = vmatpush.msra.mxu0 %v3678_v62  ;;  %2802 = vmatpush.msrb.mxu2 %v3710_v2  ;;  %v3729_v54 = vld [vmem:[%s5931_s5 + $0x200] sm:$0xff]  ;;  %v3727_v62 = vld [vmem:[%s5931_s5 + $0x1f0] sm:$0xff] }
 0x857   : > { %2717 = vmatpush.msrb.mxu3 %v2559_v1  ;;  %2960 = vmatpush.msra.mxu1 %v3748_v3  ;;  %v3769_v60 = vld [vmem:[%s5931_s5 + $0x320] sm:$0xff]  ;;  %v3767_v1 = vld [vmem:[%s5931_s5 + $0x310] sm:$0xff] }
 0x858   : > { %3117 = vrot.lane.b32.xlu1 %v3110_v15, %s3915_s11  ;;  %2642 = vmatpush.msra.mxu0 %v3677_v59  ;;  %v3705_v15 = vld [vmem:[%s5931_s5 + $0x150] sm:$0xff]  ;;  %v3726_v59 = vld [vmem:[%s5931_s5 + $0x1e8] sm:$0xff] }
 0x859   : > { %2718 = vmatpush.msrb.mxu3 %v2558_v4  ;;  %2803 = vmatpush.msrb.mxu2 %v3709_v5  ;;  %v3766_v4 = vld [vmem:[%s5931_s5 + $0x308] sm:$0xff] }
 0x85a   : > { %2961 = vmatpush.msra.mxu1 %v3747_v7  ;;  %2835 = vmatpush.msrb.mxu0 %v3716_v11  ;;  %v3725_v7 = vld [vmem:[%s5931_s5 + $0x1e0] sm:$0xff] }
 0x85b   : > { %2804 = vmatpush.msrb.mxu2 %v3708_v8  ;;  %2993 = vmatpush.msra.mxu3 %v3754_v18  ;;  %v3765_v8 = vld [vmem:[%s5931_s5 + $0x300] sm:$0xff]  ;;  %v3724_v18 = vld [vmem:[%s5931_s5 + $0x1d8] sm:$0xff] }
 0x85c   : > { %3022 = vrot.lane.b32.xlu2 %v3015_v61, %s3915_s11  ;;  %2962 = vmatpush.msra.mxu1 %v3746_v10 }
 0x85d   : > { %3115 = vrot.lane.b32.xlu0 %v3108_v58, %s3915_s11  ;;  %2805 = vmatpush.msrb.mxu2 %v3707_v9  ;;  %v3703_v58 = vld [vmem:[%s5931_s5 + $0x140] sm:$0xff] }
 0x85e   : > { %2836 = vmatpush.msrb.mxu0 %v3715_v63  ;;  %2963 = vmatpush.msra.mxu1 %v3745_v12  ;;  %v3723_v63 = vld [vmem:[%s5931_s5 + $0x1d0] sm:$0xff] }
 0x85f   : > { %2994 = vmatpush.msra.mxu3 %v3753_v19  ;;  %2806 = vmatpush.msrb.mxu2 %v3706_v13  ;;  %v3763_v19 = vld [vmem:[%s5931_s5 + $0x2f0] sm:$0xff]  ;;  %v3722_v13 = vld [vmem:[%s5931_s5 + $0x1c8] sm:$0xff] }
 0x860   : > { %2964 = vmatpush.msra.mxu1 %v3744_v14  ;;  %v3762_v14 = vld [vmem:[%s5931_s5 + $0x2e8] sm:$0xff] }
 0x861   : > { %2807 = vmatpush.msrb.mxu2 %v3705_v15 }
 0x862   : > { %2965 = vmatpush.msra.mxu1 %v3743_v47 }
 0x863   : > { %2808 = vmatpush.msrb.mxu2 %v3704_v49 }
 0x864   : > { %2966 = vmatpush.msra.mxu1 %v3742_v50  ;;  %v3721_v50 = vld [vmem:[%s5931_s5 + $0x1c0] sm:$0xff] }
 0x865   : > { %3020 = vrot.lane.b32.xlu0 %v3013_v16, %s3915_s11  ;;  %2809 = vmatpush.msrb.mxu2 %v3703_v58  ;;  %v3740_v16 = vld [vmem:[%s5931_s5 + $0x258] sm:$0xff] }
 0x866   : > { %2967 = vmatpush.msra.mxu1 %v3741_v6 }
 0x867   : > { %2810 = vmatpush.msrb.mxu2 %v3702_v21  ;;  %v3720_v21 = vld [vmem:[%s5931_s5 + $0x1b8] sm:$0xff] }
 0x868   : > { %2968 = vmatpush.msra.mxu1 %v3740_v16  ;;  %v3760_v16 = vld [vmem:[%s5931_s5 + $0x2d8] sm:$0xff] }
 0x869   : > { %2811 = vmatpush.msrb.mxu2 %v3701_v30 }
 0x86a   : > { %2969 = vmatpush.msra.mxu1 %v3739_v17 }
 0x86b   : > { %2812 = vmatpush.msrb.mxu2 %v3700_v20  ;;  %v3719_v20 = vld [vmem:[%s5931_s5 + $0x1b0] sm:$0xff] }
 0x86c   : > { %2970 = vmatpush.msra.mxu1 %v3738_v22  ;;  %v3759_v22 = vld [vmem:[%s5931_s5 + $0x2d0] sm:$0xff] }
 0x86d   : > { %2813 = vmatpush.msrb.mxu2 %v3699_v43 }
 0x86e   : > { %2971 = vmatpush.msra.mxu1 %v3737_v23 }
 0x88a   : > { %v2614_v0 = vpop.permute.xlu2 %2613 }
 0x88b   : > { %3695 = vmatmul.msk.f32.vlgmr.msra.gmra.mxu2 %vm467_vm8, %v2614_v0 }
 0x88c   : > { %3069 = vmatpush.msra.mxu2 %v3736_v24 }
 0x88e   : > { %3070 = vmatpush.msra.mxu2 %v3735_v29 }
 0x892   : > { %v5744_v61 = vpop.permute.xlu2 %2617 }
 0x893   : > { %3696 = vmatmul.msk.f32.gmra.mxu2 %vm467_vm8, %v5744_v61 }
 0x89e   : > { %v2943_v2 = vpop.permute.xlu2 %2942 }
 0x8a2   : > { %v2690_v44 = vpop.permute.xlu1 %2689 }
 0x8a3   : > { %3697 = vmatmul.msk.f32.vlgmr.msrb.gmra.mxu1 %vm467_vm8, %v2690_v44  ;;  %v3858_v52 = vpop.permute.xlu0 %3857 }
 0x8a4   : > { %v3860_v27 = vunpack.i.h.bf16 %v3858_v52  ;;  %v3859_v28 = vunpack.i.l.bf16 %v3858_v52  ;;  %3164 = vmatpush.msrb.mxu1 %v3776_v26 }
 0x8a6   : > { %v2619_v34 = vsel %vm567_vm13, %v3860_v27, %v2614_v0  ;;  %v2695_v35 = vsel %vm567_vm13, %v3859_v28, %v2690_v44  ;;  %3165 = vmatpush.msrb.mxu1 %v3775_v40  ;;  %v3764_v0 = vld [vmem:[%s5931_s5 + $0x2f8] sm:$0xff]  ;;  %v2947_v15 = vpop.permute.xlu2 %2946 }
 0x8a7   : > { %2643 = vmatmul.f32.vlgmr.msra.gmra.mxu0 %v2619_v34  ;;  %2719 = vmatmul.f32.vlgmr.msrb.gmra.mxu3 %v2695_v35 }
 0x8a8   : > { %3032 = vmatpush.msra.mxu0 %v3734_v31  ;;  %3127 = vmatpush.msrb.mxu3 %v3774_v32 }
 0x8aa   : > { %v2694_v39 = vpop.permute.xlu1 %2693  ;;  %3033 = vmatpush.msra.mxu0 %v3733_v36  ;;  %3128 = vmatpush.msrb.mxu3 %v3773_v37 }
 0x8ab   : > { %3698 = vmatmul.msk.f32.gmra.mxu1 %vm467_vm8, %v2694_v39  ;;  %v3863_v25 = vpop.permute.xlu0 %3862 }
 0x8ac   : > { %v3865_v46 = vunpack.i.h.bf16 %v3863_v25  ;;  %v3864_v56 = vunpack.i.l.bf16 %v3863_v25  ;;  %3034 = vmatpush.msra.mxu0 %v3732_v55  ;;  %3129 = vmatpush.msrb.mxu3 %v3772_v38 }
 0x8ae   : > { %v2620_v51 = vsel %vm567_vm13, %v3865_v46, %v5744_v61  ;;  %v2696_v53 = vsel %vm567_vm13, %v3864_v56, %v2694_v39  ;;  %3035 = vmatpush.msra.mxu0 %v3731_v41  ;;  %3130 = vmatpush.msrb.mxu3 %v3771_v42  ;;  %v3761_v61 = vld [vmem:[%s5931_s5 + $0x2e0] sm:$0xff]  ;;  %v3019_v23 = vpop.permute.xlu2 %3018 }
 0x8af   : > { %2646 = vmatmul.f32.gmra.mxu0 %v2620_v51  ;;  %2722 = vmatmul.f32.gmra.mxu3 %v2696_v53 }
 0x8b0   : > { %3036 = vmatpush.msra.mxu0 %v3730_v33  ;;  %3131 = vmatpush.msrb.mxu3 %v3770_v48 }
 0x8b2   : > { %3037 = vmatpush.msra.mxu0 %v3729_v54  ;;  %3132 = vmatpush.msrb.mxu3 %v3769_v60  ;;  %v2785_v3 = vpop.permute.xlu1 %2784  ;;  %v3886_v60 = vld [vmem:[%s5932_s6] ss:$0 sm:$0xff] }
 0x8b4   : > { %3038 = vmatpush.msra.mxu0 %v3728_v57  ;;  %3133 = vmatpush.msrb.mxu3 %v3768_v45 }
 0x8b6   : > { %3039 = vmatpush.msra.mxu0 %v3727_v62  ;;  %3134 = vmatpush.msrb.mxu3 %v3767_v1  ;;  %v3023_v29 = vpop.permute.xlu2 %3022 }
 0x8b7   : > { %v3868_v5 = vpop.permute.xlu0 %3867  ;;  %3717 = vmatmul.msk.f32.vlgmr.msrb.gmra.mxu0 %vm467_vm8, %v2785_v3  ;;  %3755 = vmatmul.msk.f32.vlgmr.msra.gmra.mxu3 %vm467_vm8, %v2943_v2 }
 0x8b8   : > { %v3870_v10 = vunpack.i.h.bf16 %v3868_v5  ;;  %v3869_v11 = vunpack.i.l.bf16 %v3868_v5  ;;  %3040 = vmatpush.msra.mxu0 %v3726_v59  ;;  %3135 = vmatpush.msrb.mxu3 %v3766_v4 }
 0x8ba   : > { %v2790_v9 = vsel %vm567_vm13, %v3869_v11, %v2785_v3  ;;  %v2948_v12 = vsel %vm567_vm13, %v3870_v10, %v2943_v2  ;;  %3041 = vmatpush.msra.mxu0 %v3725_v7  ;;  %3136 = vmatpush.msrb.mxu3 %v3765_v8  ;;  %v2789_v47 = vpop.permute.xlu1 %2788 }
 0x8bb   : > { %2814 = vmatmul.f32.vlgmr.msrb.gmra.mxu2 %v2790_v9  ;;  %2972 = vmatmul.f32.vlgmr.msra.gmra.mxu1 %v2948_v12 }
 0x8bc   : > { %3042 = vmatpush.msra.mxu0 %v3724_v18  ;;  %3137 = vmatpush.msrb.mxu3 %v3764_v0 }
 0x8be   : > { %3043 = vmatpush.msra.mxu0 %v3723_v63  ;;  %3138 = vmatpush.msrb.mxu3 %v3763_v19 }
 0x8bf   : > { %v3873_v49 = vpop.permute.xlu0 %3872  ;;  %3718 = vmatmul.msk.f32.gmra.mxu0 %vm467_vm8, %v2789_v47  ;;  %3756 = vmatmul.msk.f32.gmra.mxu3 %vm467_vm8, %v2947_v15 }
 0x8c0   : > { %v3875_v58 = vunpack.i.h.bf16 %v3873_v49  ;;  %v3874_v6 = vunpack.i.l.bf16 %v3873_v49  ;;  %3044 = vmatpush.msra.mxu0 %v3722_v13  ;;  %3139 = vmatpush.msrb.mxu3 %v3762_v14  ;;  %v3887_v14 = vld [vmem:[%s5932_s6 + $0x1] ss:$0 sm:$0xff] }
 0x8c2   : > { %v2791_v30 = vsel %vm567_vm13, %v3874_v6, %v2789_v47  ;;  %v2949_v17 = vsel %vm567_vm13, %v3875_v58, %v2947_v15  ;;  %3045 = vmatpush.msra.mxu0 %v3721_v50  ;;  %3140 = vmatpush.msrb.mxu3 %v3761_v61  ;;  %v3114_v24 = vpop.permute.xlu1 %3113 }
 0x8c3   : > { %2817 = vmatmul.f32.gmra.mxu2 %v2791_v30  ;;  %2975 = vmatmul.f32.gmra.mxu1 %v2949_v17 }
 0x8c4   : > { %3046 = vmatpush.msra.mxu0 %v3720_v21  ;;  %3141 = vmatpush.msrb.mxu3 %v3760_v16 }
 0x8c6   : > { %3047 = vmatpush.msra.mxu0 %v3719_v20  ;;  %3142 = vmatpush.msrb.mxu3 %v3759_v22 }
 0x8c7   : > { %v3878_v43 = vpop.permute.xlu0 %3877 }
 0x8c8   : > { %v3880_v44 = vunpack.i.h.bf16 %v3878_v43  ;;  %v3879_v52 = vunpack.i.l.bf16 %v3878_v43 }
 0x8ca   : > { %v3024_v26 = vsel %vm567_vm13, %v3880_v44, %v3019_v23  ;;  %v3119_v27 = vsel %vm567_vm13, %v3879_v52, %v3114_v24  ;;  %v3118_v31 = vpop.permute.xlu1 %3117 }
 0x8cb   : > { %3048 = vmatmul.f32.vlgmr.msra.gmra.mxu0 %v3024_v26  ;;  %3757 = vmatmul.msk.f32.vlgmr.msra.gmra.mxu2 %vm467_vm8, %v3019_v23 }
 0x8cc   : > { %3143 = vmatmul.f32.vlgmr.msrb.gmra.mxu3 %v3119_v27  ;;  %3777 = vmatmul.msk.f32.vlgmr.msrb.gmra.mxu1 %vm467_vm8, %v3114_v24 }
 0x8cf   : > { %v3116_v28 = vpop.permute.xlu0 %3115 }
 0x8d0   : > { %v3120_v32 = vsel %vm567_vm13, %v3116_v28, %v3118_v31 }
 0x8d3   : > { %3758 = vmatmul.msk.f32.gmra.mxu2 %vm467_vm8, %v3023_v29 }
 0x8d4   : > { %3146 = vmatmul.f32.gmra.mxu3 %v3120_v32  ;;  %3778 = vmatmul.msk.f32.gmra.mxu1 %vm467_vm8, %v3118_v31 }
 0x8d7   : > { %v3021_v34 = vpop.permute.xlu0 %3020 }
 0x8d8   : > { %v3025_v35 = vsel %vm567_vm13, %v3021_v34, %v3023_v29 }
 0x8d9   : > { %3051 = vmatmul.f32.gmra.mxu0 %v3025_v35 }
 0x90e   : > { %v2667_v38 = vpop.f32.mrf.mxu2 }
 0x916   : > { %v2670_v41 = vpop.f32.mrf.mxu2 }
 0x920   : > { %v2743_v37 = vpop.f32.mrf.mxu1 }
 0x924   : > { %v2644_v36 = vpop.f32.mrf.mxu0 }
 0x925   : > { %v2668_v46 = vadd.f32 %v2667_v38, %v2644_v36 }
 0x928   : > { %v2746_v40 = vpop.f32.mrf.mxu1 }
 0x92a   : > { %v2720_v55 = vpop.f32.mrf.mxu3 }
 0x92b   : > { %v2721_v33 = vadd.f32 %v2720_v55, %v2668_v46 }
 0x92c   : > { %v2647_v39 = vpop.f32.mrf.mxu0 }
 0x92d   : > { %v2744_v53 = vadd.f32 %v2743_v37, %v2721_v33  ;;  %v2671_v57 = vadd.f32 %v2670_v41, %v2647_v39 }
 0x932   : > { %v2723_v25 = vpop.f32.mrf.mxu3 }
 0x933   : > { %v2724_v1 = vadd.f32 %v2723_v25, %v2671_v57 }
 0x934   : > { %v2838_v42 = vpop.f32.mrf.mxu0 }
 0x935   : > { %v2747_v4 = vadd.f32 %v2746_v40, %v2724_v1 }
 0x938   : > { %v2973_v56 = vpop.f32.mrf.mxu1 }
 0x93a   : > { %v2996_v48 = vpop.f32.mrf.mxu3 }
 0x93b   : > { %v2997_v11 = vadd.f32 %v2996_v48, %v2973_v56 }
 0x93c   : > { %v2841_v62 = vpop.f32.mrf.mxu0 }
 0x93e   : > { %v2815_v51 = vpop.f32.mrf.mxu2 }
 0x93f   : > { %v2839_v54 = vadd.f32 %v2838_v42, %v2815_v51 }
 0x940   : > { %v2976_v3 = vpop.f32.mrf.mxu1 }
 0x941   : > { %v2844_v45 = vadd.f32 %v2839_v54, %v2744_v53 }
 0x942   : > { %v2999_v5 = vpop.f32.mrf.mxu3 }
 0x943   : > { %v2850_v2 = vadd.f32 %v3886_v60, %v2844_v45  ;;  %v3000_v49 = vadd.f32 %v2999_v5, %v2976_v3 }
 0x945   : > { %3182 = vst [vmem:[%s396_s12] sm:$0xff] %v2850_v2 }
 0x946   : > { %v2818_v59 = vpop.f32.mrf.mxu2 }
 0x947   : > { %v2842_v7 = vadd.f32 %v2841_v62, %v2818_v59 }
 0x948   : > { %v3049_v10 = vpop.f32.mrf.mxu0 }
 0x949   : > { %v2845_v8 = vadd.f32 %v2842_v7, %v2747_v4  ;;  %v3050_v0 = vadd.f32 %v3049_v10, %v2997_v11  ;;  %v3167_v9 = vpop.f32.mrf.mxu1 }
 0x94b   : > { %v2851_v18 = vadd.f32 %v3886_v60, %v2845_v8 }
 0x94d   : > { %3183 = vst [vmem:[%s396_s12 + $0x8] sm:$0xff] %v2851_v18 }
 0x94e   : > { %v3072_v12 = vpop.f32.mrf.mxu2 }
 0x94f   : > { %v3073_v63 = vadd.f32 %v3072_v12, %v3050_v0  ;;  %v3144_v19 = vpop.f32.mrf.mxu3 }
 0x950   : > { %v3168_v13 = vadd.f32 %v3167_v9, %v3144_v19 }
 0x951   : > { %v3170_v6 = vpop.f32.mrf.mxu1 }
 0x952   : > { %v3173_v15 = vadd.f32 %v3168_v13, %v3073_v63 }
 0x954   : > { %v3180_v47 = vadd.f32 %v3887_v14, %v3173_v15 }
 0x956   : > { %3184 = vst [vmem:[%s391_s19] sm:$0xff] %v3180_v47  ;;  %v3052_v50 = vpop.f32.mrf.mxu0  ;;  %v3075_v21 = vpop.f32.mrf.mxu2 }
 0x957   : > { %v3053_v61 = vadd.f32 %v3052_v50, %v3000_v49  ;;  %v3147_v58 = vpop.f32.mrf.mxu3 }
 0x958   : > { %v3171_v30 = vadd.f32 %v3170_v6, %v3147_v58 }
 0x959   : > { %v3076_v16 = vadd.f32 %v3075_v21, %v3053_v61 }
 0x95b   : > { %v3174_v17 = vadd.f32 %v3171_v30, %v3076_v16 }
 0x95d   : > { %v3181_v20 = vadd.f32 %v3887_v14, %v3174_v17 }
 0x95f   : > { %3185 = vst [vmem:[%s391_s19 + $0x8] sm:$0xff] %v3181_v20 }
 0x960 PF: > { %s21_s13 = sadd.s32 1, %s3910_s13  }
 0x961   : > { %p18_p4 = scmp.ge.s32.totalorder %s21_s13, 4  }
 0x963   :  { %20 = sbr.rel (!%p18_p4) target bundleno = 1 (0x1), region = 140 }

</bundles_post_ra>
